<compile_context>
chip_gen: v6e
topology: v6e:2x2x1
jax: 0.10.0
libtpu: 0.0.40
codegen_flags: <defaults>
</compile_context>

<pallas_src>
import functools

import jax
import jax.numpy as jnp
from jax.experimental import pallas as pl
from jax.experimental.pallas import tpu as pltpu


TM_MAX = 4096   # lane-axis (flat B*H*W) tile cap; per-step VMEM stays < ~3 MiB
HALO = 128      # halo block width; covers the max tap shift 2*W + 2 (needs W <= 62)


def _cdiv(a, b):
    return -(-a // b)


def _round_up(x, m):
    return _cdiv(x, m) * m


def _tiling(M):
    """Pick (tm, mpad, ntiles): >=2 even-count lane tiles when possible (v7x
    2-TC sharding + pipelining), <128 lanes of padding per tile."""
    ntiles = max(1, _cdiv(M, TM_MAX))
    if M > 128:
        ntiles = max(2, ntiles)
    if ntiles > 1 and ntiles % 2:
        ntiles += 1
    tm = _round_up(_cdiv(M, ntiles), 128)
    return tm, tm * ntiles, ntiles


# ----------------------------------------------------------------------------
# Pallas kernel: full-resolution 3x3 conv (stride 1) + bias + ReLU on a flat
# lane tile.  The M = B*H*W axis rides the 128-lane axis; every tap (kh, kw)
# of the 3x3 window is a lane shift d = kh*W + kw of the resident tile, so no
# patch matrix is ever materialized in HBM.
#   w_ref    : (9, Cout, Cin) bf16   tap-major folded weights (VMEM-resident)
#   b_ref    : (Cout, 1)      f32    bias (lane-broadcast)
#   x_ref    : (Cin, tm)      bf16   flat activation tile
#   halo_ref : (Cin, 128)     bf16   next 128 lanes (covers tap shifts <= 2W+2)
#   o_ref    : (Cout, tm)     bf16   full-resolution response tile
# ----------------------------------------------------------------------------
def _conv3x3_relu_kernel(w_ref, b_ref, x_ref, halo_ref, o_ref, *, taps, tm):
    xx = jnp.concatenate([x_ref[...], halo_ref[...]], axis=1)   # (Cin, tm + HALO)
    acc = None
    for t, d in enumerate(taps):
        xs = xx[:, d:d + tm]                                    # lane-shifted tap slab
        part = jnp.dot(w_ref[t], xs, preferred_element_type=jnp.float32)
        acc = part if acc is None else acc + part
    acc = acc + b_ref[...]                                      # (Cout, 1) broadcast
    o_ref[...] = jnp.maximum(acc, 0.0).astype(o_ref.dtype)


def conv3x3_relu(x_cbhw, w_hwio, b, stride):
    """PyTorch Conv2d(k=3, VALID, stride) + ReLU in (C, B, H, W) layout, bf16 out."""
    Cin, B, H, W = x_cbhw.shape
    Cout = w_hwio.shape[3]
    assert H >= 3 and W >= 3 and 2 * W + 2 <= HALO
    Ho = (H - 3) // stride + 1
    Wo = (W - 3) // stride + 1

    M = B * H * W
    tm, mpad, ntiles = _tiling(M)
    halo_blocks_per_tile = tm // HALO

    # Flat bf16 activation, padded so every tile's 128-lane halo block exists.
    x_flat = jnp.pad(x_cbhw.reshape(Cin, M).astype(jnp.bfloat16),
                     ((0, 0), (0, mpad + HALO - M)))
    # HWIO -> (tap = kh*3+kw, Cout, Cin), matching the tap-shift enumeration below.
    w_taps = (jnp.transpose(w_hwio, (0, 1, 3, 2))
              .reshape(9, Cout, Cin).astype(jnp.bfloat16))
    taps = tuple(kh * W + kw for kh in range(3) for kw in range(3))

    out = pl.pallas_call(
        functools.partial(_conv3x3_relu_kernel, taps=taps, tm=tm),
        out_shape=jax.ShapeDtypeStruct((Cout, mpad), jnp.bfloat16),
        grid_spec=pltpu.PrefetchScalarGridSpec(
            num_scalar_prefetch=0,
            grid=(ntiles,),
            in_specs=[
                pl.BlockSpec((9, Cout, Cin), lambda i: (0, 0, 0)),   # VMEM-resident
                pl.BlockSpec((Cout, 1), lambda i: (0, 0)),           # VMEM-resident
                pl.BlockSpec((Cin, tm), lambda i: (0, i)),           # stream over M
                pl.BlockSpec((Cin, HALO),
                             lambda i: (0, (i + 1) * halo_blocks_per_tile)),
            ],
            out_specs=pl.BlockSpec((Cout, tm), lambda i: (0, i)),
        ),
        compiler_params=pltpu.CompilerParams(
            dimension_semantics=("parallel",),   # independent M tiles (v7x 2-TC shard)
            vmem_limit_bytes=32 * 1024 * 1024,   # safe on v5e/v6e/v7x
        ),
    )(w_taps, b.reshape(Cout, 1).astype(jnp.float32), x_flat, x_flat)

    out = out[:, :M].reshape(Cout, B, H, W)
    # VALID crop + stride subsampling of the full-resolution response.
    return out[:, :, 0:stride * (Ho - 1) + 1:stride,
               0:stride * (Wo - 1) + 1:stride]


def net_forward(x_nchw, params):
    # NCHW -> (C, B, H, W): channels sit on the contraction/sublane side, the
    # flat B*H*W axis stays on the 128-lane axis through every conv kernel.
    x = jnp.transpose(x_nchw, (1, 0, 2, 3)).astype(jnp.bfloat16)
    x = conv3x3_relu(x, params["w1"], params["b1"], stride=1)   # (16, B, 30, 30)
    x = conv3x3_relu(x, params["w2"], params["b2"], stride=2)   # (16, B, 14, 14)
    x = conv3x3_relu(x, params["w3"], params["b3"], stride=1)   # (32, B, 12, 12)
    x = conv3x3_relu(x, params["w4"], params["b4"], stride=2)   # (32, B,  5,  5)
    # Linear(32*5*5 -> 1): left to XLA per perf review (Cout=1 GEMV, not worth a launch).
    # TODO(synk): fuse the full 5-layer net into one VMEM-resident pallas_call
    # gridded over batch tiles (longer-term item from the perf review).
    C, B, H, W = x.shape
    flat = jnp.transpose(x, (1, 0, 2, 3)).reshape(B, C * H * W)  # PyTorch NCHW flatten
    return jnp.dot(flat.astype(jnp.float32), params["fc_w"]) + params["fc_b"]


# ----------------------------------------------------------------------------
# Deterministic parameter initialization (synthetic, not a checkpoint load).
# ----------------------------------------------------------------------------
def init_params(key):
    ks = jax.random.split(key, 10)

    def conv_w(k, cin, cout):
        fan_in = cin * 9
        return (jax.random.normal(k, (3, 3, cin, cout), jnp.float32)
                * (1.0 / jnp.sqrt(fan_in)))

    return {
        "w1": conv_w(ks[0], 3, 16),  "b1": 0.01 * jax.random.normal(ks[1], (16,), jnp.float32),
        "w2": conv_w(ks[2], 16, 16), "b2": 0.01 * jax.random.normal(ks[3], (16,), jnp.float32),
        "w3": conv_w(ks[4], 16, 32), "b3": 0.01 * jax.random.normal(ks[5], (32,), jnp.float32),
        "w4": conv_w(ks[6], 32, 32), "b4": 0.01 * jax.random.normal(ks[7], (32,), jnp.float32),
        "fc_w": jax.random.normal(ks[8], (32 * 5 * 5, 1), jnp.float32) / jnp.sqrt(800.0),
        "fc_b": 0.01 * jax.random.normal(ks[9], (1,), jnp.float32),
    }


# ----------------------------------------------------------------------------
# Pure-JAX reference with matching bf16-operand / f32-accumulate / bf16-store math.
# ----------------------------------------------------------------------------
def _reference_forward(x_nchw, params):
    x = jnp.transpose(x_nchw, (0, 2, 3, 1)).astype(jnp.bfloat16)   # NHWC
    dn = ("NHWC", "HWIO", "NHWC")

    def conv(x, w, b, s):
        y = jax.lax.conv_general_dilated(
            x, w.astype(jnp.bfloat16), (s, s), "VALID",
            dimension_numbers=dn, preferred_element_type=jnp.float32)
        return jax.nn.relu(y + b).astype(jnp.bfloat16)

    x = conv(x, params["w1"], params["b1"], 1)
    x = conv(x, params["w2"], params["b2"], 2)
    x = conv(x, params["w3"], params["b3"], 1)
    x = conv(x, params["w4"], params["b4"], 2)
    flat = jnp.transpose(x, (0, 3, 1, 2)).reshape(x.shape[0], 32 * 5 * 5)
    return jnp.dot(flat.astype(jnp.float32), params["fc_w"]) + params["fc_b"]


if __name__ == "__main__":
    key = jax.random.PRNGKey(0)
    pkey, xkey = jax.random.split(key)
    params = init_params(pkey)
    # Spatial size must be 32 so the flattened feature is 32*5*5 = 800, as the
    # Linear(32*5*5, 1) layer in the PyTorch module requires.
    x = jax.random.normal(xkey, (2, 3, 32, 32), jnp.float32)

    fwd = jax.jit(net_forward)
    out = jax.block_until_ready(fwd(x, params))
    assert out.shape == (2, 1), out.shape

    ref = jax.block_until_ready(_reference_forward(x, params))
    assert jnp.allclose(out, ref, rtol=2e-2, atol=2e-2), (out, ref)

    print("KERNEL_OK")
</pallas_src>

<mosaic_0001>
module attributes {stable_mosaic.version = 11 : i64} {
  func.func @_conv3x3_relu_kernel(%arg0: i32, %arg1: memref<9x16x3xbf16, #tpu.memory_space<vmem>>, %arg2: memref<16x1xf32, #tpu.memory_space<vmem>>, %arg3: memref<3x1024xbf16, #tpu.memory_space<vmem>>, %arg4: memref<3x128xbf16, #tpu.memory_space<vmem>>, %arg5: memref<16x1024xbf16, #tpu.memory_space<vmem>>) attributes {dimension_semantics = [#tpu.dimension_semantics<parallel>], iteration_bounds = array<i64: 2>, scalar_prefetch = 0 : i64, scratch_operands = 0 : i64, tpu.core_type = #tpu.core_type<tc>, window_params = [{pipeline_mode = #tpu.pipeline_mode<synchronous>, transform_indices = @transform_0, window_bounds = array<i64: 9, 16, 3>}, {pipeline_mode = #tpu.pipeline_mode<synchronous>, transform_indices = @transform_1, window_bounds = array<i64: 16, 1>}, {transform_indices = @transform_2, window_bounds = array<i64: 3, 1024>}, {transform_indices = @transform_3, window_bounds = array<i64: 3, 128>}, {transform_indices = @transform_4, window_bounds = array<i64: 16, 1024>}]} {
    %c0 = arith.constant 0 : index
    %c0_0 = arith.constant 0 : index
    %0 = vector.load %arg3[%c0, %c0_0] : memref<3x1024xbf16, #tpu.memory_space<vmem>>, vector<3x1024xbf16>
    %c0_1 = arith.constant 0 : index
    %c0_2 = arith.constant 0 : index
    %1 = vector.load %arg4[%c0_1, %c0_2] : memref<3x128xbf16, #tpu.memory_space<vmem>>, vector<3x128xbf16>
    %2 = tpu.concatenate %0, %1 in 1 : vector<3x1024xbf16>, vector<3x128xbf16> -> vector<3x1152xbf16>
    %3 = vector.extract_strided_slice %2 {offsets = [0, 0], sizes = [3, 1024], strides = [1, 1]} : vector<3x1152xbf16> to vector<3x1024xbf16>
    %c0_3 = arith.constant 0 : index
    %c0_4 = arith.constant 0 : index
    %c0_5 = arith.constant 0 : index
    %4 = vector.load %arg1[%c0_3, %c0_4, %c0_5] : memref<9x16x3xbf16, #tpu.memory_space<vmem>>, vector<1x16x3xbf16>
    %5 = vector.shape_cast %4 : vector<1x16x3xbf16> to vector<16x3xbf16>
    %cst = arith.constant dense<0.000000e+00> : vector<16x1024xf32>
    %6 = tpu.matmul %5, %3, %cst {dimension_numbers = #tpu.dot_dimension_numbers<[1], [0], [0], [1], [0, 0, 1, 1], [], []>} : vector<16x3xbf16>, vector<3x1024xbf16>, vector<16x1024xf32> -> vector<16x1024xf32>
    %7 = vector.extract_strided_slice %2 {offsets = [0, 1], sizes = [3, 1024], strides = [1, 1]} : vector<3x1152xbf16> to vector<3x1024xbf16>
    %c1 = arith.constant 1 : index
    %c0_6 = arith.constant 0 : index
    %c0_7 = arith.constant 0 : index
    %8 = vector.load %arg1[%c1, %c0_6, %c0_7] : memref<9x16x3xbf16, #tpu.memory_space<vmem>>, vector<1x16x3xbf16>
    %9 = vector.shape_cast %8 : vector<1x16x3xbf16> to vector<16x3xbf16>
    %cst_8 = arith.constant dense<0.000000e+00> : vector<16x1024xf32>
    %10 = tpu.matmul %9, %7, %cst_8 {dimension_numbers = #tpu.dot_dimension_numbers<[1], [0], [0], [1], [0, 0, 1, 1], [], []>} : vector<16x3xbf16>, vector<3x1024xbf16>, vector<16x1024xf32> -> vector<16x1024xf32>
    %11 = arith.addf %6, %10 : vector<16x1024xf32>
    %12 = vector.extract_strided_slice %2 {offsets = [0, 2], sizes = [3, 1024], strides = [1, 1]} : vector<3x1152xbf16> to vector<3x1024xbf16>
    %c2 = arith.constant 2 : index
    %c0_9 = arith.constant 0 : index
    %c0_10 = arith.constant 0 : index
    %13 = vector.load %arg1[%c2, %c0_9, %c0_10] : memref<9x16x3xbf16, #tpu.memory_space<vmem>>, vector<1x16x3xbf16>
    %14 = vector.shape_cast %13 : vector<1x16x3xbf16> to vector<16x3xbf16>
    %cst_11 = arith.constant dense<0.000000e+00> : vector<16x1024xf32>
    %15 = tpu.matmul %14, %12, %cst_11 {dimension_numbers = #tpu.dot_dimension_numbers<[1], [0], [0], [1], [0, 0, 1, 1], [], []>} : vector<16x3xbf16>, vector<3x1024xbf16>, vector<16x1024xf32> -> vector<16x1024xf32>
    %16 = arith.addf %11, %15 : vector<16x1024xf32>
    %17 = vector.extract_strided_slice %2 {offsets = [0, 32], sizes = [3, 1024], strides = [1, 1]} : vector<3x1152xbf16> to vector<3x1024xbf16>
    %c3 = arith.constant 3 : index
    %c0_12 = arith.constant 0 : index
    %c0_13 = arith.constant 0 : index
    %18 = vector.load %arg1[%c3, %c0_12, %c0_13] : memref<9x16x3xbf16, #tpu.memory_space<vmem>>, vector<1x16x3xbf16>
    %19 = vector.shape_cast %18 : vector<1x16x3xbf16> to vector<16x3xbf16>
    %cst_14 = arith.constant dense<0.000000e+00> : vector<16x1024xf32>
    %20 = tpu.matmul %19, %17, %cst_14 {dimension_numbers = #tpu.dot_dimension_numbers<[1], [0], [0], [1], [0, 0, 1, 1], [], []>} : vector<16x3xbf16>, vector<3x1024xbf16>, vector<16x1024xf32> -> vector<16x1024xf32>
    %21 = arith.addf %16, %20 : vector<16x1024xf32>
    %22 = vector.extract_strided_slice %2 {offsets = [0, 33], sizes = [3, 1024], strides = [1, 1]} : vector<3x1152xbf16> to vector<3x1024xbf16>
    %c4 = arith.constant 4 : index
    %c0_15 = arith.constant 0 : index
    %c0_16 = arith.constant 0 : index
    %23 = vector.load %arg1[%c4, %c0_15, %c0_16] : memref<9x16x3xbf16, #tpu.memory_space<vmem>>, vector<1x16x3xbf16>
    %24 = vector.shape_cast %23 : vector<1x16x3xbf16> to vector<16x3xbf16>
    %cst_17 = arith.constant dense<0.000000e+00> : vector<16x1024xf32>
    %25 = tpu.matmul %24, %22, %cst_17 {dimension_numbers = #tpu.dot_dimension_numbers<[1], [0], [0], [1], [0, 0, 1, 1], [], []>} : vector<16x3xbf16>, vector<3x1024xbf16>, vector<16x1024xf32> -> vector<16x1024xf32>
    %26 = arith.addf %21, %25 : vector<16x1024xf32>
    %27 = vector.extract_strided_slice %2 {offsets = [0, 34], sizes = [3, 1024], strides = [1, 1]} : vector<3x1152xbf16> to vector<3x1024xbf16>
    %c5 = arith.constant 5 : index
    %c0_18 = arith.constant 0 : index
    %c0_19 = arith.constant 0 : index
    %28 = vector.load %arg1[%c5, %c0_18, %c0_19] : memref<9x16x3xbf16, #tpu.memory_space<vmem>>, vector<1x16x3xbf16>
    %29 = vector.shape_cast %28 : vector<1x16x3xbf16> to vector<16x3xbf16>
    %cst_20 = arith.constant dense<0.000000e+00> : vector<16x1024xf32>
    %30 = tpu.matmul %29, %27, %cst_20 {dimension_numbers = #tpu.dot_dimension_numbers<[1], [0], [0], [1], [0, 0, 1, 1], [], []>} : vector<16x3xbf16>, vector<3x1024xbf16>, vector<16x1024xf32> -> vector<16x1024xf32>
    %31 = arith.addf %26, %30 : vector<16x1024xf32>
    %32 = vector.extract_strided_slice %2 {offsets = [0, 64], sizes = [3, 1024], strides = [1, 1]} : vector<3x1152xbf16> to vector<3x1024xbf16>
    %c6 = arith.constant 6 : index
    %c0_21 = arith.constant 0 : index
    %c0_22 = arith.constant 0 : index
    %33 = vector.load %arg1[%c6, %c0_21, %c0_22] : memref<9x16x3xbf16, #tpu.memory_space<vmem>>, vector<1x16x3xbf16>
    %34 = vector.shape_cast %33 : vector<1x16x3xbf16> to vector<16x3xbf16>
    %cst_23 = arith.constant dense<0.000000e+00> : vector<16x1024xf32>
    %35 = tpu.matmul %34, %32, %cst_23 {dimension_numbers = #tpu.dot_dimension_numbers<[1], [0], [0], [1], [0, 0, 1, 1], [], []>} : vector<16x3xbf16>, vector<3x1024xbf16>, vector<16x1024xf32> -> vector<16x1024xf32>
    %36 = arith.addf %31, %35 : vector<16x1024xf32>
    %37 = vector.extract_strided_slice %2 {offsets = [0, 65], sizes = [3, 1024], strides = [1, 1]} : vector<3x1152xbf16> to vector<3x1024xbf16>
    %c7 = arith.constant 7 : index
    %c0_24 = arith.constant 0 : index
    %c0_25 = arith.constant 0 : index
    %38 = vector.load %arg1[%c7, %c0_24, %c0_25] : memref<9x16x3xbf16, #tpu.memory_space<vmem>>, vector<1x16x3xbf16>
    %39 = vector.shape_cast %38 : vector<1x16x3xbf16> to vector<16x3xbf16>
    %cst_26 = arith.constant dense<0.000000e+00> : vector<16x1024xf32>
    %40 = tpu.matmul %39, %37, %cst_26 {dimension_numbers = #tpu.dot_dimension_numbers<[1], [0], [0], [1], [0, 0, 1, 1], [], []>} : vector<16x3xbf16>, vector<3x1024xbf16>, vector<16x1024xf32> -> vector<16x1024xf32>
    %41 = arith.addf %36, %40 : vector<16x1024xf32>
    %42 = vector.extract_strided_slice %2 {offsets = [0, 66], sizes = [3, 1024], strides = [1, 1]} : vector<3x1152xbf16> to vector<3x1024xbf16>
    %c8 = arith.constant 8 : index
    %c0_27 = arith.constant 0 : index
    %c0_28 = arith.constant 0 : index
    %43 = vector.load %arg1[%c8, %c0_27, %c0_28] : memref<9x16x3xbf16, #tpu.memory_space<vmem>>, vector<1x16x3xbf16>
    %44 = vector.shape_cast %43 : vector<1x16x3xbf16> to vector<16x3xbf16>
    %cst_29 = arith.constant dense<0.000000e+00> : vector<16x1024xf32>
    %45 = tpu.matmul %44, %42, %cst_29 {dimension_numbers = #tpu.dot_dimension_numbers<[1], [0], [0], [1], [0, 0, 1, 1], [], []>} : vector<16x3xbf16>, vector<3x1024xbf16>, vector<16x1024xf32> -> vector<16x1024xf32>
    %46 = arith.addf %41, %45 : vector<16x1024xf32>
    %c0_30 = arith.constant 0 : index
    %c0_31 = arith.constant 0 : index
    %47 = vector.load %arg2[%c0_30, %c0_31] : memref<16x1xf32, #tpu.memory_space<vmem>>, vector<16x1xf32>
    %48 = vector.broadcast %47 : vector<16x1xf32> to vector<16x1024xf32>
    %49 = arith.addf %46, %48 : vector<16x1024xf32>
    %cst_32 = arith.constant 0.000000e+00 : f32
    %50 = vector.broadcast %cst_32 : f32 to vector<16x1024xf32>
    %51 = arith.maximumf %49, %50 : vector<16x1024xf32>
    %52 = arith.truncf %51 : vector<16x1024xf32> to vector<16x1024xbf16>
    %c0_33 = arith.constant 0 : index
    %c0_34 = arith.constant 0 : index
    %53 = vector.load %arg5[%c0_33, %c0_34] : memref<16x1024xbf16, #tpu.memory_space<vmem>>, vector<16x1024xbf16>
    tpu.vector_store %arg5[%c0_33, %c0_34], %52 {strides = array<i32>} : memref<16x1024xbf16, #tpu.memory_space<vmem>>, vector<16x1024xbf16>,
    return
  }
  func.func @transform_0(%arg0: i32) -> (i32, i32, i32) {
    %c0_i32 = arith.constant 0 : i32
    %c0_i32_0 = arith.constant 0 : i32
    %c0_i32_1 = arith.constant 0 : i32
    %c0_i32_2 = arith.constant 0 : i32
    return %c0_i32, %c0_i32_0, %c0_i32_1 : i32, i32, i32
  }
  func.func @transform_1(%arg0: i32) -> (i32, i32) {
    %c0_i32 = arith.constant 0 : i32
    %c0_i32_0 = arith.constant 0 : i32
    %c0_i32_1 = arith.constant 0 : i32
    return %c0_i32, %c0_i32_0 : i32, i32
  }
  func.func @transform_2(%arg0: i32) -> (i32, i32) {
    %c0_i32 = arith.constant 0 : i32
    %c0_i32_0 = arith.constant 0 : i32
    return %c0_i32, %arg0 : i32, i32
  }
  func.func @transform_3(%arg0: i32) -> (i32, i32) {
    %c1_i32 = arith.constant 1 : i32
    %0 = arith.addi %arg0, %c1_i32 : i32
    %c8_i32 = arith.constant 8 : i32
    %1 = arith.muli %0, %c8_i32 : i32
    %c0_i32 = arith.constant 0 : i32
    %c0_i32_0 = arith.constant 0 : i32
    return %c0_i32, %1 : i32, i32
  }
  func.func @transform_4(%arg0: i32) -> (i32, i32) {
    %c0_i32 = arith.constant 0 : i32
    %c0_i32_0 = arith.constant 0 : i32
    return %c0_i32, %arg0 : i32, i32
  }
}

module attributes {stable_mosaic.version = 11 : i64} {
  func.func @_conv3x3_relu_kernel(%arg0: i32, %arg1: memref<9x16x16xbf16, #tpu.memory_space<vmem>>, %arg2: memref<16x1xf32, #tpu.memory_space<vmem>>, %arg3: memref<16x1024xbf16, #tpu.memory_space<vmem>>, %arg4: memref<16x128xbf16, #tpu.memory_space<vmem>>, %arg5: memref<16x1024xbf16, #tpu.memory_space<vmem>>) attributes {dimension_semantics = [#tpu.dimension_semantics<parallel>], iteration_bounds = array<i64: 2>, scalar_prefetch = 0 : i64, scratch_operands = 0 : i64, tpu.core_type = #tpu.core_type<tc>, window_params = [{pipeline_mode = #tpu.pipeline_mode<synchronous>, transform_indices = @transform_0, window_bounds = array<i64: 9, 16, 16>}, {pipeline_mode = #tpu.pipeline_mode<synchronous>, transform_indices = @transform_1, window_bounds = array<i64: 16, 1>}, {transform_indices = @transform_2, window_bounds = array<i64: 16, 1024>}, {transform_indices = @transform_3, window_bounds = array<i64: 16, 128>}, {transform_indices = @transform_4, window_bounds = array<i64: 16, 1024>}]} {
    %c0 = arith.constant 0 : index
    %c0_0 = arith.constant 0 : index
    %0 = vector.load %arg3[%c0, %c0_0] : memref<16x1024xbf16, #tpu.memory_space<vmem>>, vector<16x1024xbf16>
    %c0_1 = arith.constant 0 : index
    %c0_2 = arith.constant 0 : index
    %1 = vector.load %arg4[%c0_1, %c0_2] : memref<16x128xbf16, #tpu.memory_space<vmem>>, vector<16x128xbf16>
    %2 = tpu.concatenate %0, %1 in 1 : vector<16x1024xbf16>, vector<16x128xbf16> -> vector<16x1152xbf16>
    %3 = vector.extract_strided_slice %2 {offsets = [0, 0], sizes = [16, 1024], strides = [1, 1]} : vector<16x1152xbf16> to vector<16x1024xbf16>
    %c0_3 = arith.constant 0 : index
    %c0_4 = arith.constant 0 : index
    %c0_5 = arith.constant 0 : index
    %4 = vector.load %arg1[%c0_3, %c0_4, %c0_5] : memref<9x16x16xbf16, #tpu.memory_space<vmem>>, vector<1x16x16xbf16>
    %5 = vector.shape_cast %4 : vector<1x16x16xbf16> to vector<16x16xbf16>
    %cst = arith.constant dense<0.000000e+00> : vector<16x1024xf32>
    %6 = tpu.matmul %5, %3, %cst {dimension_numbers = #tpu.dot_dimension_numbers<[1], [0], [0], [1], [0, 0, 1, 1], [], []>} : vector<16x16xbf16>, vector<16x1024xbf16>, vector<16x1024xf32> -> vector<16x1024xf32>
    %7 = vector.extract_strided_slice %2 {offsets = [0, 1], sizes = [16, 1024], strides = [1, 1]} : vector<16x1152xbf16> to vector<16x1024xbf16>
    %c1 = arith.constant 1 : index
    %c0_6 = arith.constant 0 : index
    %c0_7 = arith.constant 0 : index
    %8 = vector.load %arg1[%c1, %c0_6, %c0_7] : memref<9x16x16xbf16, #tpu.memory_space<vmem>>, vector<1x16x16xbf16>
    %9 = vector.shape_cast %8 : vector<1x16x16xbf16> to vector<16x16xbf16>
    %cst_8 = arith.constant dense<0.000000e+00> : vector<16x1024xf32>
    %10 = tpu.matmul %9, %7, %cst_8 {dimension_numbers = #tpu.dot_dimension_numbers<[1], [0], [0], [1], [0, 0, 1, 1], [], []>} : vector<16x16xbf16>, vector<16x1024xbf16>, vector<16x1024xf32> -> vector<16x1024xf32>
    %11 = arith.addf %6, %10 : vector<16x1024xf32>
    %12 = vector.extract_strided_slice %2 {offsets = [0, 2], sizes = [16, 1024], strides = [1, 1]} : vector<16x1152xbf16> to vector<16x1024xbf16>
    %c2 = arith.constant 2 : index
    %c0_9 = arith.constant 0 : index
    %c0_10 = arith.constant 0 : index
    %13 = vector.load %arg1[%c2, %c0_9, %c0_10] : memref<9x16x16xbf16, #tpu.memory_space<vmem>>, vector<1x16x16xbf16>
    %14 = vector.shape_cast %13 : vector<1x16x16xbf16> to vector<16x16xbf16>
    %cst_11 = arith.constant dense<0.000000e+00> : vector<16x1024xf32>
    %15 = tpu.matmul %14, %12, %cst_11 {dimension_numbers = #tpu.dot_dimension_numbers<[1], [0], [0], [1], [0, 0, 1, 1], [], []>} : vector<16x16xbf16>, vector<16x1024xbf16>, vector<16x1024xf32> -> vector<16x1024xf32>
    %16 = arith.addf %11, %15 : vector<16x1024xf32>
    %17 = vector.extract_strided_slice %2 {offsets = [0, 30], sizes = [16, 1024], strides = [1, 1]} : vector<16x1152xbf16> to vector<16x1024xbf16>
    %c3 = arith.constant 3 : index
    %c0_12 = arith.constant 0 : index
    %c0_13 = arith.constant 0 : index
    %18 = vector.load %arg1[%c3, %c0_12, %c0_13] : memref<9x16x16xbf16, #tpu.memory_space<vmem>>, vector<1x16x16xbf16>
    %19 = vector.shape_cast %18 : vector<1x16x16xbf16> to vector<16x16xbf16>
    %cst_14 = arith.constant dense<0.000000e+00> : vector<16x1024xf32>
    %20 = tpu.matmul %19, %17, %cst_14 {dimension_numbers = #tpu.dot_dimension_numbers<[1], [0], [0], [1], [0, 0, 1, 1], [], []>} : vector<16x16xbf16>, vector<16x1024xbf16>, vector<16x1024xf32> -> vector<16x1024xf32>
    %21 = arith.addf %16, %20 : vector<16x1024xf32>
    %22 = vector.extract_strided_slice %2 {offsets = [0, 31], sizes = [16, 1024], strides = [1, 1]} : vector<16x1152xbf16> to vector<16x1024xbf16>
    %c4 = arith.constant 4 : index
    %c0_15 = arith.constant 0 : index
    %c0_16 = arith.constant 0 : index
    %23 = vector.load %arg1[%c4, %c0_15, %c0_16] : memref<9x16x16xbf16, #tpu.memory_space<vmem>>, vector<1x16x16xbf16>
    %24 = vector.shape_cast %23 : vector<1x16x16xbf16> to vector<16x16xbf16>
    %cst_17 = arith.constant dense<0.000000e+00> : vector<16x1024xf32>
    %25 = tpu.matmul %24, %22, %cst_17 {dimension_numbers = #tpu.dot_dimension_numbers<[1], [0], [0], [1], [0, 0, 1, 1], [], []>} : vector<16x16xbf16>, vector<16x1024xbf16>, vector<16x1024xf32> -> vector<16x1024xf32>
    %26 = arith.addf %21, %25 : vector<16x1024xf32>
    %27 = vector.extract_strided_slice %2 {offsets = [0, 32], sizes = [16, 1024], strides = [1, 1]} : vector<16x1152xbf16> to vector<16x1024xbf16>
    %c5 = arith.constant 5 : index
    %c0_18 = arith.constant 0 : index
    %c0_19 = arith.constant 0 : index
    %28 = vector.load %arg1[%c5, %c0_18, %c0_19] : memref<9x16x16xbf16, #tpu.memory_space<vmem>>, vector<1x16x16xbf16>
    %29 = vector.shape_cast %28 : vector<1x16x16xbf16> to vector<16x16xbf16>
    %cst_20 = arith.constant dense<0.000000e+00> : vector<16x1024xf32>
    %30 = tpu.matmul %29, %27, %cst_20 {dimension_numbers = #tpu.dot_dimension_numbers<[1], [0], [0], [1], [0, 0, 1, 1], [], []>} : vector<16x16xbf16>, vector<16x1024xbf16>, vector<16x1024xf32> -> vector<16x1024xf32>
    %31 = arith.addf %26, %30 : vector<16x1024xf32>
    %32 = vector.extract_strided_slice %2 {offsets = [0, 60], sizes = [16, 1024], strides = [1, 1]} : vector<16x1152xbf16> to vector<16x1024xbf16>
    %c6 = arith.constant 6 : index
    %c0_21 = arith.constant 0 : index
    %c0_22 = arith.constant 0 : index
    %33 = vector.load %arg1[%c6, %c0_21, %c0_22] : memref<9x16x16xbf16, #tpu.memory_space<vmem>>, vector<1x16x16xbf16>
    %34 = vector.shape_cast %33 : vector<1x16x16xbf16> to vector<16x16xbf16>
    %cst_23 = arith.constant dense<0.000000e+00> : vector<16x1024xf32>
    %35 = tpu.matmul %34, %32, %cst_23 {dimension_numbers = #tpu.dot_dimension_numbers<[1], [0], [0], [1], [0, 0, 1, 1], [], []>} : vector<16x16xbf16>, vector<16x1024xbf16>, vector<16x1024xf32> -> vector<16x1024xf32>
    %36 = arith.addf %31, %35 : vector<16x1024xf32>
    %37 = vector.extract_strided_slice %2 {offsets = [0, 61], sizes = [16, 1024], strides = [1, 1]} : vector<16x1152xbf16> to vector<16x1024xbf16>
    %c7 = arith.constant 7 : index
    %c0_24 = arith.constant 0 : index
    %c0_25 = arith.constant 0 : index
    %38 = vector.load %arg1[%c7, %c0_24, %c0_25] : memref<9x16x16xbf16, #tpu.memory_space<vmem>>, vector<1x16x16xbf16>
    %39 = vector.shape_cast %38 : vector<1x16x16xbf16> to vector<16x16xbf16>
    %cst_26 = arith.constant dense<0.000000e+00> : vector<16x1024xf32>
    %40 = tpu.matmul %39, %37, %cst_26 {dimension_numbers = #tpu.dot_dimension_numbers<[1], [0], [0], [1], [0, 0, 1, 1], [], []>} : vector<16x16xbf16>, vector<16x1024xbf16>, vector<16x1024xf32> -> vector<16x1024xf32>
    %41 = arith.addf %36, %40 : vector<16x1024xf32>
    %42 = vector.extract_strided_slice %2 {offsets = [0, 62], sizes = [16, 1024], strides = [1, 1]} : vector<16x1152xbf16> to vector<16x1024xbf16>
    %c8 = arith.constant 8 : index
    %c0_27 = arith.constant 0 : index
    %c0_28 = arith.constant 0 : index
    %43 = vector.load %arg1[%c8, %c0_27, %c0_28] : memref<9x16x16xbf16, #tpu.memory_space<vmem>>, vector<1x16x16xbf16>
    %44 = vector.shape_cast %43 : vector<1x16x16xbf16> to vector<16x16xbf16>
    %cst_29 = arith.constant dense<0.000000e+00> : vector<16x1024xf32>
    %45 = tpu.matmul %44, %42, %cst_29 {dimension_numbers = #tpu.dot_dimension_numbers<[1], [0], [0], [1], [0, 0, 1, 1], [], []>} : vector<16x16xbf16>, vector<16x1024xbf16>, vector<16x1024xf32> -> vector<16x1024xf32>
    %46 = arith.addf %41, %45 : vector<16x1024xf32>
    %c0_30 = arith.constant 0 : index
    %c0_31 = arith.constant 0 : index
    %47 = vector.load %arg2[%c0_30, %c0_31] : memref<16x1xf32, #tpu.memory_space<vmem>>, vector<16x1xf32>
    %48 = vector.broadcast %47 : vector<16x1xf32> to vector<16x1024xf32>
    %49 = arith.addf %46, %48 : vector<16x1024xf32>
    %cst_32 = arith.constant 0.000000e+00 : f32
    %50 = vector.broadcast %cst_32 : f32 to vector<16x1024xf32>
    %51 = arith.maximumf %49, %50 : vector<16x1024xf32>
    %52 = arith.truncf %51 : vector<16x1024xf32> to vector<16x1024xbf16>
    %c0_33 = arith.constant 0 : index
    %c0_34 = arith.constant 0 : index
    %53 = vector.load %arg5[%c0_33, %c0_34] : memref<16x1024xbf16, #tpu.memory_space<vmem>>, vector<16x1024xbf16>
    tpu.vector_store %arg5[%c0_33, %c0_34], %52 {strides = array<i32>} : memref<16x1024xbf16, #tpu.memory_space<vmem>>, vector<16x1024xbf16>,
    return
  }
  func.func @transform_0(%arg0: i32) -> (i32, i32, i32) {
    %c0_i32 = arith.constant 0 : i32
    %c0_i32_0 = arith.constant 0 : i32
    %c0_i32_1 = arith.constant 0 : i32
    %c0_i32_2 = arith.constant 0 : i32
    return %c0_i32, %c0_i32_0, %c0_i32_1 : i32, i32, i32
  }
  func.func @transform_1(%arg0: i32) -> (i32, i32) {
    %c0_i32 = arith.constant 0 : i32
    %c0_i32_0 = arith.constant 0 : i32
    %c0_i32_1 = arith.constant 0 : i32
    return %c0_i32, %c0_i32_0 : i32, i32
  }
  func.func @transform_2(%arg0: i32) -> (i32, i32) {
    %c0_i32 = arith.constant 0 : i32
    %c0_i32_0 = arith.constant 0 : i32
    return %c0_i32, %arg0 : i32, i32
  }
  func.func @transform_3(%arg0: i32) -> (i32, i32) {
    %c1_i32 = arith.constant 1 : i32
    %0 = arith.addi %arg0, %c1_i32 : i32
    %c8_i32 = arith.constant 8 : i32
    %1 = arith.muli %0, %c8_i32 : i32
    %c0_i32 = arith.constant 0 : i32
    %c0_i32_0 = arith.constant 0 : i32
    return %c0_i32, %1 : i32, i32
  }
  func.func @transform_4(%arg0: i32) -> (i32, i32) {
    %c0_i32 = arith.constant 0 : i32
    %c0_i32_0 = arith.constant 0 : i32
    return %c0_i32, %arg0 : i32, i32
  }
}

module attributes {stable_mosaic.version = 11 : i64} {
  func.func @_conv3x3_relu_kernel(%arg0: i32, %arg1: memref<9x32x16xbf16, #tpu.memory_space<vmem>>, %arg2: memref<32x1xf32, #tpu.memory_space<vmem>>, %arg3: memref<16x256xbf16, #tpu.memory_space<vmem>>, %arg4: memref<16x128xbf16, #tpu.memory_space<vmem>>, %arg5: memref<32x256xbf16, #tpu.memory_space<vmem>>) attributes {dimension_semantics = [#tpu.dimension_semantics<parallel>], iteration_bounds = array<i64: 2>, scalar_prefetch = 0 : i64, scratch_operands = 0 : i64, tpu.core_type = #tpu.core_type<tc>, window_params = [{pipeline_mode = #tpu.pipeline_mode<synchronous>, transform_indices = @transform_0, window_bounds = array<i64: 9, 32, 16>}, {pipeline_mode = #tpu.pipeline_mode<synchronous>, transform_indices = @transform_1, window_bounds = array<i64: 32, 1>}, {transform_indices = @transform_2, window_bounds = array<i64: 16, 256>}, {transform_indices = @transform_3, window_bounds = array<i64: 16, 128>}, {transform_indices = @transform_4, window_bounds = array<i64: 32, 256>}]} {
    %c0 = arith.constant 0 : index
    %c0_0 = arith.constant 0 : index
    %0 = vector.load %arg3[%c0, %c0_0] : memref<16x256xbf16, #tpu.memory_space<vmem>>, vector<16x256xbf16>
    %c0_1 = arith.constant 0 : index
    %c0_2 = arith.constant 0 : index
    %1 = vector.load %arg4[%c0_1, %c0_2] : memref<16x128xbf16, #tpu.memory_space<vmem>>, vector<16x128xbf16>
    %2 = tpu.concatenate %0, %1 in 1 : vector<16x256xbf16>, vector<16x128xbf16> -> vector<16x384xbf16>
    %3 = vector.extract_strided_slice %2 {offsets = [0, 0], sizes = [16, 256], strides = [1, 1]} : vector<16x384xbf16> to vector<16x256xbf16>
    %c0_3 = arith.constant 0 : index
    %c0_4 = arith.constant 0 : index
    %c0_5 = arith.constant 0 : index
    %4 = vector.load %arg1[%c0_3, %c0_4, %c0_5] : memref<9x32x16xbf16, #tpu.memory_space<vmem>>, vector<1x32x16xbf16>
    %5 = vector.shape_cast %4 : vector<1x32x16xbf16> to vector<32x16xbf16>
    %cst = arith.constant dense<0.000000e+00> : vector<32x256xf32>
    %6 = tpu.matmul %5, %3, %cst {dimension_numbers = #tpu.dot_dimension_numbers<[1], [0], [0], [1], [0, 0, 1, 1], [], []>} : vector<32x16xbf16>, vector<16x256xbf16>, vector<32x256xf32> -> vector<32x256xf32>
    %7 = vector.extract_strided_slice %2 {offsets = [0, 1], sizes = [16, 256], strides = [1, 1]} : vector<16x384xbf16> to vector<16x256xbf16>
    %c1 = arith.constant 1 : index
    %c0_6 = arith.constant 0 : index
    %c0_7 = arith.constant 0 : index
    %8 = vector.load %arg1[%c1, %c0_6, %c0_7] : memref<9x32x16xbf16, #tpu.memory_space<vmem>>, vector<1x32x16xbf16>
    %9 = vector.shape_cast %8 : vector<1x32x16xbf16> to vector<32x16xbf16>
    %cst_8 = arith.constant dense<0.000000e+00> : vector<32x256xf32>
    %10 = tpu.matmul %9, %7, %cst_8 {dimension_numbers = #tpu.dot_dimension_numbers<[1], [0], [0], [1], [0, 0, 1, 1], [], []>} : vector<32x16xbf16>, vector<16x256xbf16>, vector<32x256xf32> -> vector<32x256xf32>
    %11 = arith.addf %6, %10 : vector<32x256xf32>
    %12 = vector.extract_strided_slice %2 {offsets = [0, 2], sizes = [16, 256], strides = [1, 1]} : vector<16x384xbf16> to vector<16x256xbf16>
    %c2 = arith.constant 2 : index
    %c0_9 = arith.constant 0 : index
    %c0_10 = arith.constant 0 : index
    %13 = vector.load %arg1[%c2, %c0_9, %c0_10] : memref<9x32x16xbf16, #tpu.memory_space<vmem>>, vector<1x32x16xbf16>
    %14 = vector.shape_cast %13 : vector<1x32x16xbf16> to vector<32x16xbf16>
    %cst_11 = arith.constant dense<0.000000e+00> : vector<32x256xf32>
    %15 = tpu.matmul %14, %12, %cst_11 {dimension_numbers = #tpu.dot_dimension_numbers<[1], [0], [0], [1], [0, 0, 1, 1], [], []>} : vector<32x16xbf16>, vector<16x256xbf16>, vector<32x256xf32> -> vector<32x256xf32>
    %16 = arith.addf %11, %15 : vector<32x256xf32>
    %17 = vector.extract_strided_slice %2 {offsets = [0, 14], sizes = [16, 256], strides = [1, 1]} : vector<16x384xbf16> to vector<16x256xbf16>
    %c3 = arith.constant 3 : index
    %c0_12 = arith.constant 0 : index
    %c0_13 = arith.constant 0 : index
    %18 = vector.load %arg1[%c3, %c0_12, %c0_13] : memref<9x32x16xbf16, #tpu.memory_space<vmem>>, vector<1x32x16xbf16>
    %19 = vector.shape_cast %18 : vector<1x32x16xbf16> to vector<32x16xbf16>
    %cst_14 = arith.constant dense<0.000000e+00> : vector<32x256xf32>
    %20 = tpu.matmul %19, %17, %cst_14 {dimension_numbers = #tpu.dot_dimension_numbers<[1], [0], [0], [1], [0, 0, 1, 1], [], []>} : vector<32x16xbf16>, vector<16x256xbf16>, vector<32x256xf32> -> vector<32x256xf32>
    %21 = arith.addf %16, %20 : vector<32x256xf32>
    %22 = vector.extract_strided_slice %2 {offsets = [0, 15], sizes = [16, 256], strides = [1, 1]} : vector<16x384xbf16> to vector<16x256xbf16>
    %c4 = arith.constant 4 : index
    %c0_15 = arith.constant 0 : index
    %c0_16 = arith.constant 0 : index
    %23 = vector.load %arg1[%c4, %c0_15, %c0_16] : memref<9x32x16xbf16, #tpu.memory_space<vmem>>, vector<1x32x16xbf16>
    %24 = vector.shape_cast %23 : vector<1x32x16xbf16> to vector<32x16xbf16>
    %cst_17 = arith.constant dense<0.000000e+00> : vector<32x256xf32>
    %25 = tpu.matmul %24, %22, %cst_17 {dimension_numbers = #tpu.dot_dimension_numbers<[1], [0], [0], [1], [0, 0, 1, 1], [], []>} : vector<32x16xbf16>, vector<16x256xbf16>, vector<32x256xf32> -> vector<32x256xf32>
    %26 = arith.addf %21, %25 : vector<32x256xf32>
    %27 = vector.extract_strided_slice %2 {offsets = [0, 16], sizes = [16, 256], strides = [1, 1]} : vector<16x384xbf16> to vector<16x256xbf16>
    %c5 = arith.constant 5 : index
    %c0_18 = arith.constant 0 : index
    %c0_19 = arith.constant 0 : index
    %28 = vector.load %arg1[%c5, %c0_18, %c0_19] : memref<9x32x16xbf16, #tpu.memory_space<vmem>>, vector<1x32x16xbf16>
    %29 = vector.shape_cast %28 : vector<1x32x16xbf16> to vector<32x16xbf16>
    %cst_20 = arith.constant dense<0.000000e+00> : vector<32x256xf32>
    %30 = tpu.matmul %29, %27, %cst_20 {dimension_numbers = #tpu.dot_dimension_numbers<[1], [0], [0], [1], [0, 0, 1, 1], [], []>} : vector<32x16xbf16>, vector<16x256xbf16>, vector<32x256xf32> -> vector<32x256xf32>
    %31 = arith.addf %26, %30 : vector<32x256xf32>
    %32 = vector.extract_strided_slice %2 {offsets = [0, 28], sizes = [16, 256], strides = [1, 1]} : vector<16x384xbf16> to vector<16x256xbf16>
    %c6 = arith.constant 6 : index
    %c0_21 = arith.constant 0 : index
    %c0_22 = arith.constant 0 : index
    %33 = vector.load %arg1[%c6, %c0_21, %c0_22] : memref<9x32x16xbf16, #tpu.memory_space<vmem>>, vector<1x32x16xbf16>
    %34 = vector.shape_cast %33 : vector<1x32x16xbf16> to vector<32x16xbf16>
    %cst_23 = arith.constant dense<0.000000e+00> : vector<32x256xf32>
    %35 = tpu.matmul %34, %32, %cst_23 {dimension_numbers = #tpu.dot_dimension_numbers<[1], [0], [0], [1], [0, 0, 1, 1], [], []>} : vector<32x16xbf16>, vector<16x256xbf16>, vector<32x256xf32> -> vector<32x256xf32>
    %36 = arith.addf %31, %35 : vector<32x256xf32>
    %37 = vector.extract_strided_slice %2 {offsets = [0, 29], sizes = [16, 256], strides = [1, 1]} : vector<16x384xbf16> to vector<16x256xbf16>
    %c7 = arith.constant 7 : index
    %c0_24 = arith.constant 0 : index
    %c0_25 = arith.constant 0 : index
    %38 = vector.load %arg1[%c7, %c0_24, %c0_25] : memref<9x32x16xbf16, #tpu.memory_space<vmem>>, vector<1x32x16xbf16>
    %39 = vector.shape_cast %38 : vector<1x32x16xbf16> to vector<32x16xbf16>
    %cst_26 = arith.constant dense<0.000000e+00> : vector<32x256xf32>
    %40 = tpu.matmul %39, %37, %cst_26 {dimension_numbers = #tpu.dot_dimension_numbers<[1], [0], [0], [1], [0, 0, 1, 1], [], []>} : vector<32x16xbf16>, vector<16x256xbf16>, vector<32x256xf32> -> vector<32x256xf32>
    %41 = arith.addf %36, %40 : vector<32x256xf32>
    %42 = vector.extract_strided_slice %2 {offsets = [0, 30], sizes = [16, 256], strides = [1, 1]} : vector<16x384xbf16> to vector<16x256xbf16>
    %c8 = arith.constant 8 : index
    %c0_27 = arith.constant 0 : index
    %c0_28 = arith.constant 0 : index
    %43 = vector.load %arg1[%c8, %c0_27, %c0_28] : memref<9x32x16xbf16, #tpu.memory_space<vmem>>, vector<1x32x16xbf16>
    %44 = vector.shape_cast %43 : vector<1x32x16xbf16> to vector<32x16xbf16>
    %cst_29 = arith.constant dense<0.000000e+00> : vector<32x256xf32>
    %45 = tpu.matmul %44, %42, %cst_29 {dimension_numbers = #tpu.dot_dimension_numbers<[1], [0], [0], [1], [0, 0, 1, 1], [], []>} : vector<32x16xbf16>, vector<16x256xbf16>, vector<32x256xf32> -> vector<32x256xf32>
    %46 = arith.addf %41, %45 : vector<32x256xf32>
    %c0_30 = arith.constant 0 : index
    %c0_31 = arith.constant 0 : index
    %47 = vector.load %arg2[%c0_30, %c0_31] : memref<32x1xf32, #tpu.memory_space<vmem>>, vector<32x1xf32>
    %48 = vector.broadcast %47 : vector<32x1xf32> to vector<32x256xf32>
    %49 = arith.addf %46, %48 : vector<32x256xf32>
    %cst_32 = arith.constant 0.000000e+00 : f32
    %50 = vector.broadcast %cst_32 : f32 to vector<32x256xf32>
    %51 = arith.maximumf %49, %50 : vector<32x256xf32>
    %52 = arith.truncf %51 : vector<32x256xf32> to vector<32x256xbf16>
    %c0_33 = arith.constant 0 : index
    %c0_34 = arith.constant 0 : index
    %53 = vector.load %arg5[%c0_33, %c0_34] : memref<32x256xbf16, #tpu.memory_space<vmem>>, vector<32x256xbf16>
    tpu.vector_store %arg5[%c0_33, %c0_34], %52 {strides = array<i32>} : memref<32x256xbf16, #tpu.memory_space<vmem>>, vector<32x256xbf16>,
    return
  }
  func.func @transform_0(%arg0: i32) -> (i32, i32, i32) {
    %c0_i32 = arith.constant 0 : i32
    %c0_i32_0 = arith.constant 0 : i32
    %c0_i32_1 = arith.constant 0 : i32
    %c0_i32_2 = arith.constant 0 : i32
    return %c0_i32, %c0_i32_0, %c0_i32_1 : i32, i32, i32
  }
  func.func @transform_1(%arg0: i32) -> (i32, i32) {
    %c0_i32 = arith.constant 0 : i32
    %c0_i32_0 = arith.constant 0 : i32
    %c0_i32_1 = arith.constant 0 : i32
    return %c0_i32, %c0_i32_0 : i32, i32
  }
  func.func @transform_2(%arg0: i32) -> (i32, i32) {
    %c0_i32 = arith.constant 0 : i32
    %c0_i32_0 = arith.constant 0 : i32
    return %c0_i32, %arg0 : i32, i32
  }
  func.func @transform_3(%arg0: i32) -> (i32, i32) {
    %c1_i32 = arith.constant 1 : i32
    %0 = arith.addi %arg0, %c1_i32 : i32
    %c2_i32 = arith.constant 2 : i32
    %1 = arith.muli %0, %c2_i32 : i32
    %c0_i32 = arith.constant 0 : i32
    %c0_i32_0 = arith.constant 0 : i32
    return %c0_i32, %1 : i32, i32
  }
  func.func @transform_4(%arg0: i32) -> (i32, i32) {
    %c0_i32 = arith.constant 0 : i32
    %c0_i32_0 = arith.constant 0 : i32
    return %c0_i32, %arg0 : i32, i32
  }
}

module attributes {stable_mosaic.version = 11 : i64} {
  func.func @_conv3x3_relu_kernel(%arg0: i32, %arg1: memref<9x32x32xbf16, #tpu.memory_space<vmem>>, %arg2: memref<32x1xf32, #tpu.memory_space<vmem>>, %arg3: memref<32x256xbf16, #tpu.memory_space<vmem>>, %arg4: memref<32x128xbf16, #tpu.memory_space<vmem>>, %arg5: memref<32x256xbf16, #tpu.memory_space<vmem>>) attributes {dimension_semantics = [#tpu.dimension_semantics<parallel>], iteration_bounds = array<i64: 2>, scalar_prefetch = 0 : i64, scratch_operands = 0 : i64, tpu.core_type = #tpu.core_type<tc>, window_params = [{pipeline_mode = #tpu.pipeline_mode<synchronous>, transform_indices = @transform_0, window_bounds = array<i64: 9, 32, 32>}, {pipeline_mode = #tpu.pipeline_mode<synchronous>, transform_indices = @transform_1, window_bounds = array<i64: 32, 1>}, {transform_indices = @transform_2, window_bounds = array<i64: 32, 256>}, {transform_indices = @transform_3, window_bounds = array<i64: 32, 128>}, {transform_indices = @transform_4, window_bounds = array<i64: 32, 256>}]} {
    %c0 = arith.constant 0 : index
    %c0_0 = arith.constant 0 : index
    %0 = vector.load %arg3[%c0, %c0_0] : memref<32x256xbf16, #tpu.memory_space<vmem>>, vector<32x256xbf16>
    %c0_1 = arith.constant 0 : index
    %c0_2 = arith.constant 0 : index
    %1 = vector.load %arg4[%c0_1, %c0_2] : memref<32x128xbf16, #tpu.memory_space<vmem>>, vector<32x128xbf16>
    %2 = tpu.concatenate %0, %1 in 1 : vector<32x256xbf16>, vector<32x128xbf16> -> vector<32x384xbf16>
    %3 = vector.extract_strided_slice %2 {offsets = [0, 0], sizes = [32, 256], strides = [1, 1]} : vector<32x384xbf16> to vector<32x256xbf16>
    %c0_3 = arith.constant 0 : index
    %c0_4 = arith.constant 0 : index
    %c0_5 = arith.constant 0 : index
    %4 = vector.load %arg1[%c0_3, %c0_4, %c0_5] : memref<9x32x32xbf16, #tpu.memory_space<vmem>>, vector<1x32x32xbf16>
    %5 = vector.shape_cast %4 : vector<1x32x32xbf16> to vector<32x32xbf16>
    %cst = arith.constant dense<0.000000e+00> : vector<32x256xf32>
    %6 = tpu.matmul %5, %3, %cst {dimension_numbers = #tpu.dot_dimension_numbers<[1], [0], [0], [1], [0, 0, 1, 1], [], []>} : vector<32x32xbf16>, vector<32x256xbf16>, vector<32x256xf32> -> vector<32x256xf32>
    %7 = vector.extract_strided_slice %2 {offsets = [0, 1], sizes = [32, 256], strides = [1, 1]} : vector<32x384xbf16> to vector<32x256xbf16>
    %c1 = arith.constant 1 : index
    %c0_6 = arith.constant 0 : index
    %c0_7 = arith.constant 0 : index
    %8 = vector.load %arg1[%c1, %c0_6, %c0_7] : memref<9x32x32xbf16, #tpu.memory_space<vmem>>, vector<1x32x32xbf16>
    %9 = vector.shape_cast %8 : vector<1x32x32xbf16> to vector<32x32xbf16>
    %cst_8 = arith.constant dense<0.000000e+00> : vector<32x256xf32>
    %10 = tpu.matmul %9, %7, %cst_8 {dimension_numbers = #tpu.dot_dimension_numbers<[1], [0], [0], [1], [0, 0, 1, 1], [], []>} : vector<32x32xbf16>, vector<32x256xbf16>, vector<32x256xf32> -> vector<32x256xf32>
    %11 = arith.addf %6, %10 : vector<32x256xf32>
    %12 = vector.extract_strided_slice %2 {offsets = [0, 2], sizes = [32, 256], strides = [1, 1]} : vector<32x384xbf16> to vector<32x256xbf16>
    %c2 = arith.constant 2 : index
    %c0_9 = arith.constant 0 : index
    %c0_10 = arith.constant 0 : index
    %13 = vector.load %arg1[%c2, %c0_9, %c0_10] : memref<9x32x32xbf16, #tpu.memory_space<vmem>>, vector<1x32x32xbf16>
    %14 = vector.shape_cast %13 : vector<1x32x32xbf16> to vector<32x32xbf16>
    %cst_11 = arith.constant dense<0.000000e+00> : vector<32x256xf32>
    %15 = tpu.matmul %14, %12, %cst_11 {dimension_numbers = #tpu.dot_dimension_numbers<[1], [0], [0], [1], [0, 0, 1, 1], [], []>} : vector<32x32xbf16>, vector<32x256xbf16>, vector<32x256xf32> -> vector<32x256xf32>
    %16 = arith.addf %11, %15 : vector<32x256xf32>
    %17 = vector.extract_strided_slice %2 {offsets = [0, 12], sizes = [32, 256], strides = [1, 1]} : vector<32x384xbf16> to vector<32x256xbf16>
    %c3 = arith.constant 3 : index
    %c0_12 = arith.constant 0 : index
    %c0_13 = arith.constant 0 : index
    %18 = vector.load %arg1[%c3, %c0_12, %c0_13] : memref<9x32x32xbf16, #tpu.memory_space<vmem>>, vector<1x32x32xbf16>
    %19 = vector.shape_cast %18 : vector<1x32x32xbf16> to vector<32x32xbf16>
    %cst_14 = arith.constant dense<0.000000e+00> : vector<32x256xf32>
    %20 = tpu.matmul %19, %17, %cst_14 {dimension_numbers = #tpu.dot_dimension_numbers<[1], [0], [0], [1], [0, 0, 1, 1], [], []>} : vector<32x32xbf16>, vector<32x256xbf16>, vector<32x256xf32> -> vector<32x256xf32>
    %21 = arith.addf %16, %20 : vector<32x256xf32>
    %22 = vector.extract_strided_slice %2 {offsets = [0, 13], sizes = [32, 256], strides = [1, 1]} : vector<32x384xbf16> to vector<32x256xbf16>
    %c4 = arith.constant 4 : index
    %c0_15 = arith.constant 0 : index
    %c0_16 = arith.constant 0 : index
    %23 = vector.load %arg1[%c4, %c0_15, %c0_16] : memref<9x32x32xbf16, #tpu.memory_space<vmem>>, vector<1x32x32xbf16>
    %24 = vector.shape_cast %23 : vector<1x32x32xbf16> to vector<32x32xbf16>
    %cst_17 = arith.constant dense<0.000000e+00> : vector<32x256xf32>
    %25 = tpu.matmul %24, %22, %cst_17 {dimension_numbers = #tpu.dot_dimension_numbers<[1], [0], [0], [1], [0, 0, 1, 1], [], []>} : vector<32x32xbf16>, vector<32x256xbf16>, vector<32x256xf32> -> vector<32x256xf32>
    %26 = arith.addf %21, %25 : vector<32x256xf32>
    %27 = vector.extract_strided_slice %2 {offsets = [0, 14], sizes = [32, 256], strides = [1, 1]} : vector<32x384xbf16> to vector<32x256xbf16>
    %c5 = arith.constant 5 : index
    %c0_18 = arith.constant 0 : index
    %c0_19 = arith.constant 0 : index
    %28 = vector.load %arg1[%c5, %c0_18, %c0_19] : memref<9x32x32xbf16, #tpu.memory_space<vmem>>, vector<1x32x32xbf16>
    %29 = vector.shape_cast %28 : vector<1x32x32xbf16> to vector<32x32xbf16>
    %cst_20 = arith.constant dense<0.000000e+00> : vector<32x256xf32>
    %30 = tpu.matmul %29, %27, %cst_20 {dimension_numbers = #tpu.dot_dimension_numbers<[1], [0], [0], [1], [0, 0, 1, 1], [], []>} : vector<32x32xbf16>, vector<32x256xbf16>, vector<32x256xf32> -> vector<32x256xf32>
    %31 = arith.addf %26, %30 : vector<32x256xf32>
    %32 = vector.extract_strided_slice %2 {offsets = [0, 24], sizes = [32, 256], strides = [1, 1]} : vector<32x384xbf16> to vector<32x256xbf16>
    %c6 = arith.constant 6 : index
    %c0_21 = arith.constant 0 : index
    %c0_22 = arith.constant 0 : index
    %33 = vector.load %arg1[%c6, %c0_21, %c0_22] : memref<9x32x32xbf16, #tpu.memory_space<vmem>>, vector<1x32x32xbf16>
    %34 = vector.shape_cast %33 : vector<1x32x32xbf16> to vector<32x32xbf16>
    %cst_23 = arith.constant dense<0.000000e+00> : vector<32x256xf32>
    %35 = tpu.matmul %34, %32, %cst_23 {dimension_numbers = #tpu.dot_dimension_numbers<[1], [0], [0], [1], [0, 0, 1, 1], [], []>} : vector<32x32xbf16>, vector<32x256xbf16>, vector<32x256xf32> -> vector<32x256xf32>
    %36 = arith.addf %31, %35 : vector<32x256xf32>
    %37 = vector.extract_strided_slice %2 {offsets = [0, 25], sizes = [32, 256], strides = [1, 1]} : vector<32x384xbf16> to vector<32x256xbf16>
    %c7 = arith.constant 7 : index
    %c0_24 = arith.constant 0 : index
    %c0_25 = arith.constant 0 : index
    %38 = vector.load %arg1[%c7, %c0_24, %c0_25] : memref<9x32x32xbf16, #tpu.memory_space<vmem>>, vector<1x32x32xbf16>
    %39 = vector.shape_cast %38 : vector<1x32x32xbf16> to vector<32x32xbf16>
    %cst_26 = arith.constant dense<0.000000e+00> : vector<32x256xf32>
    %40 = tpu.matmul %39, %37, %cst_26 {dimension_numbers = #tpu.dot_dimension_numbers<[1], [0], [0], [1], [0, 0, 1, 1], [], []>} : vector<32x32xbf16>, vector<32x256xbf16>, vector<32x256xf32> -> vector<32x256xf32>
    %41 = arith.addf %36, %40 : vector<32x256xf32>
    %42 = vector.extract_strided_slice %2 {offsets = [0, 26], sizes = [32, 256], strides = [1, 1]} : vector<32x384xbf16> to vector<32x256xbf16>
    %c8 = arith.constant 8 : index
    %c0_27 = arith.constant 0 : index
    %c0_28 = arith.constant 0 : index
    %43 = vector.load %arg1[%c8, %c0_27, %c0_28] : memref<9x32x32xbf16, #tpu.memory_space<vmem>>, vector<1x32x32xbf16>
    %44 = vector.shape_cast %43 : vector<1x32x32xbf16> to vector<32x32xbf16>
    %cst_29 = arith.constant dense<0.000000e+00> : vector<32x256xf32>
    %45 = tpu.matmul %44, %42, %cst_29 {dimension_numbers = #tpu.dot_dimension_numbers<[1], [0], [0], [1], [0, 0, 1, 1], [], []>} : vector<32x32xbf16>, vector<32x256xbf16>, vector<32x256xf32> -> vector<32x256xf32>
    %46 = arith.addf %41, %45 : vector<32x256xf32>
    %c0_30 = arith.constant 0 : index
    %c0_31 = arith.constant 0 : index
    %47 = vector.load %arg2[%c0_30, %c0_31] : memref<32x1xf32, #tpu.memory_space<vmem>>, vector<32x1xf32>
    %48 = vector.broadcast %47 : vector<32x1xf32> to vector<32x256xf32>
    %49 = arith.addf %46, %48 : vector<32x256xf32>
    %cst_32 = arith.constant 0.000000e+00 : f32
    %50 = vector.broadcast %cst_32 : f32 to vector<32x256xf32>
    %51 = arith.maximumf %49, %50 : vector<32x256xf32>
    %52 = arith.truncf %51 : vector<32x256xf32> to vector<32x256xbf16>
    %c0_33 = arith.constant 0 : index
    %c0_34 = arith.constant 0 : index
    %53 = vector.load %arg5[%c0_33, %c0_34] : memref<32x256xbf16, #tpu.memory_space<vmem>>, vector<32x256xbf16>
    tpu.vector_store %arg5[%c0_33, %c0_34], %52 {strides = array<i32>} : memref<32x256xbf16, #tpu.memory_space<vmem>>, vector<32x256xbf16>,
    return
  }
  func.func @transform_0(%arg0: i32) -> (i32, i32, i32) {
    %c0_i32 = arith.constant 0 : i32
    %c0_i32_0 = arith.constant 0 : i32
    %c0_i32_1 = arith.constant 0 : i32
    %c0_i32_2 = arith.constant 0 : i32
    return %c0_i32, %c0_i32_0, %c0_i32_1 : i32, i32, i32
  }
  func.func @transform_1(%arg0: i32) -> (i32, i32) {
    %c0_i32 = arith.constant 0 : i32
    %c0_i32_0 = arith.constant 0 : i32
    %c0_i32_1 = arith.constant 0 : i32
    return %c0_i32, %c0_i32_0 : i32, i32
  }
  func.func @transform_2(%arg0: i32) -> (i32, i32) {
    %c0_i32 = arith.constant 0 : i32
    %c0_i32_0 = arith.constant 0 : i32
    return %c0_i32, %arg0 : i32, i32
  }
  func.func @transform_3(%arg0: i32) -> (i32, i32) {
    %c1_i32 = arith.constant 1 : i32
    %0 = arith.addi %arg0, %c1_i32 : i32
    %c2_i32 = arith.constant 2 : i32
    %1 = arith.muli %0, %c2_i32 : i32
    %c0_i32 = arith.constant 0 : i32
    %c0_i32_0 = arith.constant 0 : i32
    return %c0_i32, %1 : i32, i32
  }
  func.func @transform_4(%arg0: i32) -> (i32, i32) {
    %c0_i32 = arith.constant 0 : i32
    %c0_i32_0 = arith.constant 0 : i32
    return %c0_i32, %arg0 : i32, i32
  }
}

</mosaic_0001>

<bundles_post_ra>
// kernel: net_forward.4
= control target key start
LH: loop header
LB: loop body
LE: loop exit
PB: predicated region body
PF: predicated region fallthrough
CT: control target
= control target key end

     0   :  { %s2894_s15 = smov 0   ;;  %s2896_s16 = smov 0   ;;  %s3436_s0 = inlined_call_operand.vmem [shape: bf16[9,16,3], index: 0, kind: input, shape index: {}]   ;;  %s3437_s1 = inlined_call_operand.vmem [shape: f32[16,1], index: 1, kind: input, shape index: {}]   ;;  %s3438_s2 = inlined_call_operand.vmem [shape: bf16[3,2176], index: 2, kind: input, shape index: {}, may-alias: {2,3}]   ;;  %s3439_s3 = inlined_call_operand.vmem [shape: bf16[3,2176], index: 3, kind: input, shape index: {}, may-alias: {2,3}]   ;;  %s3440_s4 = inlined_call_operand.vmem [shape: bf16[16,2048], index: 4, kind: output, shape index: {}]  }
   0x1   :  { %s2898_s17 = smov 0  }
   0x2 LB: > { %s2907_s18 = sadd.s32 4294967295, %s2856_s17   ;;  %s2909_s19 = sadd.s32 1, %s2856_s17   ;;  %s2856_s17 = sphi %s2898_s17, %s3482_s17   ;;  %s2852_s16 = sphi %s2896_s16, %s3481_s16   ;;  %s2848_s15 = sphi %s2894_s15, %s3480_s15  }
   0x3   : > { %s116_s20 = ssub.s32 %s2856_s17, %s2909_s19  ;;  %s119_s21 = sadd.s32 1, %s2852_s16 }
   0x4   : > { %p117_p0 = scmp.eq.s32.totalorder %s116_s20, 0  ;;  %p129_p1 = scmp.ne.s32.totalorder %s2852_s16, %s2848_s15 }
   0x5   : > { %p130_p2 = scmp.eq.s32.totalorder %s2907_s18, 1  ;;  %p2691_p3 = scmp.ge.s32.totalorder %s2856_s17, 1 }
   0x6   : > { %s2917_s22 = scalar_select %p117_p0, %s2852_s16, %s119_s21  }
   0x7   : > { %p2919_p4 = por %p130_p2, %p129_p1  ;;  %p188_p5 = scmp.lt.s32.totalorder %s2856_s17, 3 }
   0x9   : > { %p189_p6 = pnand %p2691_p3, %p188_p5 }
   0xb   : > { %192 = sbr.rel (%p189_p6) target bundleno = 508 (0x1fc), region = 36 }
  0x10   : > { %s2924_s24 = sshll.u32 %s2907_s18, 3  ;;  %v256_v0 = vlaneseq  ;;  %v2858_v1 = vmov 1983009808   ;;  %s2859_s5 = smov 127   ;;  %v2860_v14 = vmov 0   ;;  %vm328_vm0 = vcmask 1040384  }
  0x11   : > { %p228_p7 = scmp.lt.s32.totalorder %s2924_s24, 16  ;;  %v254_v2 = vunpack.c.l.s4 %v2858_v1  ;;  %s2776_s30 = sadd.s32 8, %s2924_s24  ;;  %431 = vmatprep.mubr.bf16.mxu1 %v2860_v14  ;;  %388 = vmatprep.mubr.bf16.mxu0 %v2860_v14  ;;  %vm329_vm1 = vcmask 1041408   ;;  %v2867_v22 = vmov 65535   ;;  %vm315_vm2 = vcmask 1039360   ;;  %v2825_v37 = vld [vmem:[%s3436_s0 + $0x8] sm:$0xff]  }
  0x12   : > { %v257_v3 = vshrl.u32 %v256_v0, 7  ;;  %p239_p8 = scmp.lt.s32.totalorder %s2776_s30, 16  ;;  %2821 = vset.pattern.permute.xlu0 %v2860_v14  ;;  %2822 = vset.pattern.permute.xlu1 %v2860_v14  ;;  %s2861_s10 = smov 126   ;;  %v330_v23 = vsel %vm328_vm0, 4294967295, %v2867_v22  ;;  %vm324_vm3 = vcmask 23552   ;;  %vm758_vm4 = vcmask 1031168  }
  0x13   : > { %s229_s25 = scalar_select %p228_p7, %s2924_s24, 16  ;;  %v255_v4 = vunpack.c.0.s8 %v254_v2  ;;  %v3025_v24 = vsel %vm329_vm1, %v330_v23, 0  ;;  %v2826_v62 = vld [vmem:[%s3436_s0] sm:$0xff]   ;;  %vm1008_vm5 = vcmask 785408   ;;  %vm1258_vm6 = vcmask 777216  }
  0x14   : > { %s3484_s30 = smov (!%p239_p8, %s2776_s30), 16  ;;  %s2862_s11 = smov 96   ;;  %vm1508_vm7 = vcmask 769024   ;;  %vm1758_vm8 = vcmask 523264   ;;  %vm2008_vm9 = vcmask 515072   ;;  %vm2258_vm10 = vcmask 506880  }
  0x15   : > { %s2694_s26 = sshll.u32 %s229_s25, 1  ;;  %v258_v5 = vsub.s32 %v255_v4, %v257_v3  ;;  %s2696_s6 = sshll.u32 %s3484_s30, 1 }
  0x16   : > { %s231_s29 = scalar_lea.vmem %s3438_s2, %s2694_s26  ;;  %s242_s9 = scalar_lea.vmem %s3439_s3, %s2696_s6 }
  0x17   : > { %v248_v6 = vld [vmem:[%s231_s29 + $0x8] sm:$0xff]  ;;  %v247_v7 = vld [vmem:[%s231_s29] sm:$0xff]  ;;  %s2863_s12 = smov 95   ;;  %s2864_s13 = smov 94  }
  0x18   : > { %v2932_v8 = vrot.slane %v248_v6, %v258_v5  ;;  %v2934_v9 = vrot.slane %v247_v7, %v258_v5  ;;  %v252_v10 = vcombine.high %v247_v7, %v247_v7  ;;  %v269_v13 = vcombine.high %v248_v6, %v248_v6  ;;  %v2971_v19 = vld [vmem:[%s242_s9] sm:$0x3]  ;;  %s2865_s14 = smov 64   ;;  %s2866_s17 = smov 63  }
  0x19   : > { %s2868_s20 = smov 62   ;;  %s220_s25 = sand.u32 1, %s2848_s15  }
  0x1a   : > { %305 = vrot.lane.b32.xlu1 %v2932_v8, %s2859_s5  ;;  %297 = vrot.lane.b32.xlu0 %v2934_v9, %s2859_s5  ;;  %v2938_v11 = vrot.slane %v252_v10, %v258_v5  ;;  %v2942_v12 = vcombine.high %v2934_v9, %v2934_v9  ;;  %v2956_v16 = vcombine.high %v2932_v8, %v2932_v8  ;;  %s2692_s26 = sshll.u32 %s220_s25, 6  ;;  %s2785_s27 = sshll.u32 (%p2919_p4), %s2907_s18, 5 }
  0x1b   : > { %v2958_v17 = vrot.slane %v269_v13, %v258_v5  ;;  %v537_v54 = vand.u32 %v3025_v24, %v2934_v9  ;;  %v549_v1 = vand.u32 %v3025_v24, %v2932_v8  ;;  %s3396_s15 = scalar_lea.vmem [#allocation2], %s2692_s26  ;;  %s2591_s30 = scalar_lea.vmem (%p2919_p4), %s3440_s4, %s2785_s27 }
  0x1c   : > { %v2948_v15 = vcombine.high %v2938_v11, %v2938_v11  ;;  %v540_v44 = vand.u32 %v3025_v24, %v2942_v12  ;;  %v543_v55 = vand.u32 %v3025_v24, %v2938_v11  ;;  %v552_v58 = vand.u32 %v3025_v24, %v2956_v16 }
  0x1d   : > { %v2964_v18 = vcombine.high %v2958_v17, %v2958_v17  ;;  %v555_v2 = vand.u32 %v3025_v24, %v2958_v17 }
  0x1e   : > { %299 = vrot.lane.b32.xlu0 %v2942_v12, %s2859_s5  ;;  %303 = vrot.lane.b32.xlu1 %v2948_v15, %s2859_s5  ;;  %v546_v51 = vand.u32 %v3025_v24, %v2948_v15 }
  0x1f   : > { %v558_v59 = vand.u32 %v3025_v24, %v2964_v18 }
  0x22   : > { %301 = vrot.lane.b32.xlu0 %v2938_v11, %s2859_s5  ;;  %307 = vrot.lane.b32.xlu1 %v2956_v16, %s2859_s5 }
  0x26   : > { %309 = vrot.lane.b32.xlu0 %v2958_v17, %s2859_s5  ;;  %311 = vrot.lane.b32.xlu1 %v2964_v18, %s2859_s5 }
  0x2a   : > { %313 = vrot.lane.b32.xlu0 %v2971_v19, %s2859_s5  ;;  %742 = vrot.lane.b32.xlu1 %v2942_v12, %s2861_s10 }
  0x2e   : > { %744 = vrot.lane.b32.xlu0 %v2938_v11, %s2861_s10  ;;  %746 = vrot.lane.b32.xlu1 %v2948_v15, %s2861_s10 }
  0x32   : > { %748 = vrot.lane.b32.xlu0 %v2932_v8, %s2861_s10  ;;  %740 = vrot.lane.b32.xlu1 %v2934_v9, %s2861_s10 }
  0x36   : > { %750 = vrot.lane.b32.xlu0 %v2956_v16, %s2861_s10  ;;  %752 = vrot.lane.b32.xlu1 %v2958_v17, %s2861_s10 }
  0x3a   : > { %754 = vrot.lane.b32.xlu0 %v2964_v18, %s2861_s10  ;;  %756 = vrot.lane.b32.xlu1 %v2971_v19, %s2861_s10 }
  0x3e   : > { %992 = vrot.lane.b32.xlu0 %v2942_v12, %s2862_s11  ;;  %994 = vrot.lane.b32.xlu1 %v2938_v11, %s2862_s11 }
  0x42   : > { %996 = vrot.lane.b32.xlu0 %v2948_v15, %s2862_s11  ;;  %998 = vrot.lane.b32.xlu1 %v2932_v8, %s2862_s11 }
  0x46   : > { %990 = vrot.lane.b32.xlu0 %v2934_v9, %s2862_s11  ;;  %1000 = vrot.lane.b32.xlu1 %v2956_v16, %s2862_s11 }
  0x4a   : > { %1002 = vrot.lane.b32.xlu0 %v2958_v17, %s2862_s11  ;;  %1004 = vrot.lane.b32.xlu1 %v2964_v18, %s2862_s11 }
  0x4e   : > { %1006 = vrot.lane.b32.xlu0 %v2971_v19, %s2862_s11  ;;  %1242 = vrot.lane.b32.xlu1 %v2942_v12, %s2863_s12 }
  0x52   : > { %1244 = vrot.lane.b32.xlu0 %v2938_v11, %s2863_s12  ;;  %1246 = vrot.lane.b32.xlu1 %v2948_v15, %s2863_s12 }
  0x56   : > { %1248 = vrot.lane.b32.xlu0 %v2932_v8, %s2863_s12  ;;  %1240 = vrot.lane.b32.xlu1 %v2934_v9, %s2863_s12 }
  0x5a   : > { %1250 = vrot.lane.b32.xlu0 %v2956_v16, %s2863_s12  ;;  %1252 = vrot.lane.b32.xlu1 %v2958_v17, %s2863_s12 }
  0x5e   : > { %1254 = vrot.lane.b32.xlu0 %v2964_v18, %s2863_s12  ;;  %1256 = vrot.lane.b32.xlu1 %v2971_v19, %s2863_s12 }
  0x62   : > { %1492 = vrot.lane.b32.xlu0 %v2942_v12, %s2864_s13  ;;  %1494 = vrot.lane.b32.xlu1 %v2938_v11, %s2864_s13 }
  0x66   : > { %1496 = vrot.lane.b32.xlu0 %v2948_v15, %s2864_s13  ;;  %1498 = vrot.lane.b32.xlu1 %v2932_v8, %s2864_s13 }
  0x6a   : > { %1490 = vrot.lane.b32.xlu0 %v2934_v9, %s2864_s13  ;;  %1500 = vrot.lane.b32.xlu1 %v2956_v16, %s2864_s13 }
  0x6e   : > { %1502 = vrot.lane.b32.xlu0 %v2958_v17, %s2864_s13  ;;  %1504 = vrot.lane.b32.xlu1 %v2964_v18, %s2864_s13 }
  0x72   : > { %1506 = vrot.lane.b32.xlu0 %v2971_v19, %s2864_s13  ;;  %1742 = vrot.lane.b32.xlu1 %v2942_v12, %s2865_s14 }
  0x76   : > { %1744 = vrot.lane.b32.xlu0 %v2938_v11, %s2865_s14  ;;  %1746 = vrot.lane.b32.xlu1 %v2948_v15, %s2865_s14 }
  0x7a   : > { %1748 = vrot.lane.b32.xlu0 %v2932_v8, %s2865_s14  ;;  %1740 = vrot.lane.b32.xlu1 %v2934_v9, %s2865_s14 }
  0x7e   : > { %1750 = vrot.lane.b32.xlu0 %v2956_v16, %s2865_s14  ;;  %1752 = vrot.lane.b32.xlu1 %v2958_v17, %s2865_s14 }
  0x82   : > { %1754 = vrot.lane.b32.xlu0 %v2964_v18, %s2865_s14  ;;  %1756 = vrot.lane.b32.xlu1 %v2971_v19, %s2865_s14 }
  0x86   : > { %1992 = vrot.lane.b32.xlu0 %v2942_v12, %s2866_s17  ;;  %1994 = vrot.lane.b32.xlu1 %v2938_v11, %s2866_s17 }
  0x8a   : > { %1996 = vrot.lane.b32.xlu0 %v2948_v15, %s2866_s17  ;;  %1998 = vrot.lane.b32.xlu1 %v2932_v8, %s2866_s17 }
  0x8c   : > { %v306_v20 = vpop.permute.xlu1 %305  ;;  %v298_v21 = vpop.permute.xlu0 %297 }
  0x8e   : > { %1990 = vrot.lane.b32.xlu0 %v2934_v9, %s2866_s17  ;;  %2000 = vrot.lane.b32.xlu1 %v2956_v16, %s2866_s17 }
  0x90   : > { %v300_v25 = vpop.permute.xlu0 %299  ;;  %v304_v26 = vpop.permute.xlu1 %303 }
  0x91   : > { %v319_v27 = vsel %vm315_vm2, %v304_v26, %v306_v20  ;;  %v316_v29 = vsel %vm315_vm2, %v298_v21, %v300_v25 }
  0x92   : > { %2002 = vrot.lane.b32.xlu0 %v2958_v17, %s2866_s17  ;;  %2004 = vrot.lane.b32.xlu1 %v2964_v18, %s2866_s17  ;;  %v342_v28 = vand.u32 %v3025_v24, %v319_v27  ;;  %v333_v36 = vand.u32 %v3025_v24, %v316_v29 }
  0x94   : > { %v302_v30 = vpop.permute.xlu0 %301  ;;  %413 = vmatprep.subr.bf16.mxu1 %v342_v28  ;;  %v308_v31 = vpop.permute.xlu1 %307 }
  0x95   : > { %v318_v32 = vsel %vm315_vm2, %v302_v30, %v304_v26  ;;  %v317_v33 = vsel %vm315_vm2, %v300_v25, %v302_v30  ;;  %v320_v38 = vsel %vm315_vm2, %v306_v20, %v308_v31  ;;  %v2827_v26 = vld [vmem:[%s3436_s0 + $0x10] sm:$0xff]  }
  0x96   : > { %2006 = vrot.lane.b32.xlu0 %v2971_v19, %s2866_s17  ;;  %2242 = vrot.lane.b32.xlu1 %v2942_v12, %s2868_s20  ;;  %v336_v34 = vand.u32 %v3025_v24, %v317_v33  ;;  %v339_v35 = vand.u32 %v3025_v24, %v318_v32  ;;  %v345_v43 = vand.u32 %v3025_v24, %v320_v38 }
  0x98   : > { %370 = vmatprep.subr.bf16.mxu0 %v336_v34  ;;  %v310_v39 = vpop.permute.xlu0 %309  ;;  %414 = vmatpush1.bf16.msra.mxu1 %v339_v35  ;;  %v312_v40 = vpop.permute.xlu1 %311 }
  0x99   : > { %v321_v41 = vsel %vm315_vm2, %v308_v31, %v310_v39  ;;  %371 = vmatpush1.bf16.msra.mxu0 %v333_v36  ;;  %v322_v45 = vsel %vm315_vm2, %v310_v39, %v312_v40 }
  0x9a   : > { %v348_v42 = vand.u32 %v3025_v24, %v321_v41  ;;  %2244 = vrot.lane.b32.xlu0 %v2938_v11, %s2868_s20  ;;  %2246 = vrot.lane.b32.xlu1 %v2948_v15, %s2868_s20  ;;  %v351_v50 = vand.u32 %v3025_v24, %v322_v45 }
  0x9b   : > { %2701 = vmatmul.mubr.msk.bf16.vlgmr.msra.gmra.mxu1 %vm324_vm3, %v2825_v37 }
  0x9c   : > { %2700 = vmatmul.mubr.msk.bf16.vlgmr.msra.gmra.mxu0 %vm324_vm3, %v2825_v37  ;;  %v314_v46 = vpop.permute.xlu0 %313  ;;  %456 = vmatprep.subr.bf16.mxu0 %v348_v42  ;;  %v743_v47 = vpop.permute.xlu1 %742 }
  0x9d   : > { %v323_v48 = vsel %vm315_vm2, %v312_v40, %v314_v46  ;;  %457 = vmatpush1.bf16.msra.mxu0 %v345_v43  ;;  %474 = vmatprep.mubr.bf16.mxu0 %v2860_v14 }
  0x9e   : > { %v354_v49 = vand.u32 %v3025_v24, %v323_v48  ;;  %2248 = vrot.lane.b32.xlu0 %v2932_v8, %s2868_s20  ;;  %2240 = vrot.lane.b32.xlu1 %v2934_v9, %s2868_s20 }
  0x9f   : > { %517 = vmatprep.mubr.bf16.mxu1 %v2860_v14  ;;  %574 = vmatprep.subr.bf16.mxu0 %v540_v44 }
  0xa0   : > { %v745_v52 = vpop.permute.xlu0 %744  ;;  %499 = vmatprep.subr.bf16.mxu1 %v354_v49  ;;  %v747_v53 = vpop.permute.xlu1 %746 }
  0xa1   : > { %500 = vmatpush1.bf16.msra.mxu1 %v351_v50  ;;  %v760_v63 = vsel %vm758_vm4, %v743_v47, %v745_v52  ;;  %v761_v8 = vsel %vm758_vm4, %v745_v52, %v747_v53  ;;  %v2828_v50 = vld [vmem:[%s3436_s0 + $0x18] sm:$0xff]  }
  0xa2   : > { %2250 = vrot.lane.b32.xlu0 %v2956_v16, %s2868_s20  ;;  %2252 = vrot.lane.b32.xlu1 %v2958_v17, %s2868_s20  ;;  %v774_v3 = vand.u32 %v760_v63, %v3025_v24  ;;  %v777_v15 = vand.u32 %v761_v8, %v3025_v24 }
  0xa3   : > { %617 = vmatprep.subr.bf16.mxu1 %v546_v51 }
  0xa4   : > { %v749_v56 = vpop.permute.xlu0 %748  ;;  %2702 = vmatmul.mubr.msk.bf16.vlgmr.msra.gmra.mxu0 %vm324_vm3, %v2825_v37  ;;  %2703 = vmatmul.mubr.msk.bf16.vlgmr.msra.gmra.mxu1 %vm324_vm3, %v2825_v37  ;;  %v741_v57 = vpop.permute.xlu1 %740 }
  0xa5   : > { %575 = vmatpush1.bf16.msra.mxu0 %v537_v54  ;;  %618 = vmatpush1.bf16.msra.mxu1 %v543_v55  ;;  %v762_v0 = vsel %vm758_vm4, %v747_v53, %v749_v56  ;;  %v759_v9 = vsel %vm758_vm4, %v741_v57, %v743_v47 }
  0xa6   : > { %2254 = vrot.lane.b32.xlu0 %v2964_v18, %s2868_s20  ;;  %2256 = vrot.lane.b32.xlu1 %v2971_v19, %s2868_s20  ;;  %v780_v4 = vand.u32 %v762_v0, %v3025_v24  ;;  %v771_v16 = vand.u32 %v759_v9, %v3025_v24 }
  0xa7   : > { %592 = vmatprep.mubr.bf16.mxu0 %v2860_v14  ;;  %635 = vmatprep.mubr.bf16.mxu1 %v2860_v14 }
  0xa8   : > { %v751_v60 = vpop.permute.xlu0 %750  ;;  %v753_v61 = vpop.permute.xlu1 %752  ;;  %660 = vmatprep.subr.bf16.mxu0 %v552_v58  ;;  %703 = vmatprep.subr.bf16.mxu1 %v558_v59 }
  0xa9   : > { %v764_v12 = vsel %vm758_vm4, %v751_v60, %v753_v61  ;;  %v763_v21 = vsel %vm758_vm4, %v749_v56, %v751_v60 }
  0xaa   : > { %v786_v17 = vand.u32 %v764_v12, %v3025_v24  ;;  %v783_v29 = vand.u32 %v763_v21, %v3025_v24  ;;  %v2829_v12 = vld [vmem:[%s3436_s0 + $0x20] sm:$0xff]  }
  0xac   : > { %v755_v5 = vpop.permute.xlu0 %754  ;;  %2705 = vmatmul.mubr.msk.bf16.vlgmr.msra.gmra.mxu0 %vm324_vm3, %v2826_v62  ;;  %v757_v6 = vpop.permute.xlu1 %756  ;;  %2706 = vmatmul.mubr.msk.bf16.vlgmr.msra.gmra.mxu1 %vm324_vm3, %v2826_v62 }
  0xad   : > { %661 = vmatpush1.bf16.msra.mxu0 %v549_v1  ;;  %704 = vmatpush1.bf16.msra.mxu1 %v555_v2  ;;  %v766_v7 = vsel %vm758_vm4, %v755_v5, %v757_v6  ;;  %v765_v22 = vsel %vm758_vm4, %v753_v61, %v755_v5 }
  0xae   : > { %808 = vmatprep.subr.bf16.mxu0 %v774_v3  ;;  %851 = vmatprep.subr.bf16.mxu1 %v780_v4  ;;  %v792_v13 = vand.u32 %v766_v7, %v3025_v24  ;;  %v789_v30 = vand.u32 %v765_v22, %v3025_v24 }
  0xaf   : > { %678 = vmatprep.mubr.bf16.mxu0 %v2860_v14  ;;  %721 = vmatprep.mubr.bf16.mxu1 %v2860_v14 }
  0xb0   : > { %v993_v10 = vpop.permute.xlu0 %992  ;;  %v995_v11 = vpop.permute.xlu1 %994 }
  0xb1   : > { %v1010_v27 = vsel %vm1008_vm5, %v993_v10, %v995_v11 }
  0xb2   : > { %v1024_v31 = vand.u32 %v1010_v27, %v3025_v24 }
  0xb4   : > { %v997_v18 = vpop.permute.xlu0 %996  ;;  %2707 = vmatmul.mubr.msk.bf16.vlgmr.msra.gmra.mxu0 %vm324_vm3, %v2826_v62  ;;  %v999_v19 = vpop.permute.xlu1 %998  ;;  %2708 = vmatmul.mubr.msk.bf16.vlgmr.msra.gmra.mxu1 %vm324_vm3, %v2826_v62 }
  0xb5   : > { %809 = vmatpush1.bf16.msra.mxu0 %v771_v16  ;;  %852 = vmatpush1.bf16.msra.mxu1 %v777_v15  ;;  %v1012_v20 = vsel %vm1008_vm5, %v997_v18, %v999_v19  ;;  %v1011_v34 = vsel %vm1008_vm5, %v995_v11, %v997_v18 }
  0xb6   : > { %894 = vmatprep.subr.bf16.mxu0 %v786_v17  ;;  %937 = vmatprep.subr.bf16.mxu1 %v792_v13  ;;  %v1030_v28 = vand.u32 %v1012_v20, %v3025_v24  ;;  %v1027_v41 = vand.u32 %v1011_v34, %v3025_v24 }
  0xb7   : > { %826 = vmatprep.mubr.bf16.mxu0 %v2860_v14  ;;  %869 = vmatprep.mubr.bf16.mxu1 %v2860_v14 }
  0xb8   : > { %v991_v23 = vpop.permute.xlu0 %990  ;;  %v1001_v25 = vpop.permute.xlu1 %1000 }
  0xb9   : > { %v1009_v35 = vsel %vm1008_vm5, %v991_v23, %v993_v10  ;;  %v1013_v46 = vsel %vm1008_vm5, %v999_v19, %v1001_v25 }
  0xba   : > { %v1021_v42 = vand.u32 %v1009_v35, %v3025_v24  ;;  %v1033_v54 = vand.u32 %v1013_v46, %v3025_v24  ;;  %v2483_v35 = vld [vmem:[%s3437_s1 + $0x8] sm:$0xff] }
  0xbb   : > { %2491 = vperm.xlu1 %2822, %v2483_v35  }
  0xbc   : > { %v1003_v32 = vpop.permute.xlu0 %1002  ;;  %2712 = vmatmul.mubr.msk.bf16.vlgmr.msra.gmra.mxu0 %vm324_vm3, %v2827_v26  ;;  %v1005_v33 = vpop.permute.xlu1 %1004  ;;  %2713 = vmatmul.mubr.msk.bf16.vlgmr.msra.gmra.mxu1 %vm324_vm3, %v2827_v26 }
  0xbd   : > { %895 = vmatpush1.bf16.msra.mxu0 %v783_v29  ;;  %938 = vmatpush1.bf16.msra.mxu1 %v789_v30  ;;  %v1014_v38 = vsel %vm1008_vm5, %v1001_v25, %v1003_v32  ;;  %v1015_v47 = vsel %vm1008_vm5, %v1003_v32, %v1005_v33 }
  0xbe   : > { %1058 = vmatprep.subr.bf16.mxu0 %v1024_v31  ;;  %1101 = vmatprep.subr.bf16.mxu1 %v1030_v28  ;;  %v1036_v43 = vand.u32 %v1014_v38, %v3025_v24  ;;  %v1039_v55 = vand.u32 %v1015_v47, %v3025_v24  ;;  %v2482_v28 = vld [vmem:[%s3437_s1] sm:$0xff] }
  0xbf   : > { %912 = vmatprep.mubr.bf16.mxu0 %v2860_v14  ;;  %955 = vmatprep.mubr.bf16.mxu1 %v2860_v14 }
  0xc0   : > { %v1007_v36 = vpop.permute.xlu0 %1006  ;;  %v1243_v37 = vpop.permute.xlu1 %1242  ;;  %2486 = vperm.xlu0 %2821, %v2482_v28  }
  0xc1   : > { %v1016_v39 = vsel %vm1008_vm5, %v1005_v33, %v1007_v36 }
  0xc2   : > { %v1042_v40 = vand.u32 %v1016_v39, %v3025_v24 }
  0xc4   : > { %v1245_v44 = vpop.permute.xlu0 %1244  ;;  %2714 = vmatmul.mubr.msk.bf16.vlgmr.msra.gmra.mxu0 %vm324_vm3, %v2827_v26  ;;  %v1247_v45 = vpop.permute.xlu1 %1246  ;;  %2715 = vmatmul.mubr.msk.bf16.vlgmr.msra.gmra.mxu1 %vm324_vm3, %v2827_v26 }
  0xc5   : > { %1059 = vmatpush1.bf16.msra.mxu0 %v1021_v42  ;;  %1102 = vmatpush1.bf16.msra.mxu1 %v1027_v41  ;;  %v1260_v51 = vsel %vm1258_vm6, %v1243_v37, %v1245_v44  ;;  %v1261_v60 = vsel %vm1258_vm6, %v1245_v44, %v1247_v45 }
  0xc6   : > { %1144 = vmatprep.subr.bf16.mxu0 %v1036_v43  ;;  %1187 = vmatprep.subr.bf16.mxu1 %v1042_v40  ;;  %v1274_v56 = vand.u32 %v1260_v51, %v3025_v24  ;;  %v1277_v3 = vand.u32 %v1261_v60, %v3025_v24  ;;  %v2830_v40 = vld [vmem:[%s3436_s0 + $0x28] sm:$0xff]  }
  0xc7   : > { %1076 = vmatprep.mubr.bf16.mxu0 %v2860_v14  ;;  %1119 = vmatprep.mubr.bf16.mxu1 %v2860_v14 }
  0xc8   : > { %v1249_v48 = vpop.permute.xlu0 %1248  ;;  %v1241_v49 = vpop.permute.xlu1 %1240 }
  0xc9   : > { %v1262_v52 = vsel %vm1258_vm6, %v1247_v45, %v1249_v48  ;;  %v1259_v61 = vsel %vm1258_vm6, %v1241_v49, %v1243_v37 }
  0xca   : > { %v1280_v53 = vand.u32 %v1262_v52, %v3025_v24  ;;  %v1271_v4 = vand.u32 %v1259_v61, %v3025_v24 }
  0xcc   : > { %v1251_v57 = vpop.permute.xlu0 %1250  ;;  %2719 = vmatmul.mubr.msk.bf16.vlgmr.msra.gmra.mxu0 %vm324_vm3, %v2828_v50  ;;  %v1253_v58 = vpop.permute.xlu1 %1252  ;;  %2720 = vmatmul.mubr.msk.bf16.vlgmr.msra.gmra.mxu1 %vm324_vm3, %v2828_v50 }
  0xcd   : > { %1145 = vmatpush1.bf16.msra.mxu0 %v1033_v54  ;;  %1188 = vmatpush1.bf16.msra.mxu1 %v1039_v55  ;;  %v1264_v59 = vsel %vm1258_vm6, %v1251_v57, %v1253_v58  ;;  %v1263_v8 = vsel %vm1258_vm6, %v1249_v48, %v1251_v57 }
  0xce   : > { %1308 = vmatprep.subr.bf16.mxu0 %v1274_v56  ;;  %1351 = vmatprep.subr.bf16.mxu1 %v1280_v53  ;;  %v1286_v1 = vand.u32 %v1264_v59, %v3025_v24  ;;  %v1283_v17 = vand.u32 %v1263_v8, %v3025_v24 }
  0xcf   : > { %1162 = vmatprep.mubr.bf16.mxu0 %v2860_v14  ;;  %1205 = vmatprep.mubr.bf16.mxu1 %v2860_v14 }
  0xd0   : > { %v1255_v62 = vpop.permute.xlu0 %1254  ;;  %v1257_v63 = vpop.permute.xlu1 %1256 }
  0xd1   : > { %v1266_v0 = vsel %vm1258_vm6, %v1255_v62, %v1257_v63  ;;  %v1265_v9 = vsel %vm1258_vm6, %v1253_v58, %v1255_v62 }
  0xd2   : > { %v1292_v2 = vand.u32 %v1266_v0, %v3025_v24  ;;  %v1289_v18 = vand.u32 %v1265_v9, %v3025_v24 }
  0xd4   : > { %v1493_v5 = vpop.permute.xlu0 %1492  ;;  %2721 = vmatmul.mubr.msk.bf16.vlgmr.msra.gmra.mxu0 %vm324_vm3, %v2828_v50  ;;  %v1495_v6 = vpop.permute.xlu1 %1494  ;;  %2722 = vmatmul.mubr.msk.bf16.vlgmr.msra.gmra.mxu1 %vm324_vm3, %v2828_v50 }
  0xd5   : > { %1309 = vmatpush1.bf16.msra.mxu0 %v1271_v4  ;;  %1352 = vmatpush1.bf16.msra.mxu1 %v1277_v3  ;;  %v1510_v7 = vsel %vm1508_vm7, %v1493_v5, %v1495_v6 }
  0xd6   : > { %1394 = vmatprep.subr.bf16.mxu0 %v1286_v1  ;;  %1437 = vmatprep.subr.bf16.mxu1 %v1292_v2  ;;  %v1524_v15 = vand.u32 %v1510_v7, %v3025_v24  ;;  %v2831_v1 = vld [vmem:[%s3436_s0 + $0x30] sm:$0xff]  }
  0xd7   : > { %1326 = vmatprep.mubr.bf16.mxu0 %v2860_v14  ;;  %1369 = vmatprep.mubr.bf16.mxu1 %v2860_v14 }
  0xd8   : > { %v1497_v10 = vpop.permute.xlu0 %1496  ;;  %v1499_v11 = vpop.permute.xlu1 %1498 }
  0xd9   : > { %v1512_v13 = vsel %vm1508_vm7, %v1497_v10, %v1499_v11  ;;  %v1511_v21 = vsel %vm1508_vm7, %v1495_v6, %v1497_v10 }
  0xda   : > { %v1530_v16 = vand.u32 %v1512_v13, %v3025_v24  ;;  %v1527_v29 = vand.u32 %v1511_v21, %v3025_v24 }
  0xdc   : > { %v1491_v19 = vpop.permute.xlu0 %1490  ;;  %2726 = vmatmul.mubr.msk.bf16.vlgmr.msra.gmra.mxu0 %vm324_vm3, %v2829_v12  ;;  %v1501_v20 = vpop.permute.xlu1 %1500  ;;  %2727 = vmatmul.mubr.msk.bf16.vlgmr.msra.gmra.mxu1 %vm324_vm3, %v2829_v12 }
  0xdd   : > { %1395 = vmatpush1.bf16.msra.mxu0 %v1283_v17  ;;  %1438 = vmatpush1.bf16.msra.mxu1 %v1289_v18  ;;  %v1509_v22 = vsel %vm1508_vm7, %v1491_v19, %v1493_v5  ;;  %v1513_v36 = vsel %vm1508_vm7, %v1499_v11, %v1501_v20 }
  0xde   : > { %1558 = vmatprep.subr.bf16.mxu0 %v1524_v15  ;;  %1601 = vmatprep.subr.bf16.mxu1 %v1530_v16  ;;  %v1521_v30 = vand.u32 %v1509_v22, %v3025_v24  ;;  %v1533_v43 = vand.u32 %v1513_v36, %v3025_v24 }
  0xdf   : > { %1412 = vmatprep.mubr.bf16.mxu0 %v2860_v14  ;;  %1455 = vmatprep.mubr.bf16.mxu1 %v2860_v14 }
  0xe0   : > { %v1503_v23 = vpop.permute.xlu0 %1502  ;;  %v1505_v25 = vpop.permute.xlu1 %1504 }
  0xe1   : > { %v1514_v26 = vsel %vm1508_vm7, %v1501_v20, %v1503_v23  ;;  %v1515_v37 = vsel %vm1508_vm7, %v1503_v23, %v1505_v25 }
  0xe2   : > { %v1536_v27 = vand.u32 %v1514_v26, %v3025_v24  ;;  %v1539_v44 = vand.u32 %v1515_v37, %v3025_v24  ;;  %v2832_v26 = vld [vmem:[%s3436_s0 + $0x38] sm:$0xff]  }
  0xe4   : > { %v1507_v31 = vpop.permute.xlu0 %1506  ;;  %2728 = vmatmul.mubr.msk.bf16.vlgmr.msra.gmra.mxu0 %vm324_vm3, %v2829_v12  ;;  %v1743_v32 = vpop.permute.xlu1 %1742  ;;  %2729 = vmatmul.mubr.msk.bf16.vlgmr.msra.gmra.mxu1 %vm324_vm3, %v2829_v12 }
  0xe5   : > { %v1516_v33 = vsel %vm1508_vm7, %v1505_v25, %v1507_v31  ;;  %1559 = vmatpush1.bf16.msra.mxu0 %v1521_v30  ;;  %1602 = vmatpush1.bf16.msra.mxu1 %v1527_v29 }
  0xe6   : > { %v1542_v34 = vand.u32 %v1516_v33, %v3025_v24  ;;  %1644 = vmatprep.subr.bf16.mxu0 %v1536_v27  ;;  %1576 = vmatprep.mubr.bf16.mxu0 %v2860_v14 }
  0xe7   : > { %1619 = vmatprep.mubr.bf16.mxu1 %v2860_v14 }
  0xe8   : > { %v1745_v38 = vpop.permute.xlu0 %1744  ;;  %v1747_v39 = vpop.permute.xlu1 %1746  ;;  %1687 = vmatprep.subr.bf16.mxu1 %v1542_v34 }
  0xe9   : > { %v1760_v41 = vsel %vm1758_vm8, %v1743_v32, %v1745_v38  ;;  %v1761_v49 = vsel %vm1758_vm8, %v1745_v38, %v1747_v39 }
  0xea   : > { %v1774_v42 = vand.u32 %v1760_v41, %v3025_v24  ;;  %v1777_v55 = vand.u32 %v1761_v49, %v3025_v24 }
  0xec   : > { %v1749_v45 = vpop.permute.xlu0 %1748  ;;  %2733 = vmatmul.mubr.msk.bf16.vlgmr.msra.gmra.mxu0 %vm324_vm3, %v2830_v40  ;;  %v1741_v46 = vpop.permute.xlu1 %1740  ;;  %2734 = vmatmul.mubr.msk.bf16.vlgmr.msra.gmra.mxu1 %vm324_vm3, %v2830_v40 }
  0xed   : > { %v1762_v47 = vsel %vm1758_vm8, %v1747_v39, %v1749_v45  ;;  %1645 = vmatpush1.bf16.msra.mxu0 %v1533_v43  ;;  %1688 = vmatpush1.bf16.msra.mxu1 %v1539_v44  ;;  %v1759_v50 = vsel %vm1758_vm8, %v1741_v46, %v1743_v32 }
  0xee   : > { %v1780_v48 = vand.u32 %v1762_v47, %v3025_v24  ;;  %1808 = vmatprep.subr.bf16.mxu0 %v1774_v42  ;;  %1662 = vmatprep.mubr.bf16.mxu0 %v2860_v14  ;;  %v1771_v56 = vand.u32 %v1759_v50, %v3025_v24  ;;  %v2833_v50 = vld [vmem:[%s3436_s0 + $0x40] sm:$0xff]  }
  0xef   : > { %1705 = vmatprep.mubr.bf16.mxu1 %v2860_v14 }
  0xf0   : > { %v1751_v51 = vpop.permute.xlu0 %1750  ;;  %v1753_v52 = vpop.permute.xlu1 %1752  ;;  %1851 = vmatprep.subr.bf16.mxu1 %v1780_v48 }
  0xf1   : > { %v1764_v53 = vsel %vm1758_vm8, %v1751_v51, %v1753_v52  ;;  %v1763_v61 = vsel %vm1758_vm8, %v1749_v45, %v1751_v51 }
  0xf2   : > { %v1786_v54 = vand.u32 %v1764_v53, %v3025_v24  ;;  %v1783_v4 = vand.u32 %v1763_v61, %v3025_v24 }
  0xf4   : > { %v1755_v57 = vpop.permute.xlu0 %1754  ;;  %2735 = vmatmul.mubr.msk.bf16.vlgmr.msra.gmra.mxu0 %vm324_vm3, %v2830_v40  ;;  %v1757_v58 = vpop.permute.xlu1 %1756  ;;  %2736 = vmatmul.mubr.msk.bf16.vlgmr.msra.gmra.mxu1 %vm324_vm3, %v2830_v40 }
  0xf5   : > { %1809 = vmatpush1.bf16.msra.mxu0 %v1771_v56  ;;  %v1766_v59 = vsel %vm1758_vm8, %v1755_v57, %v1757_v58  ;;  %1852 = vmatpush1.bf16.msra.mxu1 %v1777_v55  ;;  %v1765_v62 = vsel %vm1758_vm8, %v1753_v52, %v1755_v57 }
  0xf6   : > { %v1792_v60 = vand.u32 %v1766_v59, %v3025_v24  ;;  %1894 = vmatprep.subr.bf16.mxu0 %v1786_v54  ;;  %1826 = vmatprep.mubr.bf16.mxu0 %v2860_v14  ;;  %v1789_v5 = vand.u32 %v1765_v62, %v3025_v24 }
  0xf7   : > { %1869 = vmatprep.mubr.bf16.mxu1 %v2860_v14 }
  0xf8   : > { %v1993_v63 = vpop.permute.xlu0 %1992  ;;  %v1995_v0 = vpop.permute.xlu1 %1994  ;;  %1937 = vmatprep.subr.bf16.mxu1 %v1792_v60 }
  0xf9   : > { %v2010_v2 = vsel %vm2008_vm9, %v1993_v63, %v1995_v0 }
  0xfa   : > { %v2024_v3 = vand.u32 %v2010_v2, %v3025_v24 }
  0xfc   : > { %v1997_v6 = vpop.permute.xlu0 %1996  ;;  %2740 = vmatmul.mubr.msk.bf16.vlgmr.msra.gmra.mxu0 %vm324_vm3, %v2831_v1  ;;  %v1999_v7 = vpop.permute.xlu1 %1998  ;;  %2741 = vmatmul.mubr.msk.bf16.vlgmr.msra.gmra.mxu1 %vm324_vm3, %v2831_v1 }
  0xfd   : > { %1895 = vmatpush1.bf16.msra.mxu0 %v1783_v4  ;;  %v2012_v8 = vsel %vm2008_vm9, %v1997_v6, %v1999_v7  ;;  %1938 = vmatpush1.bf16.msra.mxu1 %v1789_v5  ;;  %v2011_v10 = vsel %vm2008_vm9, %v1995_v0, %v1997_v6 }
  0xfe   : > { %v2030_v9 = vand.u32 %v2012_v8, %v3025_v24  ;;  %2058 = vmatprep.subr.bf16.mxu0 %v2024_v3  ;;  %1912 = vmatprep.mubr.bf16.mxu0 %v2860_v14  ;;  %v2027_v16 = vand.u32 %v2011_v10, %v3025_v24 }
  0xff   : > { %1955 = vmatprep.mubr.bf16.mxu1 %v2860_v14 }
 0x100   : > { %v1991_v11 = vpop.permute.xlu0 %1990  ;;  %v2001_v12 = vpop.permute.xlu1 %2000  ;;  %2101 = vmatprep.subr.bf16.mxu1 %v2030_v9 }
 0x101   : > { %v2009_v13 = vsel %vm2008_vm9, %v1991_v11, %v1993_v63  ;;  %v2013_v22 = vsel %vm2008_vm9, %v1999_v7, %v2001_v12 }
 0x102   : > { %v2021_v15 = vand.u32 %v2009_v13, %v3025_v24  ;;  %v2033_v30 = vand.u32 %v2013_v22, %v3025_v24 }
 0x104   : > { %v2003_v17 = vpop.permute.xlu0 %2002  ;;  %2742 = vmatmul.mubr.msk.bf16.vlgmr.msra.gmra.mxu0 %vm324_vm3, %v2831_v1  ;;  %v2005_v18 = vpop.permute.xlu1 %2004  ;;  %2743 = vmatmul.mubr.msk.bf16.vlgmr.msra.gmra.mxu1 %vm324_vm3, %v2831_v1 }
 0x105   : > { %v2014_v19 = vsel %vm2008_vm9, %v2001_v12, %v2003_v17  ;;  %2059 = vmatpush1.bf16.msra.mxu0 %v2021_v15  ;;  %2102 = vmatpush1.bf16.msra.mxu1 %v2027_v16  ;;  %v2015_v21 = vsel %vm2008_vm9, %v2003_v17, %v2005_v18 }
 0x106   : > { %v2036_v20 = vand.u32 %v2014_v19, %v3025_v24  ;;  %2076 = vmatprep.mubr.bf16.mxu0 %v2860_v14  ;;  %2119 = vmatprep.mubr.bf16.mxu1 %v2860_v14  ;;  %v2039_v28 = vand.u32 %v2015_v21, %v3025_v24 }
 0x108   : > { %v2007_v23 = vpop.permute.xlu0 %2006  ;;  %2144 = vmatprep.subr.bf16.mxu0 %v2036_v20  ;;  %v2243_v25 = vpop.permute.xlu1 %2242 }
 0x109   : > { %v2016_v27 = vsel %vm2008_vm9, %v2005_v18, %v2007_v23 }
 0x10a   : > { %v2042_v29 = vand.u32 %v2016_v27, %v3025_v24 }
 0x10c   : > { %v2245_v31 = vpop.permute.xlu0 %2244  ;;  %2747 = vmatmul.mubr.msk.bf16.vlgmr.msra.gmra.mxu0 %vm324_vm3, %v2832_v26  ;;  %v2247_v32 = vpop.permute.xlu1 %2246  ;;  %2748 = vmatmul.mubr.msk.bf16.vlgmr.msra.gmra.mxu1 %vm324_vm3, %v2832_v26 }
 0x10d   : > { %v2260_v33 = vsel %vm2258_vm10, %v2243_v25, %v2245_v31  ;;  %2145 = vmatpush1.bf16.msra.mxu0 %v2033_v30  ;;  %2187 = vmatprep.subr.bf16.mxu1 %v2042_v29  ;;  %v2261_v35 = vsel %vm2258_vm10, %v2245_v31, %v2247_v32 }
 0x10e   : > { %v2274_v34 = vand.u32 %v2260_v33, %v3025_v24  ;;  %2188 = vmatpush1.bf16.msra.mxu1 %v2039_v28  ;;  %2162 = vmatprep.mubr.bf16.mxu0 %v2860_v14  ;;  %v2277_v40 = vand.u32 %v2261_v35, %v3025_v24 }
 0x10f   : > { %2205 = vmatprep.mubr.bf16.mxu1 %v2860_v14 }
 0x110   : > { %v2249_v36 = vpop.permute.xlu0 %2248  ;;  %2308 = vmatprep.subr.bf16.mxu0 %v2274_v34  ;;  %v2241_v37 = vpop.permute.xlu1 %2240 }
 0x111   : > { %v2262_v38 = vsel %vm2258_vm10, %v2247_v32, %v2249_v36  ;;  %v2259_v39 = vsel %vm2258_vm10, %v2241_v37, %v2243_v25 }
 0x112   : > { %v2280_v41 = vand.u32 %v2262_v38, %v3025_v24  ;;  %v2271_v42 = vand.u32 %v2259_v39, %v3025_v24 }
 0x114   : > { %v2251_v43 = vpop.permute.xlu0 %2250  ;;  %2749 = vmatmul.mubr.msk.bf16.vlgmr.msra.gmra.mxu0 %vm324_vm3, %v2832_v26  ;;  %v2253_v44 = vpop.permute.xlu1 %2252  ;;  %2750 = vmatmul.mubr.msk.bf16.vlgmr.msra.gmra.mxu1 %vm324_vm3, %v2832_v26 }
 0x115   : > { %2309 = vmatpush1.bf16.msra.mxu0 %v2271_v42  ;;  %v2264_v45 = vsel %vm2258_vm10, %v2251_v43, %v2253_v44  ;;  %2351 = vmatprep.subr.bf16.mxu1 %v2280_v41  ;;  %v2263_v47 = vsel %vm2258_vm10, %v2249_v36, %v2251_v43 }
 0x116   : > { %v2286_v46 = vand.u32 %v2264_v45, %v3025_v24  ;;  %2352 = vmatpush1.bf16.msra.mxu1 %v2277_v40  ;;  %2326 = vmatprep.mubr.bf16.mxu0 %v2860_v14  ;;  %v2283_v55 = vand.u32 %v2263_v47, %v3025_v24 }
 0x117   : > { %2369 = vmatprep.mubr.bf16.mxu1 %v2860_v14 }
 0x118   : > { %v2255_v48 = vpop.permute.xlu0 %2254  ;;  %v2257_v49 = vpop.permute.xlu1 %2256  ;;  %2394 = vmatprep.subr.bf16.mxu0 %v2286_v46 }
 0x119   : > { %v2265_v51 = vsel %vm2258_vm10, %v2253_v44, %v2255_v48  ;;  %v2266_v52 = vsel %vm2258_vm10, %v2255_v48, %v2257_v49 }
 0x11a   : > { %v2289_v53 = vand.u32 %v2265_v51, %v3025_v24  ;;  %v2292_v54 = vand.u32 %v2266_v52, %v3025_v24 }
 0x11c   : > { %2754 = vmatmul.mubr.msk.bf16.vlgmr.msra.gmra.mxu0 %vm324_vm3, %v2833_v50  ;;  %2755 = vmatmul.mubr.msk.bf16.vlgmr.msra.gmra.mxu1 %vm324_vm3, %v2833_v50 }
 0x11d   : > { %2395 = vmatpush1.bf16.msra.mxu0 %v2283_v55  ;;  %2437 = vmatprep.subr.bf16.mxu1 %v2292_v54 }
 0x11e   : > { %2438 = vmatpush1.bf16.msra.mxu1 %v2289_v53  ;;  %2412 = vmatprep.mubr.bf16.mxu0 %v2860_v14 }
 0x11f   : > { %2455 = vmatprep.mubr.bf16.mxu1 %v2860_v14 }
 0x124   : > { %2756 = vmatmul.mubr.msk.bf16.vlgmr.msra.gmra.mxu0 %vm324_vm3, %v2833_v50  ;;  %2757 = vmatmul.mubr.msk.bf16.vlgmr.msra.gmra.mxu1 %vm324_vm3, %v2833_v50 }
 0x15b   : > { %v433_v56 = vpop.f32.mrf.mxu1 }
 0x15c   : > { %v390_v57 = vpop.f32.mrf.mxu0 }
 0x15d   : > { %v435_v58 = vpop.f32.mrf.mxu1 }
 0x15e   : > { %v392_v59 = vpop.f32.mrf.mxu0 }
 0x15f   : > { %v437_v24 = vpop.f32.mrf.mxu1 }
 0x160   : > { %v394_v60 = vpop.f32.mrf.mxu0 }
 0x161   : > { %v439_v61 = vpop.f32.mrf.mxu1 }
 0x162   : > { %v396_v62 = vpop.f32.mrf.mxu0 }
 0x164   : > { %v476_v63 = vpop.f32.mrf.mxu0  ;;  %v519_v0 = vpop.f32.mrf.mxu1 }
 0x166   : > { %v478_v1 = vpop.f32.mrf.mxu0  ;;  %v521_v2 = vpop.f32.mrf.mxu1 }
 0x168   : > { %v480_v3 = vpop.f32.mrf.mxu0  ;;  %v523_v4 = vpop.f32.mrf.mxu1 }
 0x16a   : > { %v482_v5 = vpop.f32.mrf.mxu0  ;;  %v525_v14 = vpop.f32.mrf.mxu1 }
 0x16c   : > { %v594_v6 = vpop.f32.mrf.mxu0  ;;  %v637_v7 = vpop.f32.mrf.mxu1 }
 0x16d   : > { %v595_v8 = vadd.f32 %v594_v6, %v390_v57  ;;  %v638_v9 = vadd.f32 %v637_v7, %v433_v56 }
 0x16e   : > { %v596_v10 = vpop.f32.mrf.mxu0  ;;  %v639_v11 = vpop.f32.mrf.mxu1 }
 0x16f   : > { %v597_v12 = vadd.f32 %v596_v10, %v392_v59  ;;  %v640_v13 = vadd.f32 %v639_v11, %v435_v58 }
 0x170   : > { %v598_v15 = vpop.f32.mrf.mxu0  ;;  %v641_v16 = vpop.f32.mrf.mxu1 }
 0x171   : > { %v599_v17 = vadd.f32 %v598_v15, %v394_v60  ;;  %v642_v18 = vadd.f32 %v641_v16, %v437_v24 }
 0x172   : > { %v600_v19 = vpop.f32.mrf.mxu0  ;;  %v643_v20 = vpop.f32.mrf.mxu1 }
 0x173   : > { %v601_v21 = vadd.f32 %v600_v19, %v396_v62  ;;  %v644_v22 = vadd.f32 %v643_v20, %v439_v61 }
 0x174   : > { %v680_v23 = vpop.f32.mrf.mxu0  ;;  %v723_v25 = vpop.f32.mrf.mxu1 }
 0x175   : > { %v681_v26 = vadd.f32 %v680_v23, %v476_v63  ;;  %v724_v27 = vadd.f32 %v723_v25, %v519_v0 }
 0x176   : > { %v682_v28 = vpop.f32.mrf.mxu0  ;;  %v725_v29 = vpop.f32.mrf.mxu1 }
 0x177   : > { %v683_v30 = vadd.f32 %v682_v28, %v478_v1  ;;  %v726_v31 = vadd.f32 %v725_v29, %v521_v2 }
 0x178   : > { %v684_v32 = vpop.f32.mrf.mxu0  ;;  %v727_v33 = vpop.f32.mrf.mxu1 }
 0x179   : > { %v685_v34 = vadd.f32 %v684_v32, %v480_v3  ;;  %v728_v35 = vadd.f32 %v727_v33, %v523_v4 }
 0x17a   : > { %v686_v36 = vpop.f32.mrf.mxu0  ;;  %v729_v37 = vpop.f32.mrf.mxu1 }
 0x17b   : > { %v687_v38 = vadd.f32 %v686_v36, %v482_v5  ;;  %v730_v39 = vadd.f32 %v729_v37, %v525_v14 }
 0x17c   : > { %v828_v40 = vpop.f32.mrf.mxu0  ;;  %v871_v41 = vpop.f32.mrf.mxu1 }
 0x17d   : > { %v966_v42 = vadd.f32 %v828_v40, %v595_v8  ;;  %v968_v43 = vadd.f32 %v871_v41, %v638_v9 }
 0x17e   : > { %v830_v44 = vpop.f32.mrf.mxu0  ;;  %v873_v45 = vpop.f32.mrf.mxu1 }
 0x17f   : > { %v967_v46 = vadd.f32 %v830_v44, %v597_v12  ;;  %v969_v47 = vadd.f32 %v873_v45, %v640_v13 }
 0x180   : > { %v832_v48 = vpop.f32.mrf.mxu0  ;;  %v875_v49 = vpop.f32.mrf.mxu1 }
 0x181   : > { %v974_v50 = vadd.f32 %v832_v48, %v599_v17  ;;  %v976_v51 = vadd.f32 %v875_v49, %v642_v18 }
 0x182   : > { %v834_v52 = vpop.f32.mrf.mxu0  ;;  %v877_v53 = vpop.f32.mrf.mxu1 }
 0x183   : > { %v975_v54 = vadd.f32 %v834_v52, %v601_v21  ;;  %v977_v55 = vadd.f32 %v877_v53, %v644_v22 }
 0x184   : > { %v914_v56 = vpop.f32.mrf.mxu0  ;;  %v957_v57 = vpop.f32.mrf.mxu1 }
 0x185   : > { %v970_v58 = vadd.f32 %v914_v56, %v681_v26  ;;  %v972_v59 = vadd.f32 %v957_v57, %v724_v27 }
 0x186   : > { %v916_v24 = vpop.f32.mrf.mxu0  ;;  %v959_v60 = vpop.f32.mrf.mxu1 }
 0x187   : > { %v971_v61 = vadd.f32 %v916_v24, %v683_v30  ;;  %v973_v62 = vadd.f32 %v959_v60, %v726_v31 }
 0x188   : > { %v918_v63 = vpop.f32.mrf.mxu0  ;;  %v961_v0 = vpop.f32.mrf.mxu1 }
 0x189   : > { %v978_v1 = vadd.f32 %v918_v63, %v685_v34  ;;  %v980_v2 = vadd.f32 %v961_v0, %v728_v35 }
 0x18a   : > { %v920_v3 = vpop.f32.mrf.mxu0  ;;  %v963_v4 = vpop.f32.mrf.mxu1 }
 0x18b   : > { %v979_v5 = vadd.f32 %v920_v3, %v687_v38  ;;  %v981_v14 = vadd.f32 %v963_v4, %v730_v39 }
 0x18c   : > { %v1078_v6 = vpop.f32.mrf.mxu0  ;;  %v1121_v7 = vpop.f32.mrf.mxu1 }
 0x18d   : > { %v3295_v8 = vadd.f32 %v1078_v6, %v966_v42  ;;  %v3297_v9 = vadd.f32 %v1121_v7, %v968_v43 }
 0x18e   : > { %v1080_v10 = vpop.f32.mrf.mxu0  ;;  %v1123_v11 = vpop.f32.mrf.mxu1 }
 0x18f   : > { %v3299_v12 = vadd.f32 %v1080_v10, %v967_v46  ;;  %v3301_v13 = vadd.f32 %v1123_v11, %v969_v47 }
 0x190   : > { %v1082_v15 = vpop.f32.mrf.mxu0  ;;  %v1125_v16 = vpop.f32.mrf.mxu1 }
 0x191   : > { %v3303_v17 = vadd.f32 %v1082_v15, %v974_v50  ;;  %v3305_v18 = vadd.f32 %v1125_v16, %v976_v51 }
 0x192   : > { %v1084_v19 = vpop.f32.mrf.mxu0  ;;  %v1127_v20 = vpop.f32.mrf.mxu1 }
 0x193   : > { %v3307_v21 = vadd.f32 %v1084_v19, %v975_v54  ;;  %v3309_v22 = vadd.f32 %v1127_v20, %v977_v55 }
 0x194   : > { %v1164_v23 = vpop.f32.mrf.mxu0  ;;  %v1207_v25 = vpop.f32.mrf.mxu1 }
 0x195   : > { %v3311_v26 = vadd.f32 %v1164_v23, %v970_v58  ;;  %v3313_v27 = vadd.f32 %v1207_v25, %v972_v59 }
 0x196   : > { %v1166_v28 = vpop.f32.mrf.mxu0  ;;  %v1209_v29 = vpop.f32.mrf.mxu1 }
 0x197   : > { %v3315_v30 = vadd.f32 %v1166_v28, %v971_v61  ;;  %v3317_v31 = vadd.f32 %v1209_v29, %v973_v62 }
 0x198   : > { %v1168_v32 = vpop.f32.mrf.mxu0  ;;  %v1211_v33 = vpop.f32.mrf.mxu1 }
 0x199   : > { %3442 = vst [vmem:[#allocation3_spill] sm:$0xff] %v3317_v31  ;;  %v3319_v34 = vadd.f32 %v1168_v32, %v978_v1  ;;  %v3321_v35 = vadd.f32 %v1211_v33, %v980_v2 }
 0x19a   : > { %v1170_v36 = vpop.f32.mrf.mxu0  ;;  %v1213_v37 = vpop.f32.mrf.mxu1 }
 0x19b   : > { %3443 = vst [vmem:[#allocation4_spill] sm:$0xff] %v3319_v34  ;;  %3444 = vst [vmem:[#allocation5_spill] sm:$0xff] %v3321_v35  ;;  %v3323_v38 = vadd.f32 %v1170_v36, %v979_v5  ;;  %v3325_v39 = vadd.f32 %v1213_v37, %v981_v14 }
 0x19c   : > { %v1328_v40 = vpop.f32.mrf.mxu0  ;;  %v1371_v41 = vpop.f32.mrf.mxu1 }
 0x19d   : > { %3445 = vst [vmem:[#allocation6_spill] sm:$0xff] %v3323_v38  ;;  %3446 = vst [vmem:[#allocation7_spill] sm:$0xff] %v3325_v39 }
 0x19e   : > { %v1330_v42 = vpop.f32.mrf.mxu0  ;;  %v1373_v43 = vpop.f32.mrf.mxu1 }
 0x1a0   : > { %v1332_v44 = vpop.f32.mrf.mxu0  ;;  %v1375_v45 = vpop.f32.mrf.mxu1 }
 0x1a2   : > { %v1334_v46 = vpop.f32.mrf.mxu0  ;;  %v1377_v47 = vpop.f32.mrf.mxu1 }
 0x1a4   : > { %v1414_v48 = vpop.f32.mrf.mxu0  ;;  %v1457_v49 = vpop.f32.mrf.mxu1 }
 0x1a6   : > { %v1416_v50 = vpop.f32.mrf.mxu0  ;;  %v1459_v51 = vpop.f32.mrf.mxu1 }
 0x1a8   : > { %v1418_v52 = vpop.f32.mrf.mxu0  ;;  %v1461_v53 = vpop.f32.mrf.mxu1 }
 0x1aa   : > { %v1420_v54 = vpop.f32.mrf.mxu0  ;;  %v1463_v55 = vpop.f32.mrf.mxu1 }
 0x1ac   : > { %v1578_v56 = vpop.f32.mrf.mxu0  ;;  %v1621_v57 = vpop.f32.mrf.mxu1 }
 0x1ae   : > { %v1580_v58 = vpop.f32.mrf.mxu0  ;;  %v1623_v59 = vpop.f32.mrf.mxu1 }
 0x1b0   : > { %v1582_v24 = vpop.f32.mrf.mxu0  ;;  %v1625_v60 = vpop.f32.mrf.mxu1 }
 0x1b2   : > { %v1584_v61 = vpop.f32.mrf.mxu0  ;;  %v1627_v62 = vpop.f32.mrf.mxu1 }
 0x1b4   : > { %v1664_v63 = vpop.f32.mrf.mxu0  ;;  %v1707_v0 = vpop.f32.mrf.mxu1 }
 0x1b6   : > { %v1666_v1 = vpop.f32.mrf.mxu0  ;;  %v1709_v2 = vpop.f32.mrf.mxu1 }
 0x1b8   : > { %v1668_v3 = vpop.f32.mrf.mxu0  ;;  %v1711_v4 = vpop.f32.mrf.mxu1 }
 0x1ba   : > { %v1670_v5 = vpop.f32.mrf.mxu0  ;;  %v1713_v14 = vpop.f32.mrf.mxu1 }
 0x1bc   : > { %v1828_v6 = vpop.f32.mrf.mxu0  ;;  %v1871_v7 = vpop.f32.mrf.mxu1 }
 0x1be   : > { %v1830_v10 = vpop.f32.mrf.mxu0  ;;  %v1873_v11 = vpop.f32.mrf.mxu1 }
 0x1c0   : > { %v1832_v15 = vpop.f32.mrf.mxu0  ;;  %v1875_v16 = vpop.f32.mrf.mxu1 }
 0x1c2   : > { %v1834_v19 = vpop.f32.mrf.mxu0  ;;  %v1877_v20 = vpop.f32.mrf.mxu1 }
 0x1c4   : > { %v3327_v23 = vpop.f32.mrf.mxu0  ;;  %v3329_v25 = vpop.f32.mrf.mxu1 }
 0x1c5   : > { %3447 = vst [vmem:[#allocation8_spill] sm:$0xff] %v3327_v23  ;;  %3448 = vst [vmem:[#allocation9_spill] sm:$0xff] %v3329_v25 }
 0x1c6   : > { %v3331_v28 = vpop.f32.mrf.mxu0  ;;  %v3333_v29 = vpop.f32.mrf.mxu1 }
 0x1c7   : > { %3449 = vst [vmem:[#allocation10_spill] sm:$0xff] %v3331_v28  ;;  %3450 = vst [vmem:[#allocation11_spill] sm:$0xff] %v3333_v29  ;;  %v1466_v29 = vadd.f32 %v1328_v40, %v3295_v8  ;;  %v1476_v28 = vadd.f32 %v1375_v45, %v3305_v18  ;;  %v1470_v8 = vadd.f32 %v1414_v48, %v3311_v26  ;;  %v3461_v40 = vld [vmem:[#allocation3_spill] sm:$0xff] }
 0x1c8   : > { %v3335_v32 = vpop.f32.mrf.mxu0  ;;  %v3337_v33 = vpop.f32.mrf.mxu1 }
 0x1c9   : > { %3451 = vst [vmem:[#allocation12_spill] sm:$0xff] %v3335_v32  ;;  %3452 = vst [vmem:[#allocation13_spill] sm:$0xff] %v3337_v33  ;;  %v1468_v32 = vadd.f32 %v1371_v41, %v3297_v9  ;;  %v1467_v33 = vadd.f32 %v1330_v42, %v3299_v12  ;;  %v1472_v9 = vadd.f32 %v1457_v49, %v3313_v27  ;;  %v3462_v41 = vld [vmem:[#allocation4_spill] sm:$0xff]  ;;  %v3463_v42 = vld [vmem:[#allocation5_spill] sm:$0xff] }
 0x1ca   : > { %v3339_v36 = vpop.f32.mrf.mxu0  ;;  %v3341_v37 = vpop.f32.mrf.mxu1  ;;  %v1471_v12 = vadd.f32 %v1416_v50, %v3315_v30  ;;  %v1480_v18 = vadd.f32 %v1461_v53, %v3463_v42  ;;  %v1726_v27 = vadd.f32 %v1625_v60, %v1476_v28 }
 0x1cb   : > { %3453 = vst [vmem:[#allocation14_spill] sm:$0xff] %v3339_v36  ;;  %3454 = vst [vmem:[#allocation15_spill] sm:$0xff] %v3341_v37  ;;  %v1469_v36 = vadd.f32 %v1373_v43, %v3301_v13  ;;  %v1474_v37 = vadd.f32 %v1332_v44, %v3303_v17  ;;  %v1473_v13 = vadd.f32 %v1459_v51, %v3461_v40  ;;  %v3464_v43 = vld [vmem:[#allocation6_spill] sm:$0xff]  ;;  %v3465_v44 = vld [vmem:[#allocation7_spill] sm:$0xff] }
 0x1cc   : > { %v2078_v39 = vpop.f32.mrf.mxu0  ;;  %v2121_v38 = vpop.f32.mrf.mxu1  ;;  %v1478_v17 = vadd.f32 %v1418_v52, %v3462_v41  ;;  %v1720_v40 = vadd.f32 %v1664_v63, %v1470_v8  ;;  %v1722_v52 = vadd.f32 %v1707_v0, %v1472_v9  ;;  %v1721_v41 = vadd.f32 %v1666_v1, %v1471_v12  ;;  %v3466_v63 = vld [vmem:[#allocation8_spill] sm:$0xff]  ;;  %v3467_v1 = vld [vmem:[#allocation9_spill] sm:$0xff] }
 0x1cd   : > { %v1719_v26 = vadd.f32 %v1623_v59, %v1469_v36  ;;  %v1724_v48 = vadd.f32 %v1582_v24, %v1474_v37  ;;  %v1723_v53 = vadd.f32 %v1709_v2, %v1473_v13  ;;  %v1976_v60 = vadd.f32 %v1875_v16, %v1726_v27 }
 0x1ce   : > { %v3343_v35 = vpop.f32.mrf.mxu0  ;;  %v3345_v34 = vpop.f32.mrf.mxu1  ;;  %v1728_v42 = vadd.f32 %v1668_v3, %v1478_v17  ;;  %v1970_v0 = vadd.f32 %v3466_v63, %v1720_v40  ;;  %v1972_v2 = vadd.f32 %v3467_v1, %v1722_v52 }
 0x1cf   : > { %3455 = vst [vmem:[#allocation16_spill] sm:$0xff] %v3343_v35  ;;  %3456 = vst [vmem:[#allocation17_spill] sm:$0xff] %v3345_v34  ;;  %v1475_v35 = vadd.f32 %v1334_v46, %v3307_v21  ;;  %v1477_v34 = vadd.f32 %v1377_v47, %v3309_v22  ;;  %v1479_v21 = vadd.f32 %v1420_v54, %v3464_v43 }
 0x1d0   : > { %v3347_v23 = vpop.f32.mrf.mxu0  ;;  %v3349_v25 = vpop.f32.mrf.mxu1  ;;  %v1481_v22 = vadd.f32 %v1463_v55, %v3465_v44  ;;  %v1716_v47 = vadd.f32 %v1578_v56, %v1466_v29  ;;  %v1730_v54 = vadd.f32 %v1711_v4, %v1480_v18  ;;  %v1969_v59 = vadd.f32 %v1873_v11, %v1719_v26 }
 0x1d1   : > { %3457 = vst [vmem:[#allocation18_spill] sm:$0xff] %v3347_v23  ;;  %3458 = vst [vmem:[#allocation19_spill] sm:$0xff] %v3349_v25  ;;  %v1725_v49 = vadd.f32 %v1584_v61, %v1475_v35  ;;  %v1727_v30 = vadd.f32 %v1627_v62, %v1477_v34  ;;  %v1729_v43 = vadd.f32 %v1670_v5, %v1479_v21  ;;  %v3377_v5 = vpop.permute.xlu0 %2486 }
 0x1d2   : > { %v3359_v31 = vpop.f32.mrf.mxu0  ;;  %v3361_v23 = vpop.f32.mrf.mxu1  ;;  %v1731_v55 = vadd.f32 %v1713_v14, %v1481_v22  ;;  %v1966_v56 = vadd.f32 %v1828_v6, %v1716_v47  ;;  %v1974_v24 = vadd.f32 %v1832_v15, %v1724_v48  ;;  %v3468_v14 = vld [vmem:[#allocation10_spill] sm:$0xff]  ;;  %v3469_v6 = vld [vmem:[#allocation11_spill] sm:$0xff]  ;;  %v3471_v15 = vld [vmem:[#allocation13_spill] sm:$0xff] }
 0x1d3   : > { %3459 = vst [vmem:[#allocation20_spill] sm:$0xff] %v3359_v31  ;;  %3460 = vst [vmem:[#allocation21_spill] sm:$0xff] %v3361_v23  ;;  %v1718_v23 = vadd.f32 %v1621_v57, %v1468_v32  ;;  %v1717_v31 = vadd.f32 %v1580_v58, %v1467_v33  ;;  %v1975_v35 = vadd.f32 %v1834_v19, %v1725_v49  ;;  %v3475_v37 = vld [vmem:[#allocation15_spill] sm:$0xff] }
 0x1d4   : > { %v2164_v45 = vpop.f32.mrf.mxu0  ;;  %v2207_v46 = vpop.f32.mrf.mxu1  ;;  %v1977_v34 = vadd.f32 %v1877_v20, %v1727_v30  ;;  %v2216_v3 = vadd.f32 %v2078_v39, %v1966_v56  ;;  %v1980_v16 = vadd.f32 %v3471_v15, %v1730_v54  ;;  %v1981_v8 = vadd.f32 %v3475_v37, %v1731_v55 }
 0x1d5   : > { %v1968_v57 = vadd.f32 %v1871_v7, %v1718_v23  ;;  %v1967_v58 = vadd.f32 %v1830_v10, %v1717_v31  ;;  %v1971_v31 = vadd.f32 %v3468_v14, %v1721_v41  ;;  %v1973_v7 = vadd.f32 %v3469_v6, %v1723_v53  ;;  %v3470_v10 = vld [vmem:[#allocation12_spill] sm:$0xff] }
 0x1d6   : > { %v2166_v50 = vpop.f32.mrf.mxu0  ;;  %v2209_v51 = vpop.f32.mrf.mxu1  ;;  %v1978_v11 = vadd.f32 %v3470_v10, %v1728_v42  ;;  %v3472_v23 = vld [vmem:[#allocation16_spill] sm:$0xff]  ;;  %v3473_v29 = vld [vmem:[#allocation17_spill] sm:$0xff]  ;;  %v2220_v52 = vadd.f32 %v2164_v45, %v1970_v0  ;;  %v2222_v41 = vadd.f32 %v2207_v46, %v1972_v2 }
 0x1d7   : > { %v2218_v4 = vadd.f32 %v2121_v38, %v1968_v57  ;;  %v2217_v28 = vadd.f32 %v3472_v23, %v1967_v58  ;;  %v2219_v32 = vadd.f32 %v3473_v29, %v1969_v59  ;;  %v3474_v38 = vld [vmem:[#allocation14_spill] sm:$0xff]  ;;  %v2221_v54 = vadd.f32 %v2166_v50, %v1971_v31  ;;  %v2492_v57 = vpop.permute.xlu1 %2491 }
 0x1d8   : > { %v2168_v44 = vpop.f32.mrf.mxu0  ;;  %v2211_v25 = vpop.f32.mrf.mxu1  ;;  %v1979_v36 = vadd.f32 %v3474_v38, %v1729_v43  ;;  %v3476_v9 = vld [vmem:[#allocation18_spill] sm:$0xff]  ;;  %v3477_v13 = vld [vmem:[#allocation19_spill] sm:$0xff]  ;;  %v2223_v43 = vadd.f32 %v2209_v51, %v1973_v7 }
 0x1d9   : > { %v2224_v12 = vadd.f32 %v3476_v9, %v1974_v24  ;;  %v2226_v17 = vadd.f32 %v3477_v13, %v1976_v60  ;;  %v2228_v0 = vadd.f32 %v2168_v44, %v1978_v11  ;;  %v2230_v2 = vadd.f32 %v2211_v25, %v1980_v16 }
 0x1da   : > { %v3371_v61 = vpop.f32.mrf.mxu0  ;;  %v3373_v62 = vpop.f32.mrf.mxu1  ;;  %v3478_v27 = vld [vmem:[#allocation20_spill] sm:$0xff]  ;;  %v3479_v30 = vld [vmem:[#allocation21_spill] sm:$0xff] }
 0x1db   : > { %v2225_v49 = vadd.f32 %v3478_v27, %v1975_v35  ;;  %v2227_v40 = vadd.f32 %v3479_v30, %v1977_v34  ;;  %v2229_v29 = vadd.f32 %v3371_v61, %v1979_v36 }
 0x1dc   : > { %v2328_v19 = vpop.f32.mrf.mxu0  ;;  %v2371_v20 = vpop.f32.mrf.mxu1 }
 0x1dd   : > { %v2466_v33 = vadd.f32 %v2328_v19, %v2216_v3  ;;  %v2468_v39 = vadd.f32 %v2371_v20, %v2218_v4 }
 0x1de   : > { %v2330_v18 = vpop.f32.mrf.mxu0  ;;  %v2373_v21 = vpop.f32.mrf.mxu1 }
 0x1df   : > { %v2467_v22 = vadd.f32 %v2330_v18, %v2217_v28  ;;  %v2494_v47 = vadd.f32 %v3377_v5, %v2466_v33  ;;  %v2469_v26 = vadd.f32 %v2373_v21, %v2219_v32  ;;  %v2496_v48 = vadd.f32 %v3377_v5, %v2468_v39 }
 0x1e0   : > { %v2332_v53 = vpop.f32.mrf.mxu0  ;;  %v2375_v42 = vpop.f32.mrf.mxu1  ;;  %v2231_v32 = vadd.f32 %v3373_v62, %v1981_v8 }
 0x1e1   : > { %v2495_v55 = vadd.f32 %v3377_v5, %v2467_v22  ;;  %v2497_v56 = vadd.f32 %v3377_v5, %v2469_v26  ;;  %v2510_v58 = vmax.f32 %v2494_v47, 0.0  ;;  %v2512_v59 = vmax.f32 %v2496_v48, 0.0 }
 0x1e2   : > { %v2474_v24 = vadd.f32 %v2332_v53, %v2224_v12  ;;  %v2476_v60 = vadd.f32 %v2375_v42, %v2226_v17  ;;  %v2334_v63 = vpop.f32.mrf.mxu0  ;;  %v2377_v35 = vpop.f32.mrf.mxu1 }
 0x1e3   : > { %v2511_v1 = vmax.f32 %v2495_v55, 0.0  ;;  %v2513_v34 = vmax.f32 %v2497_v56, 0.0  ;;  %v2475_v45 = vadd.f32 %v2334_v63, %v2225_v49  ;;  %v2477_v46 = vadd.f32 %v2377_v35, %v2227_v40 }
 0x1e4   : > { %v2502_v50 = vadd.f32 %v2492_v57, %v2474_v24  ;;  %v2504_v51 = vadd.f32 %v2492_v57, %v2476_v60  ;;  %v2414_v3 = vpop.f32.mrf.mxu0  ;;  %v2457_v4 = vpop.f32.mrf.mxu1 }
 0x1e5   : > { %v2777_v14 = vpack.c.bf16 %v2511_v1, %v2510_v58  ;;  %v2778_v31 = vpack.c.bf16 %v2513_v34, %v2512_v59  ;;  %v2503_v6 = vadd.f32 %v2492_v57, %v2475_v45  ;;  %v2505_v7 = vadd.f32 %v2492_v57, %v2477_v46 }
 0x1e6   : > { %v2518_v10 = vmax.f32 %v2502_v50, 0.0  ;;  %v2520_v15 = vmax.f32 %v2504_v51, 0.0  ;;  %v2470_v19 = vadd.f32 %v2414_v3, %v2220_v52  ;;  %v2472_v20 = vadd.f32 %v2457_v4, %v2222_v41  ;;  %v2416_v23 = vpop.f32.mrf.mxu0  ;;  %v2459_v28 = vpop.f32.mrf.mxu1 }
 0x1e7   : > { %2574 = vst [vmem:[%s3396_s15] sm:$0xff] %v2777_v14  ;;  %2575 = vst [vmem:[%s3396_s15 + $0x8] sm:$0xff] %v2778_v31  ;;  %v2519_v25 = vmax.f32 %v2503_v6, 0.0  ;;  %v2521_v44 = vmax.f32 %v2505_v7, 0.0  ;;  %v2471_v11 = vadd.f32 %v2416_v23, %v2221_v54  ;;  %v2473_v16 = vadd.f32 %v2459_v28, %v2223_v43 }
 0x1e8   : > { %v2498_v33 = vadd.f32 %v3377_v5, %v2470_v19  ;;  %v2500_v39 = vadd.f32 %v3377_v5, %v2472_v20  ;;  %v2418_v38 = vpop.f32.mrf.mxu0  ;;  %v2461_v37 = vpop.f32.mrf.mxu1 }
 0x1e9   : > { %v2781_v9 = vpack.c.bf16 %v2519_v25, %v2518_v10  ;;  %v2782_v12 = vpack.c.bf16 %v2521_v44, %v2520_v15  ;;  %v2499_v13 = vadd.f32 %v3377_v5, %v2471_v11  ;;  %v2501_v17 = vadd.f32 %v3377_v5, %v2473_v16 }
 0x1ea   : > { %v2514_v18 = vmax.f32 %v2498_v33, 0.0  ;;  %v2516_v21 = vmax.f32 %v2500_v39, 0.0  ;;  %v2478_v22 = vadd.f32 %v2418_v38, %v2228_v0  ;;  %v2480_v61 = vadd.f32 %v2461_v37, %v2230_v2  ;;  %v2420_v62 = vpop.f32.mrf.mxu0  ;;  %v2463_v36 = vpop.f32.mrf.mxu1 }
 0x1eb   : > { %2578 = vst [vmem:[%s3396_s15 + $0x20] sm:$0xff] %v2781_v9  ;;  %2579 = vst [vmem:[%s3396_s15 + $0x28] sm:$0xff] %v2782_v12  ;;  %v2515_v8 = vmax.f32 %v2499_v13, 0.0  ;;  %v2517_v47 = vmax.f32 %v2501_v17, 0.0  ;;  %v2479_v26 = vadd.f32 %v2420_v62, %v2229_v29  ;;  %v2481_v48 = vadd.f32 %v2463_v36, %v2231_v32 }
 0x1ec   : > { %v2506_v27 = vadd.f32 %v2492_v57, %v2478_v22  ;;  %v2508_v49 = vadd.f32 %v2492_v57, %v2480_v61 }
 0x1ed   : > { %v2779_v30 = vpack.c.bf16 %v2515_v8, %v2514_v18  ;;  %v2780_v5 = vpack.c.bf16 %v2517_v47, %v2516_v21  ;;  %v2507_v40 = vadd.f32 %v2492_v57, %v2479_v26  ;;  %v2509_v52 = vadd.f32 %v2492_v57, %v2481_v48 }
 0x1ee   : > { %v2522_v41 = vmax.f32 %v2506_v27, 0.0  ;;  %v2524_v53 = vmax.f32 %v2508_v49, 0.0  ;;  %v2604_v56 = vld [vmem:[%s3396_s15] sm:$0xff] (%p2919_p4)  ;;  %v2606_v57 = vld [vmem:[%s3396_s15 + $0x8] sm:$0xff] (%p2919_p4) }
 0x1ef   : > { %2576 = vst [vmem:[%s3396_s15 + $0x10] sm:$0xff] %v2779_v30  ;;  %2577 = vst [vmem:[%s3396_s15 + $0x18] sm:$0xff] %v2780_v5  ;;  %v2523_v42 = vmax.f32 %v2507_v40, 0.0  ;;  %v2525_v54 = vmax.f32 %v2509_v52, 0.0  ;;  %2588 = sbr.rel (!%p2919_p4) target bundleno = 508 (0x1fc), region = 40 }
 0x1f0   : > { %2605 = vst [vmem:[%s2591_s30] sm:$0xff] (%p2919_p4), %v2604_v56  ;;  %2607 = vst [vmem:[%s2591_s30 + $0x8] sm:$0xff] (%p2919_p4), %v2606_v57 }
 0x1f1   : > { %v2783_v43 = vpack.c.bf16 %v2523_v42, %v2522_v41  ;;  %v2784_v55 = vpack.c.bf16 %v2525_v54, %v2524_v53 }
 0x1f2   : > { %v2612_v24 = vld [vmem:[%s3396_s15 + $0x20] sm:$0xff] (%p2919_p4)  ;;  %v2614_v60 = vld [vmem:[%s3396_s15 + $0x28] sm:$0xff] (%p2919_p4) }
 0x1f3   : > { %2580 = vst [vmem:[%s3396_s15 + $0x30] sm:$0xff] %v2783_v43  ;;  %2581 = vst [vmem:[%s3396_s15 + $0x38] sm:$0xff] %v2784_v55 }
 0x1f4   : > { %2613 = vst [vmem:[%s2591_s30 + $0x40] sm:$0xff] %v2612_v24  ;;  %2615 = vst [vmem:[%s2591_s30 + $0x48] sm:$0xff] %v2614_v60 }
 0x1f6   : > { %v2608_v58 = vld [vmem:[%s3396_s15 + $0x10] sm:$0xff]  ;;  %v2610_v59 = vld [vmem:[%s3396_s15 + $0x18] sm:$0xff] }
 0x1f7   : > { %2609 = vst [vmem:[%s2591_s30 + $0x10] sm:$0xff] %v2608_v58  ;;  %2611 = vst [vmem:[%s2591_s30 + $0x18] sm:$0xff] %v2610_v59 }
 0x1fa   : > { %v2616_v63 = vld [vmem:[%s3396_s15 + $0x30] sm:$0xff]  ;;  %v2618_v35 = vld [vmem:[%s3396_s15 + $0x38] sm:$0xff] }
 0x1fb   : > { %2617 = vst [vmem:[%s2591_s30 + $0x50] sm:$0xff] %v2616_v63  ;;  %2619 = vst [vmem:[%s2591_s30 + $0x58] sm:$0xff] %v2618_v35 }
 0x1fc PF: > { %p11_p9 = scmp.ge.s32.totalorder %s2909_s19, 4   ;;  %s3480_s15 = smov %s2852_s16 }
 0x1fd   : > { %s3481_s16 = smov %s2917_s22  ;;  %s3482_s17 = smov %s2909_s19 }
 0x1fe   :  { %13 = sbr.rel (!%p11_p9) target bundleno = 2 (0x2), region = 100 }

// kernel: net_forward.5
= control target key start
LH: loop header
LB: loop body
LE: loop exit
PB: predicated region body
PF: predicated region fallthrough
CT: control target
= control target key end

     0   :  { %s4458_s0 = inlined_call_operand.vmem [shape: bf16[9,16,16], index: 0, kind: input, shape index: {}]   ;;  %s4459_s1 = inlined_call_operand.vmem [shape: f32[16,1], index: 1, kind: input, shape index: {}]   ;;  %s4460_s2 = inlined_call_operand.vmem [shape: bf16[16,2176], index: 2, kind: input, shape index: {}, may-alias: {2,3}]   ;;  %s4461_s3 = inlined_call_operand.vmem [shape: bf16[16,2176], index: 3, kind: input, shape index: {}, may-alias: {2,3}]   ;;  %s4462_s4 = inlined_call_operand.vmem [shape: bf16[16,2048], index: 4, kind: output, shape index: {}]  }
   0x1   :  { %4465 = sst [smem:[#allocation23_spill]] %s4460_s2 }
   0x2   :  { %s3626_s15 = smov 0   ;;  %s3628_s16 = smov 0  }
   0x3   :  { %s3630_s17 = smov 0   ;;  %s3632_s18 = smov 0  }
   0x4   :  { %s3634_s19 = smov 0  }
   0x5 LB: > { %4466 = sst [smem:[#allocation5_spill]] %s3520_s18  ;;  %s4463_s20 = sadd.s32 4294967295, %s3524_s19   ;;  %s3524_s19 = sphi %s3634_s19, %s4520_s19   ;;  %s3520_s18 = sphi %s3632_s18, %s4517_s18   ;;  %s3516_s17 = sphi %s3630_s17, %s4516_s17   ;;  %s3512_s16 = sphi %s3628_s16, %s4519_s16   ;;  %s3508_s15 = sphi %s3626_s15, %s4518_s15  }
   0x6   : > { %s3653_s21 = sadd.s32 1, %s3524_s19   ;;  %s63_s23 = sadd.s32 1, %s3520_s18 }
   0x7   : > { %s60_s22 = ssub.s32 %s3524_s19, %s3653_s21  ;;  %p70_p1 = scmp.ne.s32.totalorder %s3520_s18, %s3516_s17 }
   0x8   : > { %p61_p0 = scmp.eq.s32.totalorder %s60_s22, 0  ;;  %p71_p2 = scmp.eq.s32.totalorder %s3524_s19, 0 }
   0x9   : > { %s3211_s24 = sshll.u32 %s3524_s19, 3  ;;  %s93_s28 = sadd.s32 1, %s3512_s16 }
   0xa   : > { %s3663_s25 = scalar_select %p61_p0, %s3520_s18, %s63_s23  }
   0xb   : > { %p72_p3 = por %p71_p2, %p70_p1  ;;  %s3212_s26 = sadd.s32 8, %s3211_s24 }
   0xc   : > { %4467 = sst [smem:[#allocation6_spill]] %s3663_s25  ;;  %s3214_s27 = sadd.s32 8, %s3212_s26 }
   0xd   : > { %s90_s29 = ssub.s32 %s3212_s26, %s3214_s27  ;;  %p100_p4 = scmp.ne.s32.totalorder %s3512_s16, %s3508_s15 }
   0xe   : > { %p91_p5 = scmp.eq.s32.totalorder %s90_s29, 0  ;;  %p130_p6 = scmp.eq.s32.totalorder %s4463_s20, 1 }
   0xf   : > { %p3673_p7 = por %p100_p4, %p71_p2  ;;  %p3090_p9 = scmp.ge.s32.totalorder %s3524_s19, 2 }
  0x10   : > { %s3678_s5 = scalar_select %p91_p5, %s3512_s16, %s93_s28  }
  0x11   : > { %p3683_p8 = por %p130_p6, %p70_p1  ;;  %158 = sbr.rel (%p3090_p9) target bundleno = 152 (0x98), region = 24 }
  0x16   : > { %161 = sbr.rel (!%p72_p3) target bundleno = 147 (0x93), region = 28  ;;  %s163_s7 = sand.u32 (%p72_p3), 1, %s3520_s18  }
  0x17   : > { %s167_s8 = ssub.s32 (%p72_p3), 17, %s3211_s24  ;;  %s3091_s9 = sshll.u32 (%p72_p3), %s163_s7, 6 }
  0x18   : > { %p168_p10 = scmp.lt.s32.totalorder (%p72_p3), %s167_s8, 8  ;;  %s3215_s10 = sshll.u32 (%p72_p3), %s3524_s19, 5 }
  0x19   : > { %s4470_s2 = sld [smem:[#allocation23_spill]] (%p72_p3)  ;;  %s3697_s23 = scalar_lea.vmem (%p72_p3), [#allocation2], %s3091_s9  }
  0x1b   : > { %s4522_s8 = smov (!%p168_p10, %s167_s8), 8 }
  0x1c   : > { %s3093_s14 = sshll.u32 %s4522_s8, 7  ;;  %s3695_s22 = sshll.u32 %s4522_s8, 2 }
  0x1d   : > { %p3097_p11 = scmp.eq.s32.totalorder %s3093_s14, 0 }
  0x1e   : > { %p178_p12 = scmp.lt.u32.totalorder (!%p3097_p11), %s3695_s22, 8 }
  0x1f   : > { %s3693_s13 = scalar_lea.vmem %s4470_s2, %s3215_s10   ;;  %177 = sbr.rel (%p3097_p11) target bundleno = 147 (0x93), region = 32 }
  0x24   : > { %181 = sbr.rel (%p178_p12) target bundleno = 137 (0x89), region = 36  ;;  %s3701_s24 = sand.u32 (!%p178_p12), 7, %s3695_s22  }
  0x25   : > { %p200_p13 = scmp.eq.s32.totalorder (!%p178_p12), %s3701_s24, 0  ;;  %p3098_p0 = scmp.ne.s32.totalorder (!%p178_p12), %s3701_s24, 0 }
  0x29   : > { %203 = sbr.rel (%p3098_p0) target bundleno = 86 (0x56), region = 51  ;;  %s204_s26 = sshrl.u32 (!%p3098_p0), %s3695_s22, 3 }
  0x2a   : > { %s3708_s27 = sshrl.u32 (!%p3098_p0), %s204_s26, 5 }
  0x2b   : > { %p3099_p1 = scmp.le.s32.totalorder (!%p3098_p0), %s3708_s27, 0 }
  0x2e   : > { %3008 = sbr.rel (%p3099_p1) target bundleno = 70 (0x46), region = 229  ;;  %s4471_s28 = smov (!%p3099_p1), %s3697_s23 }
  0x2f   : > { %s4472_s29 = smov (!%p3099_p1), %s3693_s13  ;;  %s3717_s7 = smov (!%p3099_p1), 0  }
  0x30   : > { %s3719_s8 = smov (!%p3099_p1), 0  }
  0x33 LB: >> { %v217_v0 = vld [vmem:[%s3532_s29] sm:$0xff]  ;;  %v219_v1 = vld [vmem:[%s3532_s29 + $0x8] sm:$0xff]  ;;  %v221_v2 = vld [vmem:[%s3532_s29 + $0x10] sm:$0xff]  ;;  %s345_s9 = sadd.s32 1, %s3536_s7  ;;  %s211_s8 = sadd.s32 1, %s3540_s8   ;;  %s3540_s8 = sphi %s3719_s8, %s211_s8   ;;  %s3536_s7 = sphi %s3717_s7, %s4475_s7   ;;  %s3532_s29 = sphi %s4472_s29, %s4474_s29   ;;  %s3528_s28 = sphi %s4471_s28, %s4473_s28  }
  0x34   : >> { %218 = vst [vmem:[%s3528_s28] sm:$0xff] %v217_v0  ;;  %220 = vst [vmem:[%s3528_s28 + $0x8] sm:$0xff] %v219_v1  ;;  %v223_v3 = vld [vmem:[%s3532_s29 + $0x18] sm:$0xff]  ;;  %v281_v4 = vld [vmem:[%s3532_s29 + $0x44] sm:$0xff]  ;;  %p346_p2 = scmp.ge.s32.totalorder %s345_s9, %s3708_s27  ;;  %p210_p3 = scmp.ge.s32.totalorder %s211_s8, %s3708_s27 }
  0x35   : >> { %222 = vst [vmem:[%s3528_s28 + $0x10] sm:$0xff] %v221_v2  ;;  %v283_v5 = vld [vmem:[%s3532_s29 + $0x4c] sm:$0xff]  ;;  %224 = vst [vmem:[%s3528_s28 + $0x18] sm:$0xff] %v223_v3  ;;  %v285_v6 = vld [vmem:[%s3532_s29 + $0x54] sm:$0xff] }
  0x36   : >> { %282 = vst [vmem:[%s3528_s28 + $0x20] sm:$0xff] %v281_v4  ;;  %284 = vst [vmem:[%s3528_s28 + $0x28] sm:$0xff] %v283_v5  ;;  %v287_v7 = vld [vmem:[%s3532_s29 + $0x5c] sm:$0xff]  ;;  %v289_v8 = vld [vmem:[%s3532_s29 + $0x64] sm:$0xff]  ;;  %s4524_s9 = smov (%p346_p2, %s345_s9), 0 }
  0x37   : >> { %286 = vst [vmem:[%s3528_s28 + $0x30] sm:$0xff] %v285_v6  ;;  %288 = vst [vmem:[%s3528_s28 + $0x38] sm:$0xff] %v287_v7  ;;  %v291_v9 = vld [vmem:[%s3532_s29 + $0x6c] sm:$0xff]  ;;  %v293_v10 = vld [vmem:[%s3532_s29 + $0x74] sm:$0xff]  ;;  %s3100_s10 = sshll.u32 %s4524_s9, 8  ;;  %s4475_s7 = smov %s4524_s9 }
  0x38   : >> { %290 = vst [vmem:[%s3528_s28 + $0x40] sm:$0xff] %v289_v8  ;;  %v295_v11 = vld [vmem:[%s3532_s29 + $0x7c] sm:$0xff]  ;;  %292 = vst [vmem:[%s3528_s28 + $0x48] sm:$0xff] %v291_v9  ;;  %v297_v12 = vld [vmem:[%s3532_s29 + $0x84] sm:$0xff]  ;;  %s350_s11 = scalar_lea.vmem %s3693_s13, %s3100_s10   ;;  %s351_s12 = scalar_lea.vmem %s3697_s23, %s3100_s10 [#allocation2]  }
  0x39   : >> { %294 = vst [vmem:[%s3528_s28 + $0x50] sm:$0xff] %v293_v10  ;;  %296 = vst [vmem:[%s3528_s28 + $0x58] sm:$0xff] %v295_v11  ;;  %v299_v13 = vld [vmem:[%s3532_s29 + $0x8c] sm:$0xff]  ;;  %v301_v14 = vld [vmem:[%s3532_s29 + $0x94] sm:$0xff] }
  0x3a   : >> { %298 = vst [vmem:[%s3528_s28 + $0x60] sm:$0xff] %v297_v12  ;;  %300 = vst [vmem:[%s3528_s28 + $0x68] sm:$0xff] %v299_v13  ;;  %v303_v15 = vld [vmem:[%s3532_s29 + $0x9c] sm:$0xff]  ;;  %v305_v16 = vld [vmem:[%s3532_s29 + $0xa4] sm:$0xff] }
  0x3b   : >> { %302 = vst [vmem:[%s3528_s28 + $0x70] sm:$0xff] %v301_v14  ;;  %v307_v17 = vld [vmem:[%s3532_s29 + $0xac] sm:$0xff]  ;;  %304 = vst [vmem:[%s3528_s28 + $0x78] sm:$0xff] %v303_v15  ;;  %v309_v18 = vld [vmem:[%s3532_s29 + $0xb4] sm:$0xff] }
  0x3c   : >> { %306 = vst [vmem:[%s3528_s28 + $0x80] sm:$0xff] %v305_v16  ;;  %308 = vst [vmem:[%s3528_s28 + $0x88] sm:$0xff] %v307_v17  ;;  %v311_v19 = vld [vmem:[%s3532_s29 + $0xbc] sm:$0xff]  ;;  %v313_v20 = vld [vmem:[%s3532_s29 + $0xc4] sm:$0xff] }
  0x3d   : >> { %310 = vst [vmem:[%s3528_s28 + $0x90] sm:$0xff] %v309_v18  ;;  %312 = vst [vmem:[%s3528_s28 + $0x98] sm:$0xff] %v311_v19  ;;  %v315_v21 = vld [vmem:[%s3532_s29 + $0xcc] sm:$0xff]  ;;  %v317_v22 = vld [vmem:[%s3532_s29 + $0xd4] sm:$0xff] }
  0x3e   : >> { %314 = vst [vmem:[%s3528_s28 + $0xa0] sm:$0xff] %v313_v20  ;;  %v319_v23 = vld [vmem:[%s3532_s29 + $0xdc] sm:$0xff]  ;;  %316 = vst [vmem:[%s3528_s28 + $0xa8] sm:$0xff] %v315_v21  ;;  %v321_v24 = vld [vmem:[%s3532_s29 + $0xe4] sm:$0xff] }
  0x3f   : >> { %318 = vst [vmem:[%s3528_s28 + $0xb0] sm:$0xff] %v317_v22  ;;  %320 = vst [vmem:[%s3528_s28 + $0xb8] sm:$0xff] %v319_v23  ;;  %v323_v25 = vld [vmem:[%s3532_s29 + $0xec] sm:$0xff]  ;;  %v325_v26 = vld [vmem:[%s3532_s29 + $0xf4] sm:$0xff] }
  0x40   : >> { %322 = vst [vmem:[%s3528_s28 + $0xc0] sm:$0xff] %v321_v24  ;;  %324 = vst [vmem:[%s3528_s28 + $0xc8] sm:$0xff] %v323_v25  ;;  %v327_v27 = vld [vmem:[%s3532_s29 + $0xfc] sm:$0xff]  ;;  %v329_v28 = vld [vmem:[%s3532_s29 + $0x104] sm:$0xff] }
  0x41   : >> { %326 = vst [vmem:[%s3528_s28 + $0xd0] sm:$0xff] %v325_v26  ;;  %v331_v29 = vld [vmem:[%s3532_s29 + $0x10c] sm:$0xff]  ;;  %328 = vst [vmem:[%s3528_s28 + $0xd8] sm:$0xff] %v327_v27  ;;  %v333_v30 = vld [vmem:[%s3532_s29 + $0x114] sm:$0xff]  ;;  %213 = sbr.rel (!%p210_p3) target bundleno = 51 (0x33), region = 235 }
  0x42   : >> { %330 = vst [vmem:[%s3528_s28 + $0xe0] sm:$0xff] %v329_v28  ;;  %332 = vst [vmem:[%s3528_s28 + $0xe8] sm:$0xff] %v331_v29  ;;  %v335_v31 = vld [vmem:[%s3532_s29 + $0x11c] sm:$0xff]  ;;  %v337_v32 = vld [vmem:[%s3532_s29 + $0x124] sm:$0xff] }
  0x43   : >> { %334 = vst [vmem:[%s3528_s28 + $0xf0] sm:$0xff] %v333_v30  ;;  %336 = vst [vmem:[%s3528_s28 + $0xf8] sm:$0xff] %v335_v31  ;;  %v339_v33 = vld [vmem:[%s3532_s29 + $0x12c] sm:$0xff]  ;;  %v341_v34 = vld [vmem:[%s3532_s29 + $0x134] sm:$0xff] }
  0x44   : >> { %338 = vst [vmem:[%s3528_s28 + $0x100] sm:$0xff] %v337_v32  ;;  %v343_v35 = vld [vmem:[%s3532_s29 + $0x13c] sm:$0xff]  ;;  %340 = vst [vmem:[%s3528_s28 + $0x108] sm:$0xff] %v339_v33  ;;  %s4474_s29 = smov %s350_s11 }
  0x45   : >> { %342 = vst [vmem:[%s3528_s28 + $0x110] sm:$0xff] %v341_v34  ;;  %344 = vst [vmem:[%s3528_s28 + $0x118] sm:$0xff] %v343_v35  ;;  %s4473_s28 = smov %s351_s12 }
  0x46 PF: > { %s3825_s14 = sand.u32 31, %s204_s26   ;;  %s3216_s10 = sshll.u32 %s3708_s27, 12 }
  0x47   : > { %s356_s20 = sshra.s32 %s3216_s10, 4  ;;  %p3105_p4 = scmp.le.s32.totalorder %s3825_s14, 0 }
  0x48   : > { %s3829_s2 = scalar_lea.vmem %s3693_s13, %s356_s20   ;;  %s360_s12 = scalar_lea.vmem %s3697_s23, %s356_s20 [#allocation2]  }
  0x49   : > { %3022 = sbr.rel (%p3105_p4) target bundleno = 86 (0x56), region = 240  ;;  %s3542_s9 = smov (!%p3105_p4), %s360_s12  }
  0x4a   : > { %s3546_s8 = smov (!%p3105_p4), %s3829_s2   ;;  %s3550_s11 = smov (!%p3105_p4), 0  }
  0x4b   : > { %s3554_s28 = smov (!%p3105_p4), 0  }
  0x4e LB: >> { %v372_v36 = vld [vmem:[%s3548_s8] sm:$0xff]  ;;  %s376_s26 = sadd.s32 1, %s3552_s11  ;;  %s366_s28 = sadd.s32 1, %s3556_s28   ;;  %s3556_s28 = sphi %s3554_s28, %s366_s28   ;;  %s3552_s11 = sphi %s3550_s11, %s3551_s11   ;;  %s3548_s8 = sphi %s3546_s8, %s381_s8   ;;  %s3544_s9 = sphi %s3542_s9, %s382_s9  }
  0x4f   : >> { %v374_v37 = vld [vmem:[%s3548_s8 + $0x44] sm:$0xff]  ;;  %373 = vst [vmem:[%s3544_s9] sm:$0xff] %v372_v36  ;;  %p377_p5 = scmp.ge.s32.totalorder %s376_s26, %s3825_s14  ;;  %p365_p6 = scmp.ge.s32.totalorder %s366_s28, %s3825_s14 }
  0x50   : >> { %375 = vst [vmem:[%s3544_s9 + $0x20] sm:$0xff] %v374_v37 }
  0x51   : >> { %s4526_s26 = smov (%p377_p5, %s376_s26), 0  ;;  %368 = sbr.rel (!%p365_p6) target bundleno = 78 (0x4e), region = 246 }
  0x52   : >> { %s3106_s20 = sshll.u32 %s4526_s26, 3  ;;  %s3551_s11 = smov %s4526_s26  }
  0x53   : >> { %s381_s8 = scalar_lea.vmem %s3829_s2, %s3106_s20   ;;  %s382_s9 = scalar_lea.vmem %s360_s12, %s3106_s20 [#allocation2]  }
  0x56 PF: > { %385 = sbr.rel (%p200_p13) target bundleno = 137 (0x89), region = 69  ;;  %s387_s27 = ssub.s32 (!%p200_p13), %s3695_s22, %s3701_s24 }
  0x57   : > { %s391_s29 = sshrl.u32 (!%p200_p13), %s3695_s22, 3  ;;  %s3843_s7 = scalar_lea.vmem (!%p200_p13), %s3693_s13, %s387_s27 }
  0x58   : > { %s3846_s10 = scalar_lea.vmem (!%p200_p13), %s3697_s23, %s387_s27 [#allocation2]  ;;  %s3850_s9 = sshrl.u32 (!%p200_p13), %s391_s29, 5 }
  0x59   : > { %p3108_p9 = scmp.le.s32.totalorder (!%p200_p13), %s3850_s9, 0 }
  0x5b   : > { %3036 = sbr.rel (%p3108_p9) target bundleno = 115 (0x73), region = 251  ;;  %s4476_s2 = smov (!%p3108_p9), %s3697_s23 }
  0x5c   : > { %s4477_s14 = smov (!%p3108_p9), %s3693_s13  ;;  %s3859_s12 = smov (!%p3108_p9), 0  }
  0x5d   : > { %s3861_s8 = smov (!%p3108_p9), 0  }
  0x60 LB: >> { %v404_v38 = vld [vmem:[%s3564_s14] sm:$0xff]  ;;  %v406_v39 = vld [vmem:[%s3564_s14 + $0x8] sm:$0xff]  ;;  %v408_v40 = vld [vmem:[%s3564_s14 + $0x10] sm:$0xff]  ;;  %s532_s11 = sadd.s32 1, %s3568_s12  ;;  %s398_s8 = sadd.s32 1, %s3572_s8   ;;  %s3572_s8 = sphi %s3861_s8, %s398_s8   ;;  %s3568_s12 = sphi %s3859_s12, %s4480_s12   ;;  %s3564_s14 = sphi %s4477_s14, %s4479_s14   ;;  %s3560_s2 = sphi %s4476_s2, %s4478_s2  }
  0x61   : >> { %405 = vst [vmem:[%s3560_s2] sm:$0xff] %v404_v38  ;;  %407 = vst [vmem:[%s3560_s2 + $0x8] sm:$0xff] %v406_v39  ;;  %v410_v41 = vld [vmem:[%s3564_s14 + $0x18] sm:$0xff]  ;;  %v468_v42 = vld [vmem:[%s3564_s14 + $0x44] sm:$0xff]  ;;  %p533_p10 = scmp.ge.s32.totalorder %s532_s11, %s3850_s9  ;;  %p397_p11 = scmp.ge.s32.totalorder %s398_s8, %s3850_s9 }
  0x62   : >> { %409 = vst [vmem:[%s3560_s2 + $0x10] sm:$0xff] %v408_v40  ;;  %v470_v43 = vld [vmem:[%s3564_s14 + $0x4c] sm:$0xff]  ;;  %411 = vst [vmem:[%s3560_s2 + $0x18] sm:$0xff] %v410_v41  ;;  %v472_v44 = vld [vmem:[%s3564_s14 + $0x54] sm:$0xff] }
  0x63   : >> { %469 = vst [vmem:[%s3560_s2 + $0x20] sm:$0xff] %v468_v42  ;;  %471 = vst [vmem:[%s3560_s2 + $0x28] sm:$0xff] %v470_v43  ;;  %v474_v45 = vld [vmem:[%s3564_s14 + $0x5c] sm:$0xff]  ;;  %v476_v46 = vld [vmem:[%s3564_s14 + $0x64] sm:$0xff]  ;;  %s4528_s11 = smov (%p533_p10, %s532_s11), 0 }
  0x64   : >> { %473 = vst [vmem:[%s3560_s2 + $0x30] sm:$0xff] %v472_v44  ;;  %475 = vst [vmem:[%s3560_s2 + $0x38] sm:$0xff] %v474_v45  ;;  %v478_v47 = vld [vmem:[%s3564_s14 + $0x6c] sm:$0xff]  ;;  %v480_v48 = vld [vmem:[%s3564_s14 + $0x74] sm:$0xff]  ;;  %s3109_s28 = sshll.u32 %s4528_s11, 8  ;;  %s4480_s12 = smov %s4528_s11 }
  0x65   : >> { %477 = vst [vmem:[%s3560_s2 + $0x40] sm:$0xff] %v476_v46  ;;  %v482_v49 = vld [vmem:[%s3564_s14 + $0x7c] sm:$0xff]  ;;  %479 = vst [vmem:[%s3560_s2 + $0x48] sm:$0xff] %v478_v47  ;;  %v484_v50 = vld [vmem:[%s3564_s14 + $0x84] sm:$0xff]  ;;  %s537_s26 = scalar_lea.vmem %s3693_s13, %s3109_s28   ;;  %s538_s20 = scalar_lea.vmem %s3697_s23, %s3109_s28 [#allocation2]  }
  0x66   : >> { %481 = vst [vmem:[%s3560_s2 + $0x50] sm:$0xff] %v480_v48  ;;  %483 = vst [vmem:[%s3560_s2 + $0x58] sm:$0xff] %v482_v49  ;;  %v486_v51 = vld [vmem:[%s3564_s14 + $0x8c] sm:$0xff]  ;;  %v488_v52 = vld [vmem:[%s3564_s14 + $0x94] sm:$0xff] }
  0x67   : >> { %485 = vst [vmem:[%s3560_s2 + $0x60] sm:$0xff] %v484_v50  ;;  %487 = vst [vmem:[%s3560_s2 + $0x68] sm:$0xff] %v486_v51  ;;  %v490_v53 = vld [vmem:[%s3564_s14 + $0x9c] sm:$0xff]  ;;  %v492_v54 = vld [vmem:[%s3564_s14 + $0xa4] sm:$0xff] }
  0x68   : >> { %489 = vst [vmem:[%s3560_s2 + $0x70] sm:$0xff] %v488_v52  ;;  %v494_v55 = vld [vmem:[%s3564_s14 + $0xac] sm:$0xff]  ;;  %491 = vst [vmem:[%s3560_s2 + $0x78] sm:$0xff] %v490_v53  ;;  %v496_v56 = vld [vmem:[%s3564_s14 + $0xb4] sm:$0xff] }
  0x69   : >> { %493 = vst [vmem:[%s3560_s2 + $0x80] sm:$0xff] %v492_v54  ;;  %495 = vst [vmem:[%s3560_s2 + $0x88] sm:$0xff] %v494_v55  ;;  %v498_v57 = vld [vmem:[%s3564_s14 + $0xbc] sm:$0xff]  ;;  %v500_v58 = vld [vmem:[%s3564_s14 + $0xc4] sm:$0xff] }
  0x6a   : >> { %497 = vst [vmem:[%s3560_s2 + $0x90] sm:$0xff] %v496_v56  ;;  %499 = vst [vmem:[%s3560_s2 + $0x98] sm:$0xff] %v498_v57  ;;  %v502_v59 = vld [vmem:[%s3564_s14 + $0xcc] sm:$0xff]  ;;  %v504_v60 = vld [vmem:[%s3564_s14 + $0xd4] sm:$0xff] }
  0x6b   : >> { %501 = vst [vmem:[%s3560_s2 + $0xa0] sm:$0xff] %v500_v58  ;;  %v506_v61 = vld [vmem:[%s3564_s14 + $0xdc] sm:$0xff]  ;;  %503 = vst [vmem:[%s3560_s2 + $0xa8] sm:$0xff] %v502_v59  ;;  %v508_v62 = vld [vmem:[%s3564_s14 + $0xe4] sm:$0xff] }
  0x6c   : >> { %505 = vst [vmem:[%s3560_s2 + $0xb0] sm:$0xff] %v504_v60  ;;  %507 = vst [vmem:[%s3560_s2 + $0xb8] sm:$0xff] %v506_v61  ;;  %v510_v63 = vld [vmem:[%s3564_s14 + $0xec] sm:$0xff]  ;;  %v512_v0 = vld [vmem:[%s3564_s14 + $0xf4] sm:$0xff] }
  0x6d   : >> { %509 = vst [vmem:[%s3560_s2 + $0xc0] sm:$0xff] %v508_v62  ;;  %511 = vst [vmem:[%s3560_s2 + $0xc8] sm:$0xff] %v510_v63  ;;  %v514_v1 = vld [vmem:[%s3564_s14 + $0xfc] sm:$0xff]  ;;  %v516_v2 = vld [vmem:[%s3564_s14 + $0x104] sm:$0xff] }
  0x6e   : >> { %513 = vst [vmem:[%s3560_s2 + $0xd0] sm:$0xff] %v512_v0  ;;  %v518_v3 = vld [vmem:[%s3564_s14 + $0x10c] sm:$0xff]  ;;  %515 = vst [vmem:[%s3560_s2 + $0xd8] sm:$0xff] %v514_v1  ;;  %v520_v4 = vld [vmem:[%s3564_s14 + $0x114] sm:$0xff]  ;;  %400 = sbr.rel (!%p397_p11) target bundleno = 96 (0x60), region = 257 }
  0x6f   : >> { %517 = vst [vmem:[%s3560_s2 + $0xe0] sm:$0xff] %v516_v2  ;;  %519 = vst [vmem:[%s3560_s2 + $0xe8] sm:$0xff] %v518_v3  ;;  %v522_v5 = vld [vmem:[%s3564_s14 + $0x11c] sm:$0xff]  ;;  %v524_v6 = vld [vmem:[%s3564_s14 + $0x124] sm:$0xff] }
  0x70   : >> { %521 = vst [vmem:[%s3560_s2 + $0xf0] sm:$0xff] %v520_v4  ;;  %523 = vst [vmem:[%s3560_s2 + $0xf8] sm:$0xff] %v522_v5  ;;  %v526_v7 = vld [vmem:[%s3564_s14 + $0x12c] sm:$0xff]  ;;  %v528_v8 = vld [vmem:[%s3564_s14 + $0x134] sm:$0xff] }
  0x71   : >> { %525 = vst [vmem:[%s3560_s2 + $0x100] sm:$0xff] %v524_v6  ;;  %v530_v9 = vld [vmem:[%s3564_s14 + $0x13c] sm:$0xff]  ;;  %527 = vst [vmem:[%s3560_s2 + $0x108] sm:$0xff] %v526_v7  ;;  %s4479_s14 = smov %s537_s26 }
  0x72   : >> { %529 = vst [vmem:[%s3560_s2 + $0x110] sm:$0xff] %v528_v8  ;;  %531 = vst [vmem:[%s3560_s2 + $0x118] sm:$0xff] %v530_v9  ;;  %s4478_s2 = smov %s538_s20 }
  0x73 PF: > { %s3967_s27 = sand.u32 31, %s391_s29   ;;  %s3218_s28 = sshll.u32 %s3850_s9, 12 }
  0x74   : > { %s543_s25 = sshra.s32 %s3218_s28, 4  ;;  %p3114_p12 = scmp.le.s32.totalorder %s3967_s27, 0 }
  0x75   : > { %s3971_s18 = scalar_lea.vmem %s3693_s13, %s543_s25   ;;  %s547_s20 = scalar_lea.vmem %s3697_s23, %s543_s25 [#allocation2]  }
  0x76   : > { %3050 = sbr.rel (%p3114_p12) target bundleno = 131 (0x83), region = 262  ;;  %s3574_s11 = smov (!%p3114_p12), %s547_s20  }
  0x77   : > { %s3578_s8 = smov (!%p3114_p12), %s3971_s18   ;;  %s3582_s26 = smov (!%p3114_p12), 0  }
  0x78   : > { %s3586_s2 = smov (!%p3114_p12), 0  }
  0x7b LB: >> { %v559_v10 = vld [vmem:[%s3580_s8] sm:$0xff]  ;;  %s563_s29 = sadd.s32 1, %s3584_s26  ;;  %s553_s2 = sadd.s32 1, %s3588_s2   ;;  %s3588_s2 = sphi %s3586_s2, %s553_s2   ;;  %s3584_s26 = sphi %s3582_s26, %s3583_s26   ;;  %s3580_s8 = sphi %s3578_s8, %s568_s8   ;;  %s3576_s11 = sphi %s3574_s11, %s569_s11  }
  0x7c   : >> { %v561_v11 = vld [vmem:[%s3580_s8 + $0x44] sm:$0xff]  ;;  %560 = vst [vmem:[%s3576_s11] sm:$0xff] %v559_v10  ;;  %p564_p13 = scmp.ge.s32.totalorder %s563_s29, %s3967_s27  ;;  %p552_p0 = scmp.ge.s32.totalorder %s553_s2, %s3967_s27 }
  0x7d   : >> { %562 = vst [vmem:[%s3576_s11 + $0x20] sm:$0xff] %v561_v11 }
  0x7e   : >> { %s4530_s29 = smov (%p564_p13, %s563_s29), 0  ;;  %555 = sbr.rel (!%p552_p0) target bundleno = 123 (0x7b), region = 268 }
  0x7f   : >> { %s3115_s25 = sshll.u32 %s4530_s29, 3  ;;  %s3583_s26 = smov %s4530_s29  }
  0x80   : >> { %s568_s8 = scalar_lea.vmem %s3971_s18, %s3115_s25   ;;  %s569_s11 = scalar_lea.vmem %s547_s20, %s3115_s25 [#allocation2]  }
  0x83 PF: > { %s3590_s9 = smov 1  }
  0x84   : > { %s570_s14 = sshll.u32 %s3590_s9, %s3701_s24 }
  0x85   : > { %s3117_s12 = sadd.s32 4294967295, %s570_s14 }
  0x86   : > { %v580_v12 = vld [vmem:[%s3843_s7] sm:%s3117_s12] }
  0x87   : > { %v582_v13 = vld [vmem:[%s3843_s7 + $0x44] sm:%s3117_s12]  ;;  %581 = vst [vmem:[%s3846_s10] sm:%s3117_s12] %v580_v12 }
  0x88   : > { %583 = vst [vmem:[%s3846_s10 + $0x20] sm:%s3117_s12] %v582_v13 }
  0x89 PF: > { %p3118_p1 = scmp.ge.u32.totalorder %s3695_s22, 8 }
  0x8a   : > { %s3591_s28 = smov (!%p3118_p1), 1  }
  0x8b   : > { %184 = sbr.rel (%p3118_p1) target bundleno = 147 (0x93), region = 40  ;;  %s185_s18 = sshll.u32 (!%p3118_p1), %s3591_s28, %s3695_s22 }
  0x8c   : > { %s3119_s27 = sadd.s32 (!%p3118_p1), 4294967295, %s185_s18 }
  0x90   : > { %v195_v14 = vld [vmem:[%s3693_s13] sm:%s3119_s27] }
  0x91   : > { %v197_v15 = vld [vmem:[%s3693_s13 + $0x44] sm:%s3119_s27]  ;;  %196 = vst [vmem:[%s3697_s23] sm:%s3119_s27] %v195_v14 }
  0x92   : > { %198 = vst [vmem:[%s3697_s23 + $0x20] sm:%s3119_s27] %v197_v15 }
  0x93 PF: > { %587 = sbr.rel (!%p3673_p7) target bundleno = 152 (0x98), region = 94  ;;  %s589_s24 = sand.u32 (%p3673_p7), 1, %s3512_s16  }
  0x94   : > { %s3121_s7 = sshll.u32 (%p3673_p7), %s3524_s19, 5  ;;  %s3120_s10 = sshll.u32 (%p3673_p7), %s589_s24, 3 }
  0x95   : > { %s2969_s22 = scalar_lea.vmem (%p3673_p7), %s4461_s3, %s3121_s7  ;;  %s591_s13 = scalar_lea.vmem (%p3673_p7), [#allocation3], %s3120_s10 }
  0x96   : > { %v3122_v16 = vld [vmem:[%s2969_s22 + $0x20] sm:$0xf] (%p3673_p7)  ;;  %v3123_v17 = vld [vmem:[%s2969_s22 + $0x64] sm:$0xf] (%p3673_p7) }
  0x97   : > { %613 = vst [vmem:[%s591_s13] sm:$0xf] (%p3673_p7), %v3122_v16  ;;  %615 = vst [vmem:[%s591_s13 + $0x4] sm:$0xf] (%p3673_p7), %v3123_v17 }
  0x98 PF: > { %p3124_p2 = scmp.ge.s32.totalorder %s3524_s19, 1  ;;  %p642_p7 = scmp.lt.s32.totalorder %s3524_s19, 3 }
  0x9a   : > { %p643_p3 = pnand %p3124_p2, %p642_p7 }
  0x9c   : > { %646 = sbr.rel (%p643_p3) target bundleno = 648 (0x288), region = 135 }
  0xa1   : > { %s649_s30 = sand.u32 1, %s3516_s17   ;;  %s656_s8 = sand.u32 1, %s3508_s15   ;;  %v3592_v18 = vmov 0   ;;  %vm776_vm0 = vcmask 1039360   ;;  %v3413_v44 = vld [vmem:[%s4458_s0 + $0x8] sm:$0xff]   ;;  %vm793_vm1 = vcmask 130048  }
  0xa2   : > { %s4000_s23 = sshll.u32 %s649_s30, 6  ;;  %829 = vmatprep.mubr.bf16.mxu0 %v3592_v18  ;;  %872 = vmatprep.mubr.bf16.mxu1 %v3592_v18  ;;  %s3126_s2 = sshll.u32 %s656_s8, 3  ;;  %v3414_v59 = vld [vmem:[%s4458_s0] sm:$0xff]   ;;  %vm1175_vm2 = vcmask 1031168   ;;  %v3415_v10 = vld [vmem:[%s4458_s0 + $0x10] sm:$0xff]   ;;  %vm1409_vm3 = vcmask 801792  }
  0xa3   : > { %s651_s26 = scalar_lea.vmem [#allocation2], %s4000_s23  ;;  %3410 = vset.pattern.permute.xlu0 %v3592_v18  ;;  %3411 = vset.pattern.permute.xlu1 %v3592_v18  ;;  %s658_s15 = scalar_lea.vmem [#allocation3], %s3126_s2  ;;  %vm1643_vm4 = vcmask 793600   ;;  %vm1877_vm5 = vcmask 785408   ;;  %vm2111_vm6 = vcmask 556032   ;;  %vm2345_vm7 = vcmask 547840  }
  0xa4   : > { %v694_v19 = vld [vmem:[%s651_s26 + $0x8] sm:$0xff]  ;;  %v693_v21 = vld [vmem:[%s651_s26] sm:$0xff]  ;;  %v695_v24 = vld [vmem:[%s651_s26 + $0x10] sm:$0xff]  ;;  %s3593_s17 = smov 127   ;;  %s3594_s29 = smov 126   ;;  %vm2579_vm8 = vcmask 539648  }
  0xa5   : > { %v698_v20 = vld [vmem:[%s651_s26 + $0x28] sm:$0xff]  ;;  %v697_v23 = vld [vmem:[%s651_s26 + $0x20] sm:$0xff]  ;;  %v699_v25 = vld [vmem:[%s651_s26 + $0x30] sm:$0xff]  ;;  %s3595_s25 = smov 98   ;;  %s3596_s9 = smov 97  }
  0xa6   : > { %v4008_v22 = vcombine.high %v694_v19, %v698_v20  ;;  %v4010_v26 = vcombine.high %v693_v21, %v697_v23  ;;  %v4013_v27 = vcombine.low %v695_v24, %v699_v25  ;;  %v4016_v28 = vcombine.low %v694_v19, %v698_v20  ;;  %v696_v29 = vld [vmem:[%s651_s26 + $0x18] sm:$0xff]  ;;  %v4032_v35 = vld [vmem:[%s658_s15] sm:$0xff]   ;;  %s3597_s14 = smov 96   ;;  %s3598_s12 = smov 68  }
  0xa7   : > { %v700_v30 = vld [vmem:[%s651_s26 + $0x38] sm:$0xff]  ;;  %v4019_v31 = vcombine.high %v695_v24, %v699_v25  ;;  %v4022_v32 = vcombine.low %v693_v21, %v697_v23  ;;  %s3599_s28 = smov 67   ;;  %s3600_s24 = smov 66  }
  0xa8   : > { %764 = vrot.lane.b32.xlu1 %v4008_v22, %s3593_s17  ;;  %760 = vrot.lane.b32.xlu0 %v4010_v26, %s3593_s17  ;;  %v4025_v33 = vcombine.high %v696_v29, %v700_v30  ;;  %v4028_v34 = vcombine.low %v696_v29, %v700_v30 }
  0xac   : > { %766 = vrot.lane.b32.xlu1 %v4013_v27, %s3593_s17  ;;  %762 = vrot.lane.b32.xlu0 %v4016_v28, %s3593_s17 }
  0xb0   : > { %768 = vrot.lane.b32.xlu1 %v4019_v31, %s3593_s17  ;;  %758 = vrot.lane.b32.xlu0 %v4022_v32, %s3593_s17 }
  0xb4   : > { %772 = vrot.lane.b32.xlu1 %v4025_v33, %s3593_s17  ;;  %770 = vrot.lane.b32.xlu0 %v4028_v34, %s3593_s17 }
  0xb8   : > { %1159 = vrot.lane.b32.xlu1 %v4010_v26, %s3594_s29  ;;  %774 = vrot.lane.b32.xlu0 %v4032_v35, %s3593_s17 }
  0xbc   : > { %1163 = vrot.lane.b32.xlu1 %v4008_v22, %s3594_s29  ;;  %1161 = vrot.lane.b32.xlu0 %v4016_v28, %s3594_s29 }
  0xc0   : > { %1157 = vrot.lane.b32.xlu1 %v4022_v32, %s3594_s29  ;;  %1165 = vrot.lane.b32.xlu0 %v4013_v27, %s3594_s29 }
  0xc4   : > { %1169 = vrot.lane.b32.xlu1 %v4028_v34, %s3594_s29  ;;  %1167 = vrot.lane.b32.xlu0 %v4019_v31, %s3594_s29 }
  0xc8   : > { %1173 = vrot.lane.b32.xlu1 %v4032_v35, %s3594_s29  ;;  %1171 = vrot.lane.b32.xlu0 %v4025_v33, %s3594_s29 }
  0xcc   : > { %1395 = vrot.lane.b32.xlu1 %v4016_v28, %s3595_s25  ;;  %1393 = vrot.lane.b32.xlu0 %v4010_v26, %s3595_s25 }
  0xd0   : > { %1399 = vrot.lane.b32.xlu1 %v4013_v27, %s3595_s25  ;;  %1397 = vrot.lane.b32.xlu0 %v4008_v22, %s3595_s25 }
  0xd4   : > { %1401 = vrot.lane.b32.xlu1 %v4019_v31, %s3595_s25  ;;  %1391 = vrot.lane.b32.xlu0 %v4022_v32, %s3595_s25 }
  0xd8   : > { %1405 = vrot.lane.b32.xlu1 %v4025_v33, %s3595_s25  ;;  %1403 = vrot.lane.b32.xlu0 %v4028_v34, %s3595_s25 }
  0xdc   : > { %1627 = vrot.lane.b32.xlu1 %v4010_v26, %s3596_s9  ;;  %1407 = vrot.lane.b32.xlu0 %v4032_v35, %s3595_s25 }
  0xe0   : > { %1631 = vrot.lane.b32.xlu1 %v4008_v22, %s3596_s9  ;;  %1629 = vrot.lane.b32.xlu0 %v4016_v28, %s3596_s9 }
  0xe4   : > { %1625 = vrot.lane.b32.xlu1 %v4022_v32, %s3596_s9  ;;  %1633 = vrot.lane.b32.xlu0 %v4013_v27, %s3596_s9 }
  0xe8   : > { %1637 = vrot.lane.b32.xlu1 %v4028_v34, %s3596_s9  ;;  %1635 = vrot.lane.b32.xlu0 %v4019_v31, %s3596_s9 }
  0xec   : > { %1641 = vrot.lane.b32.xlu1 %v4032_v35, %s3596_s9  ;;  %1639 = vrot.lane.b32.xlu0 %v4025_v33, %s3596_s9 }
  0xf0   : > { %1863 = vrot.lane.b32.xlu1 %v4016_v28, %s3597_s14  ;;  %1861 = vrot.lane.b32.xlu0 %v4010_v26, %s3597_s14 }
  0xf4   : > { %1867 = vrot.lane.b32.xlu1 %v4013_v27, %s3597_s14  ;;  %1865 = vrot.lane.b32.xlu0 %v4008_v22, %s3597_s14 }
  0xf8   : > { %1869 = vrot.lane.b32.xlu1 %v4019_v31, %s3597_s14  ;;  %1859 = vrot.lane.b32.xlu0 %v4022_v32, %s3597_s14 }
  0xfc   : > { %1873 = vrot.lane.b32.xlu1 %v4025_v33, %s3597_s14  ;;  %1871 = vrot.lane.b32.xlu0 %v4028_v34, %s3597_s14 }
 0x100   : > { %2095 = vrot.lane.b32.xlu1 %v4010_v26, %s3598_s12  ;;  %1875 = vrot.lane.b32.xlu0 %v4032_v35, %s3597_s14 }
 0x104   : > { %2099 = vrot.lane.b32.xlu1 %v4008_v22, %s3598_s12  ;;  %2097 = vrot.lane.b32.xlu0 %v4016_v28, %s3598_s12 }
 0x108   : > { %2093 = vrot.lane.b32.xlu1 %v4022_v32, %s3598_s12  ;;  %2101 = vrot.lane.b32.xlu0 %v4013_v27, %s3598_s12 }
 0x10c   : > { %2105 = vrot.lane.b32.xlu1 %v4028_v34, %s3598_s12  ;;  %2103 = vrot.lane.b32.xlu0 %v4019_v31, %s3598_s12 }
 0x110   : > { %2109 = vrot.lane.b32.xlu1 %v4032_v35, %s3598_s12  ;;  %2107 = vrot.lane.b32.xlu0 %v4025_v33, %s3598_s12 }
 0x114   : > { %2331 = vrot.lane.b32.xlu1 %v4016_v28, %s3599_s28  ;;  %2329 = vrot.lane.b32.xlu0 %v4010_v26, %s3599_s28 }
 0x118   : > { %2335 = vrot.lane.b32.xlu1 %v4013_v27, %s3599_s28  ;;  %2333 = vrot.lane.b32.xlu0 %v4008_v22, %s3599_s28 }
 0x11a   : > { %v765_v36 = vpop.permute.xlu1 %764  ;;  %v761_v37 = vpop.permute.xlu0 %760 }
 0x11c   : > { %2337 = vrot.lane.b32.xlu1 %v4019_v31, %s3599_s28  ;;  %2327 = vrot.lane.b32.xlu0 %v4022_v32, %s3599_s28 }
 0x11e   : > { %v767_v38 = vpop.permute.xlu1 %766  ;;  %v763_v39 = vpop.permute.xlu0 %762 }
 0x11f   : > { %v780_v40 = vsel %vm776_vm0, %v765_v36, %v767_v38  ;;  %v778_v41 = vsel %vm776_vm0, %v761_v37, %v763_v39  ;;  %v779_v42 = vsel %vm776_vm0, %v763_v39, %v765_v36 }
 0x120   : > { %854 = vmatprep.subr.bf16.mxu1 %v780_v40  ;;  %2341 = vrot.lane.b32.xlu1 %v4025_v33, %s3599_s28 }
 0x121   : > { %811 = vmatprep.subr.bf16.mxu0 %v778_v41  ;;  %2339 = vrot.lane.b32.xlu0 %v4028_v34, %s3599_s28 }
 0x122   : > { %855 = vmatpush1.bf16.msra.mxu1 %v779_v42  ;;  %v769_v43 = vpop.permute.xlu1 %768  ;;  %v759_v45 = vpop.permute.xlu0 %758 }
 0x123   : > { %v777_v46 = vsel %vm776_vm0, %v759_v45, %v761_v37  ;;  %v781_v50 = vsel %vm776_vm0, %v767_v38, %v769_v43  ;;  %v3417_v45 = vld [vmem:[%s4458_s0 + $0x20] sm:$0xff]  }
 0x124   : > { %2563 = vrot.lane.b32.xlu1 %v4010_v26, %s3600_s24  ;;  %812 = vmatpush1.bf16.msra.mxu0 %v777_v46 }
 0x125   : > { %2343 = vrot.lane.b32.xlu0 %v4032_v35, %s3599_s28  ;;  %3141 = vmatmul.mubr.msk.bf16.vlgmr.msra.gmra.mxu1 %vm793_vm1, %v3413_v44 }
 0x126   : > { %v773_v47 = vpop.permute.xlu1 %772  ;;  %v771_v48 = vpop.permute.xlu0 %770  ;;  %958 = vmatprep.mubr.bf16.mxu1 %v3592_v18 }
 0x127   : > { %3140 = vmatmul.mubr.msk.bf16.vlgmr.msra.gmra.mxu0 %vm793_vm1, %v3413_v44  ;;  %v782_v49 = vsel %vm776_vm0, %v769_v43, %v771_v48  ;;  %v783_v54 = vsel %vm776_vm0, %v771_v48, %v773_v47 }
 0x128   : > { %2567 = vrot.lane.b32.xlu1 %v4008_v22, %s3600_s24  ;;  %897 = vmatprep.subr.bf16.mxu0 %v782_v49 }
 0x129   : > { %2565 = vrot.lane.b32.xlu0 %v4016_v28, %s3600_s24  ;;  %898 = vmatpush1.bf16.msra.mxu0 %v781_v50 }
 0x12a   : > { %v1160_v51 = vpop.permute.xlu1 %1159  ;;  %915 = vmatprep.mubr.bf16.mxu0 %v3592_v18  ;;  %v775_v52 = vpop.permute.xlu0 %774  ;;  %991 = vmatprep.subr.bf16.mxu0 %v4010_v26 }
 0x12b   : > { %v784_v53 = vsel %vm776_vm0, %v773_v47, %v775_v52 }
 0x12c   : > { %2561 = vrot.lane.b32.xlu1 %v4022_v32, %s3600_s24  ;;  %940 = vmatprep.subr.bf16.mxu1 %v784_v53 }
 0x12d   : > { %2569 = vrot.lane.b32.xlu0 %v4013_v27, %s3600_s24  ;;  %941 = vmatpush1.bf16.msra.mxu1 %v783_v54 }
 0x12e   : > { %v1164_v55 = vpop.permute.xlu1 %1163  ;;  %v1162_v56 = vpop.permute.xlu0 %1161  ;;  %1034 = vmatprep.subr.bf16.mxu1 %v4008_v22 }
 0x12f   : > { %3142 = vmatmul.mubr.msk.bf16.vlgmr.msra.gmra.mxu0 %vm793_vm1, %v3413_v44  ;;  %v1177_v62 = vsel %vm1175_vm2, %v1160_v51, %v1162_v56  ;;  %v1178_v6 = vsel %vm1175_vm2, %v1162_v56, %v1164_v55 }
 0x130   : > { %2573 = vrot.lane.b32.xlu1 %v4028_v34, %s3600_s24  ;;  %3143 = vmatmul.mubr.msk.bf16.vlgmr.msra.gmra.mxu1 %vm793_vm1, %v3413_v44 }
 0x131   : > { %2571 = vrot.lane.b32.xlu0 %v4019_v31, %s3600_s24  ;;  %992 = vmatpush1.bf16.msra.mxu0 %v4022_v32 }
 0x132   : > { %v1158_v57 = vpop.permute.xlu1 %1157  ;;  %1035 = vmatpush1.bf16.msra.mxu1 %v4016_v28  ;;  %v1166_v58 = vpop.permute.xlu0 %1165  ;;  %1009 = vmatprep.mubr.bf16.mxu0 %v3592_v18  ;;  %v3416_v28 = vld [vmem:[%s4458_s0 + $0x18] sm:$0xff]  }
 0x133   : > { %1077 = vmatprep.subr.bf16.mxu0 %v4019_v31  ;;  %1052 = vmatprep.mubr.bf16.mxu1 %v3592_v18  ;;  %v1179_v63 = vsel %vm1175_vm2, %v1164_v55, %v1166_v58  ;;  %v1176_v4 = vsel %vm1175_vm2, %v1158_v57, %v1160_v51  ;;  %v2787_v55 = vld [vmem:[%s4459_s1] sm:$0xff] }
 0x134   : > { %2577 = vrot.lane.b32.xlu1 %v4032_v35, %s3600_s24  ;;  %1120 = vmatprep.subr.bf16.mxu1 %v4025_v33 }
 0x135   : > { %2575 = vrot.lane.b32.xlu0 %v4025_v33, %s3600_s24  ;;  %s4406_s24 = scalar_lea.vmem [#allocation4], %s4000_s23  ;;  %s4515_s23 = sadd.s32 (%p3683_p8), 4294967295, %s3524_s19  }
 0x136   : > { %v1170_v60 = vpop.permute.xlu1 %1169  ;;  %v1168_v61 = vpop.permute.xlu0 %1167  ;;  %s3228_s7 = sshll.u32 (%p3683_p8), %s4515_s23, 5 }
 0x137   : > { %3145 = vmatmul.mubr.msk.bf16.vlgmr.msra.gmra.mxu0 %vm793_vm1, %v3414_v59  ;;  %v1181_v7 = vsel %vm1175_vm2, %v1168_v61, %v1170_v60  ;;  %v1180_v13 = vsel %vm1175_vm2, %v1166_v58, %v1168_v61  ;;  %v2788_v61 = vld [vmem:[%s4459_s1 + $0x8] sm:$0xff]  ;;  %s2896_s11 = scalar_lea.vmem (%p3683_p8), %s4462_s4, %s3228_s7 }
 0x138   : > { %1078 = vmatpush1.bf16.msra.mxu0 %v4013_v27  ;;  %3146 = vmatmul.mubr.msk.bf16.vlgmr.msra.gmra.mxu1 %vm793_vm1, %v3414_v59 }
 0x139   : > { %1121 = vmatpush1.bf16.msra.mxu1 %v4028_v34  ;;  %1209 = vmatprep.subr.bf16.mxu0 %v1177_v62 }
 0x13a   : > { %v1174_v0 = vpop.permute.xlu1 %1173  ;;  %1252 = vmatprep.subr.bf16.mxu1 %v1179_v63  ;;  %v1172_v1 = vpop.permute.xlu0 %1171  ;;  %1095 = vmatprep.mubr.bf16.mxu0 %v3592_v18 }
 0x13b   : > { %1138 = vmatprep.mubr.bf16.mxu1 %v3592_v18  ;;  %v1183_v5 = vsel %vm1175_vm2, %v1172_v1, %v1174_v0  ;;  %v1182_v15 = vsel %vm1175_vm2, %v1170_v60, %v1172_v1  ;;  %2791 = vperm.xlu0 %3410, %v2787_v55   ;;  %v3418_v0 = vld [vmem:[%s4458_s0 + $0x28] sm:$0xff]  }
 0x13c   : > { %2796 = vperm.xlu1 %3411, %v2788_v61  }
 0x13e   : > { %v1396_v2 = vpop.permute.xlu1 %1395  ;;  %v1394_v3 = vpop.permute.xlu0 %1393 }
 0x13f   : > { %3147 = vmatmul.mubr.msk.bf16.vlgmr.msra.gmra.mxu0 %vm793_vm1, %v3414_v59  ;;  %v1411_v16 = vsel %vm1409_vm3, %v1394_v3, %v1396_v2 }
 0x140   : > { %1210 = vmatpush1.bf16.msra.mxu0 %v1176_v4  ;;  %3148 = vmatmul.mubr.msk.bf16.vlgmr.msra.gmra.mxu1 %vm793_vm1, %v3414_v59 }
 0x141   : > { %1253 = vmatpush1.bf16.msra.mxu1 %v1178_v6  ;;  %1295 = vmatprep.subr.bf16.mxu0 %v1181_v7 }
 0x142   : > { %v1400_v8 = vpop.permute.xlu1 %1399  ;;  %1338 = vmatprep.subr.bf16.mxu1 %v1183_v5  ;;  %v1398_v9 = vpop.permute.xlu0 %1397  ;;  %1227 = vmatprep.mubr.bf16.mxu0 %v3592_v18 }
 0x143   : > { %1270 = vmatprep.mubr.bf16.mxu1 %v3592_v18  ;;  %v1413_v14 = vsel %vm1409_vm3, %v1398_v9, %v1400_v8  ;;  %v1412_v24 = vsel %vm1409_vm3, %v1396_v2, %v1398_v9 }
 0x146   : > { %v1402_v11 = vpop.permute.xlu1 %1401  ;;  %v1392_v12 = vpop.permute.xlu0 %1391 }
 0x147   : > { %3152 = vmatmul.mubr.msk.bf16.vlgmr.msra.gmra.mxu0 %vm793_vm1, %v3415_v10  ;;  %v1410_v22 = vsel %vm1409_vm3, %v1392_v12, %v1394_v3  ;;  %v1414_v31 = vsel %vm1409_vm3, %v1400_v8, %v1402_v11 }
 0x148   : > { %1296 = vmatpush1.bf16.msra.mxu0 %v1180_v13  ;;  %3153 = vmatmul.mubr.msk.bf16.vlgmr.msra.gmra.mxu1 %vm793_vm1, %v3415_v10 }
 0x149   : > { %1339 = vmatpush1.bf16.msra.mxu1 %v1182_v15  ;;  %1443 = vmatprep.subr.bf16.mxu0 %v1411_v16  ;;  %v3419_v16 = vld [vmem:[%s4458_s0 + $0x30] sm:$0xff]  }
 0x14a   : > { %v1406_v17 = vpop.permute.xlu1 %1405  ;;  %1486 = vmatprep.subr.bf16.mxu1 %v1413_v14  ;;  %v1404_v19 = vpop.permute.xlu0 %1403  ;;  %1313 = vmatprep.mubr.bf16.mxu0 %v3592_v18 }
 0x14b   : > { %1356 = vmatprep.mubr.bf16.mxu1 %v3592_v18  ;;  %v1415_v25 = vsel %vm1409_vm3, %v1402_v11, %v1404_v19  ;;  %v1416_v33 = vsel %vm1409_vm3, %v1404_v19, %v1406_v17 }
 0x14e   : > { %v1628_v20 = vpop.permute.xlu1 %1627  ;;  %v1408_v21 = vpop.permute.xlu0 %1407 }
 0x14f   : > { %3154 = vmatmul.mubr.msk.bf16.vlgmr.msra.gmra.mxu0 %vm793_vm1, %v3415_v10  ;;  %v1417_v23 = vsel %vm1409_vm3, %v1406_v17, %v1408_v21 }
 0x150   : > { %1444 = vmatpush1.bf16.msra.mxu0 %v1410_v22  ;;  %3155 = vmatmul.mubr.msk.bf16.vlgmr.msra.gmra.mxu1 %vm793_vm1, %v3415_v10 }
 0x151   : > { %1487 = vmatpush1.bf16.msra.mxu1 %v1412_v24  ;;  %1529 = vmatprep.subr.bf16.mxu0 %v1415_v25 }
 0x152   : > { %v1632_v26 = vpop.permute.xlu1 %1631  ;;  %1572 = vmatprep.subr.bf16.mxu1 %v1417_v23  ;;  %v1630_v27 = vpop.permute.xlu0 %1629  ;;  %1461 = vmatprep.mubr.bf16.mxu0 %v3592_v18 }
 0x153   : > { %1504 = vmatprep.mubr.bf16.mxu1 %v3592_v18  ;;  %v1645_v34 = vsel %vm1643_vm4, %v1628_v20, %v1630_v27  ;;  %v1646_v42 = vsel %vm1643_vm4, %v1630_v27, %v1632_v26 }
 0x156   : > { %v1626_v29 = vpop.permute.xlu1 %1625  ;;  %v1634_v30 = vpop.permute.xlu0 %1633 }
 0x157   : > { %3159 = vmatmul.mubr.msk.bf16.vlgmr.msra.gmra.mxu0 %vm793_vm1, %v3416_v28  ;;  %v1647_v32 = vsel %vm1643_vm4, %v1632_v26, %v1634_v30  ;;  %v1644_v40 = vsel %vm1643_vm4, %v1626_v29, %v1628_v20 }
 0x158   : > { %1530 = vmatpush1.bf16.msra.mxu0 %v1414_v31  ;;  %3160 = vmatmul.mubr.msk.bf16.vlgmr.msra.gmra.mxu1 %vm793_vm1, %v3416_v28 }
 0x159   : > { %1573 = vmatpush1.bf16.msra.mxu1 %v1416_v33  ;;  %1677 = vmatprep.subr.bf16.mxu0 %v1645_v34  ;;  %v3420_v34 = vld [vmem:[%s4458_s0 + $0x38] sm:$0xff]  }
 0x15a   : > { %v1638_v35 = vpop.permute.xlu1 %1637  ;;  %1720 = vmatprep.subr.bf16.mxu1 %v1647_v32  ;;  %v1636_v36 = vpop.permute.xlu0 %1635  ;;  %1547 = vmatprep.mubr.bf16.mxu0 %v3592_v18 }
 0x15b   : > { %1590 = vmatprep.mubr.bf16.mxu1 %v3592_v18  ;;  %v1649_v39 = vsel %vm1643_vm4, %v1636_v36, %v1638_v35  ;;  %v1648_v49 = vsel %vm1643_vm4, %v1634_v30, %v1636_v36 }
 0x15e   : > { %v1642_v37 = vpop.permute.xlu1 %1641  ;;  %v1640_v38 = vpop.permute.xlu0 %1639 }
 0x15f   : > { %3161 = vmatmul.mubr.msk.bf16.vlgmr.msra.gmra.mxu0 %vm793_vm1, %v3416_v28  ;;  %v1651_v41 = vsel %vm1643_vm4, %v1640_v38, %v1642_v37  ;;  %v1650_v51 = vsel %vm1643_vm4, %v1638_v35, %v1640_v38 }
 0x160   : > { %1678 = vmatpush1.bf16.msra.mxu0 %v1644_v40  ;;  %3162 = vmatmul.mubr.msk.bf16.vlgmr.msra.gmra.mxu1 %vm793_vm1, %v3416_v28 }
 0x161   : > { %1721 = vmatpush1.bf16.msra.mxu1 %v1646_v42  ;;  %1763 = vmatprep.subr.bf16.mxu0 %v1649_v39 }
 0x162   : > { %v1864_v43 = vpop.permute.xlu1 %1863  ;;  %v1862_v44 = vpop.permute.xlu0 %1861  ;;  %1806 = vmatprep.subr.bf16.mxu1 %v1651_v41  ;;  %1695 = vmatprep.mubr.bf16.mxu0 %v3592_v18 }
 0x163   : > { %1738 = vmatprep.mubr.bf16.mxu1 %v3592_v18  ;;  %v1879_v48 = vsel %vm1877_vm5, %v1862_v44, %v1864_v43 }
 0x166   : > { %v1868_v46 = vpop.permute.xlu1 %1867  ;;  %v1866_v47 = vpop.permute.xlu0 %1865 }
 0x167   : > { %3166 = vmatmul.mubr.msk.bf16.vlgmr.msra.gmra.mxu0 %vm793_vm1, %v3417_v45  ;;  %v1881_v50 = vsel %vm1877_vm5, %v1866_v47, %v1868_v46  ;;  %v1880_v59 = vsel %vm1877_vm5, %v1864_v43, %v1866_v47 }
 0x168   : > { %1764 = vmatpush1.bf16.msra.mxu0 %v1648_v49  ;;  %3167 = vmatmul.mubr.msk.bf16.vlgmr.msra.gmra.mxu1 %vm793_vm1, %v3417_v45 }
 0x169   : > { %1807 = vmatpush1.bf16.msra.mxu1 %v1650_v51  ;;  %1911 = vmatprep.subr.bf16.mxu0 %v1879_v48  ;;  %v3421_v51 = vld [vmem:[%s4458_s0 + $0x40] sm:$0xff]  }
 0x16a   : > { %v1870_v52 = vpop.permute.xlu1 %1869  ;;  %v1860_v53 = vpop.permute.xlu0 %1859  ;;  %1954 = vmatprep.subr.bf16.mxu1 %v1881_v50  ;;  %1781 = vmatprep.mubr.bf16.mxu0 %v3592_v18 }
 0x16b   : > { %1824 = vmatprep.mubr.bf16.mxu1 %v3592_v18  ;;  %v1878_v57 = vsel %vm1877_vm5, %v1860_v53, %v1862_v44  ;;  %v1882_v3 = vsel %vm1877_vm5, %v1868_v46, %v1870_v52 }
 0x16e   : > { %v1874_v54 = vpop.permute.xlu1 %1873  ;;  %v1872_v56 = vpop.permute.xlu0 %1871 }
 0x16f   : > { %3168 = vmatmul.mubr.msk.bf16.vlgmr.msra.gmra.mxu0 %vm793_vm1, %v3417_v45  ;;  %v1883_v58 = vsel %vm1877_vm5, %v1870_v52, %v1872_v56  ;;  %v1884_v5 = vsel %vm1877_vm5, %v1872_v56, %v1874_v54 }
 0x170   : > { %1912 = vmatpush1.bf16.msra.mxu0 %v1878_v57  ;;  %3169 = vmatmul.mubr.msk.bf16.vlgmr.msra.gmra.mxu1 %vm793_vm1, %v3417_v45 }
 0x171   : > { %1955 = vmatpush1.bf16.msra.mxu1 %v1880_v59  ;;  %1997 = vmatprep.subr.bf16.mxu0 %v1883_v58 }
 0x172   : > { %v2096_v60 = vpop.permute.xlu1 %2095  ;;  %v1876_v62 = vpop.permute.xlu0 %1875  ;;  %1929 = vmatprep.mubr.bf16.mxu0 %v3592_v18  ;;  %1972 = vmatprep.mubr.bf16.mxu1 %v3592_v18 }
 0x173   : > { %v1885_v63 = vsel %vm1877_vm5, %v1874_v54, %v1876_v62 }
 0x174   : > { %2040 = vmatprep.subr.bf16.mxu1 %v1885_v63 }
 0x176   : > { %v2100_v1 = vpop.permute.xlu1 %2099  ;;  %v2098_v2 = vpop.permute.xlu0 %2097 }
 0x177   : > { %3173 = vmatmul.mubr.msk.bf16.vlgmr.msra.gmra.mxu0 %vm793_vm1, %v3418_v0  ;;  %v2113_v4 = vsel %vm2111_vm6, %v2096_v60, %v2098_v2  ;;  %v2114_v13 = vsel %vm2111_vm6, %v2098_v2, %v2100_v1 }
 0x178   : > { %1998 = vmatpush1.bf16.msra.mxu0 %v1882_v3  ;;  %3174 = vmatmul.mubr.msk.bf16.vlgmr.msra.gmra.mxu1 %vm793_vm1, %v3418_v0 }
 0x179   : > { %2041 = vmatpush1.bf16.msra.mxu1 %v1884_v5  ;;  %2145 = vmatprep.subr.bf16.mxu0 %v2113_v4 }
 0x17a   : > { %v2094_v6 = vpop.permute.xlu1 %2093  ;;  %v2102_v7 = vpop.permute.xlu0 %2101  ;;  %2015 = vmatprep.mubr.bf16.mxu0 %v3592_v18  ;;  %2058 = vmatprep.mubr.bf16.mxu1 %v3592_v18 }
 0x17b   : > { %v2115_v8 = vsel %vm2111_vm6, %v2100_v1, %v2102_v7  ;;  %v2112_v11 = vsel %vm2111_vm6, %v2094_v6, %v2096_v60 }
 0x17c   : > { %2188 = vmatprep.subr.bf16.mxu1 %v2115_v8 }
 0x17e   : > { %v2106_v9 = vpop.permute.xlu1 %2105  ;;  %v2104_v10 = vpop.permute.xlu0 %2103 }
 0x17f   : > { %3175 = vmatmul.mubr.msk.bf16.vlgmr.msra.gmra.mxu0 %vm793_vm1, %v3418_v0  ;;  %v2117_v12 = vsel %vm2111_vm6, %v2104_v10, %v2106_v9  ;;  %v2116_v21 = vsel %vm2111_vm6, %v2102_v7, %v2104_v10 }
 0x180   : > { %2146 = vmatpush1.bf16.msra.mxu0 %v2112_v11  ;;  %3176 = vmatmul.mubr.msk.bf16.vlgmr.msra.gmra.mxu1 %vm793_vm1, %v3418_v0 }
 0x181   : > { %2189 = vmatpush1.bf16.msra.mxu1 %v2114_v13  ;;  %2231 = vmatprep.subr.bf16.mxu0 %v2117_v12 }
 0x182   : > { %v2110_v14 = vpop.permute.xlu1 %2109  ;;  %v2108_v15 = vpop.permute.xlu0 %2107  ;;  %2163 = vmatprep.mubr.bf16.mxu0 %v3592_v18  ;;  %2206 = vmatprep.mubr.bf16.mxu1 %v3592_v18 }
 0x183   : > { %v2119_v17 = vsel %vm2111_vm6, %v2108_v15, %v2110_v14  ;;  %v2118_v23 = vsel %vm2111_vm6, %v2106_v9, %v2108_v15 }
 0x184   : > { %2274 = vmatprep.subr.bf16.mxu1 %v2119_v17 }
 0x186   : > { %v2332_v19 = vpop.permute.xlu1 %2331  ;;  %v2330_v20 = vpop.permute.xlu0 %2329 }
 0x187   : > { %3180 = vmatmul.mubr.msk.bf16.vlgmr.msra.gmra.mxu0 %vm793_vm1, %v3419_v16  ;;  %v2347_v22 = vsel %vm2345_vm7, %v2330_v20, %v2332_v19 }
 0x188   : > { %2232 = vmatpush1.bf16.msra.mxu0 %v2116_v21  ;;  %3181 = vmatmul.mubr.msk.bf16.vlgmr.msra.gmra.mxu1 %vm793_vm1, %v3419_v16 }
 0x189   : > { %2275 = vmatpush1.bf16.msra.mxu1 %v2118_v23  ;;  %2379 = vmatprep.subr.bf16.mxu0 %v2347_v22 }
 0x18a   : > { %v2336_v24 = vpop.permute.xlu1 %2335  ;;  %v2334_v25 = vpop.permute.xlu0 %2333  ;;  %2249 = vmatprep.mubr.bf16.mxu0 %v3592_v18  ;;  %2292 = vmatprep.mubr.bf16.mxu1 %v3592_v18 }
 0x18b   : > { %v2349_v26 = vsel %vm2345_vm7, %v2334_v25, %v2336_v24  ;;  %v2348_v30 = vsel %vm2345_vm7, %v2332_v19, %v2334_v25 }
 0x18c   : > { %2422 = vmatprep.subr.bf16.mxu1 %v2349_v26 }
 0x18e   : > { %v2338_v27 = vpop.permute.xlu1 %2337  ;;  %v2328_v28 = vpop.permute.xlu0 %2327 }
 0x18f   : > { %v2346_v29 = vsel %vm2345_vm7, %v2328_v28, %v2330_v20  ;;  %3182 = vmatmul.mubr.msk.bf16.vlgmr.msra.gmra.mxu0 %vm793_vm1, %v3419_v16  ;;  %v2350_v37 = vsel %vm2345_vm7, %v2336_v24, %v2338_v27 }
 0x190   : > { %3183 = vmatmul.mubr.msk.bf16.vlgmr.msra.gmra.mxu1 %vm793_vm1, %v3419_v16  ;;  %2380 = vmatpush1.bf16.msra.mxu0 %v2346_v29 }
 0x191   : > { %2423 = vmatpush1.bf16.msra.mxu1 %v2348_v30  ;;  %2397 = vmatprep.mubr.bf16.mxu0 %v3592_v18 }
 0x192   : > { %v2342_v31 = vpop.permute.xlu1 %2341  ;;  %2440 = vmatprep.mubr.bf16.mxu1 %v3592_v18 }
 0x193   : > { %v2340_v32 = vpop.permute.xlu0 %2339 }
 0x194   : > { %v2351_v33 = vsel %vm2345_vm7, %v2338_v27, %v2340_v32  ;;  %v2352_v38 = vsel %vm2345_vm7, %v2340_v32, %v2342_v31 }
 0x195   : > { %2465 = vmatprep.subr.bf16.mxu0 %v2351_v33 }
 0x196   : > { %v2564_v35 = vpop.permute.xlu1 %2563 }
 0x197   : > { %v2344_v36 = vpop.permute.xlu0 %2343  ;;  %3187 = vmatmul.mubr.msk.bf16.vlgmr.msra.gmra.mxu0 %vm793_vm1, %v3420_v34 }
 0x198   : > { %v2353_v39 = vsel %vm2345_vm7, %v2342_v31, %v2344_v36  ;;  %2466 = vmatpush1.bf16.msra.mxu0 %v2350_v37  ;;  %3188 = vmatmul.mubr.msk.bf16.vlgmr.msra.gmra.mxu1 %vm793_vm1, %v3420_v34 }
 0x199   : > { %2508 = vmatprep.subr.bf16.mxu1 %v2353_v39  ;;  %2483 = vmatprep.mubr.bf16.mxu0 %v3592_v18 }
 0x19a   : > { %v2568_v40 = vpop.permute.xlu1 %2567  ;;  %2509 = vmatpush1.bf16.msra.mxu1 %v2352_v38  ;;  %2526 = vmatprep.mubr.bf16.mxu1 %v3592_v18 }
 0x19b   : > { %v2566_v41 = vpop.permute.xlu0 %2565 }
 0x19c   : > { %v2581_v42 = vsel %vm2579_vm8, %v2564_v35, %v2566_v41  ;;  %v2582_v46 = vsel %vm2579_vm8, %v2566_v41, %v2568_v40 }
 0x19d   : > { %2613 = vmatprep.subr.bf16.mxu0 %v2581_v42 }
 0x19e   : > { %v2562_v43 = vpop.permute.xlu1 %2561 }
 0x19f   : > { %v2580_v44 = vsel %vm2579_vm8, %v2562_v43, %v2564_v35  ;;  %v2570_v45 = vpop.permute.xlu0 %2569  ;;  %3189 = vmatmul.mubr.msk.bf16.vlgmr.msra.gmra.mxu0 %vm793_vm1, %v3420_v34 }
 0x1a0   : > { %v2583_v47 = vsel %vm2579_vm8, %v2568_v40, %v2570_v45  ;;  %3190 = vmatmul.mubr.msk.bf16.vlgmr.msra.gmra.mxu1 %vm793_vm1, %v3420_v34  ;;  %2614 = vmatpush1.bf16.msra.mxu0 %v2580_v44 }
 0x1a1   : > { %2656 = vmatprep.subr.bf16.mxu1 %v2583_v47  ;;  %2631 = vmatprep.mubr.bf16.mxu0 %v3592_v18 }
 0x1a2   : > { %v2574_v48 = vpop.permute.xlu1 %2573  ;;  %2657 = vmatpush1.bf16.msra.mxu1 %v2582_v46  ;;  %2674 = vmatprep.mubr.bf16.mxu1 %v3592_v18 }
 0x1a3   : > { %v2572_v49 = vpop.permute.xlu0 %2571 }
 0x1a4   : > { %v2585_v50 = vsel %vm2579_vm8, %v2572_v49, %v2574_v48  ;;  %v2584_v54 = vsel %vm2579_vm8, %v2570_v45, %v2572_v49 }
 0x1a5   : > { %2699 = vmatprep.subr.bf16.mxu0 %v2585_v50 }
 0x1a6   : > { %v2578_v52 = vpop.permute.xlu1 %2577 }
 0x1a7   : > { %v2576_v53 = vpop.permute.xlu0 %2575  ;;  %3194 = vmatmul.mubr.msk.bf16.vlgmr.msra.gmra.mxu0 %vm793_vm1, %v3421_v51 }
 0x1a8   : > { %v2586_v55 = vsel %vm2579_vm8, %v2574_v48, %v2576_v53  ;;  %v2587_v56 = vsel %vm2579_vm8, %v2576_v53, %v2578_v52  ;;  %2700 = vmatpush1.bf16.msra.mxu0 %v2584_v54  ;;  %3195 = vmatmul.mubr.msk.bf16.vlgmr.msra.gmra.mxu1 %vm793_vm1, %v3421_v51 }
 0x1a9   : > { %2742 = vmatprep.subr.bf16.mxu1 %v2587_v56  ;;  %2717 = vmatprep.mubr.bf16.mxu0 %v3592_v18 }
 0x1aa   : > { %2743 = vmatpush1.bf16.msra.mxu1 %v2586_v55  ;;  %2760 = vmatprep.mubr.bf16.mxu1 %v3592_v18 }
 0x1af   : > { %3196 = vmatmul.mubr.msk.bf16.vlgmr.msra.gmra.mxu0 %vm793_vm1, %v3421_v51 }
 0x1b0   : > { %3197 = vmatmul.mubr.msk.bf16.vlgmr.msra.gmra.mxu1 %vm793_vm1, %v3421_v51 }
 0x1e5   : > { %v874_v57 = vpop.f32.mrf.mxu1 }
 0x1e7   : > { %v831_v58 = vpop.f32.mrf.mxu0  ;;  %v876_v59 = vpop.f32.mrf.mxu1 }
 0x1e9   : > { %v833_v60 = vpop.f32.mrf.mxu0  ;;  %v878_v61 = vpop.f32.mrf.mxu1 }
 0x1eb   : > { %v835_v62 = vpop.f32.mrf.mxu0  ;;  %v880_v0 = vpop.f32.mrf.mxu1 }
 0x1ed   : > { %v837_v63 = vpop.f32.mrf.mxu0 }
 0x1ef   : > { %v917_v1 = vpop.f32.mrf.mxu0 }
 0x1f0   : > { %v960_v2 = vpop.f32.mrf.mxu1 }
 0x1f1   : > { %v919_v3 = vpop.f32.mrf.mxu0 }
 0x1f2   : > { %v962_v4 = vpop.f32.mrf.mxu1 }
 0x1f3   : > { %v921_v5 = vpop.f32.mrf.mxu0 }
 0x1f4   : > { %v964_v6 = vpop.f32.mrf.mxu1 }
 0x1f5   : > { %v923_v7 = vpop.f32.mrf.mxu0 }
 0x1f6   : > { %v966_v18 = vpop.f32.mrf.mxu1 }
 0x1f7   : > { %v1011_v8 = vpop.f32.mrf.mxu0 }
 0x1f8   : > { %v1012_v9 = vadd.f32 %v1011_v8, %v831_v58  ;;  %v1054_v10 = vpop.f32.mrf.mxu1 }
 0x1f9   : > { %v1055_v11 = vadd.f32 %v1054_v10, %v874_v57  ;;  %v1013_v12 = vpop.f32.mrf.mxu0 }
 0x1fa   : > { %v1014_v13 = vadd.f32 %v1013_v12, %v833_v60  ;;  %v1056_v14 = vpop.f32.mrf.mxu1 }
 0x1fb   : > { %v1057_v15 = vadd.f32 %v1056_v14, %v876_v59  ;;  %v1015_v16 = vpop.f32.mrf.mxu0 }
 0x1fc   : > { %v1016_v17 = vadd.f32 %v1015_v16, %v835_v62  ;;  %v1058_v19 = vpop.f32.mrf.mxu1 }
 0x1fd   : > { %v1059_v20 = vadd.f32 %v1058_v19, %v878_v61  ;;  %v1017_v21 = vpop.f32.mrf.mxu0 }
 0x1fe   : > { %v1018_v22 = vadd.f32 %v1017_v21, %v837_v63  ;;  %v1060_v23 = vpop.f32.mrf.mxu1 }
 0x1ff   : > { %v1061_v24 = vadd.f32 %v1060_v23, %v880_v0  ;;  %v1097_v25 = vpop.f32.mrf.mxu0 }
 0x200   : > { %v1098_v26 = vadd.f32 %v1097_v25, %v917_v1  ;;  %v1140_v27 = vpop.f32.mrf.mxu1 }
 0x201   : > { %v1141_v28 = vadd.f32 %v1140_v27, %v960_v2  ;;  %v1099_v29 = vpop.f32.mrf.mxu0 }
 0x202   : > { %v1100_v30 = vadd.f32 %v1099_v29, %v919_v3  ;;  %v1142_v31 = vpop.f32.mrf.mxu1 }
 0x203   : > { %v1143_v32 = vadd.f32 %v1142_v31, %v962_v4  ;;  %v1101_v33 = vpop.f32.mrf.mxu0 }
 0x204   : > { %v1102_v34 = vadd.f32 %v1101_v33, %v921_v5  ;;  %v1144_v35 = vpop.f32.mrf.mxu1 }
 0x205   : > { %v1145_v36 = vadd.f32 %v1144_v35, %v964_v6  ;;  %v1103_v37 = vpop.f32.mrf.mxu0 }
 0x206   : > { %v1104_v38 = vadd.f32 %v1103_v37, %v923_v7  ;;  %v1146_v39 = vpop.f32.mrf.mxu1 }
 0x207   : > { %v1147_v40 = vadd.f32 %v1146_v39, %v966_v18  ;;  %v1229_v41 = vpop.f32.mrf.mxu0 }
 0x208   : > { %v1367_v42 = vadd.f32 %v1229_v41, %v1012_v9  ;;  %v1272_v43 = vpop.f32.mrf.mxu1 }
 0x209   : > { %v1369_v44 = vadd.f32 %v1272_v43, %v1055_v11  ;;  %v1231_v45 = vpop.f32.mrf.mxu0 }
 0x20a   : > { %v1368_v46 = vadd.f32 %v1231_v45, %v1014_v13  ;;  %v1274_v47 = vpop.f32.mrf.mxu1 }
 0x20b   : > { %v1370_v48 = vadd.f32 %v1274_v47, %v1057_v15  ;;  %v1233_v49 = vpop.f32.mrf.mxu0 }
 0x20c   : > { %v1375_v50 = vadd.f32 %v1233_v49, %v1016_v17  ;;  %v1276_v51 = vpop.f32.mrf.mxu1 }
 0x20d   : > { %v1377_v52 = vadd.f32 %v1276_v51, %v1059_v20  ;;  %v1235_v53 = vpop.f32.mrf.mxu0 }
 0x20e   : > { %v1376_v54 = vadd.f32 %v1235_v53, %v1018_v22  ;;  %v1278_v55 = vpop.f32.mrf.mxu1 }
 0x20f   : > { %v1378_v56 = vadd.f32 %v1278_v55, %v1061_v24  ;;  %v1315_v57 = vpop.f32.mrf.mxu0 }
 0x210   : > { %v1371_v58 = vadd.f32 %v1315_v57, %v1098_v26  ;;  %v1358_v59 = vpop.f32.mrf.mxu1 }
 0x211   : > { %v1373_v60 = vadd.f32 %v1358_v59, %v1141_v28  ;;  %v1317_v61 = vpop.f32.mrf.mxu0 }
 0x212   : > { %v1372_v62 = vadd.f32 %v1317_v61, %v1100_v30  ;;  %v1360_v63 = vpop.f32.mrf.mxu1 }
 0x213   : > { %v1374_v0 = vadd.f32 %v1360_v63, %v1143_v32  ;;  %v1319_v1 = vpop.f32.mrf.mxu0 }
 0x214   : > { %v1379_v2 = vadd.f32 %v1319_v1, %v1102_v34  ;;  %v1362_v3 = vpop.f32.mrf.mxu1 }
 0x215   : > { %v1381_v4 = vadd.f32 %v1362_v3, %v1145_v36  ;;  %v1321_v5 = vpop.f32.mrf.mxu0 }
 0x216   : > { %v1380_v6 = vadd.f32 %v1321_v5, %v1104_v38  ;;  %v1364_v7 = vpop.f32.mrf.mxu1 }
 0x217   : > { %v1382_v18 = vadd.f32 %v1364_v7, %v1147_v40  ;;  %v1463_v8 = vpop.f32.mrf.mxu0 }
 0x218   : > { %v4282_v9 = vadd.f32 %v1463_v8, %v1367_v42  ;;  %v1506_v10 = vpop.f32.mrf.mxu1 }
 0x219   : > { %v4284_v11 = vadd.f32 %v1506_v10, %v1369_v44  ;;  %v1465_v12 = vpop.f32.mrf.mxu0 }
 0x21a   : > { %v4286_v13 = vadd.f32 %v1465_v12, %v1368_v46  ;;  %v1508_v14 = vpop.f32.mrf.mxu1 }
 0x21b   : > { %v4288_v15 = vadd.f32 %v1508_v14, %v1370_v48  ;;  %v1467_v16 = vpop.f32.mrf.mxu0 }
 0x21c   : > { %v4290_v17 = vadd.f32 %v1467_v16, %v1375_v50  ;;  %v1510_v19 = vpop.f32.mrf.mxu1 }
 0x21d   : > { %v4292_v20 = vadd.f32 %v1510_v19, %v1377_v52  ;;  %v1469_v21 = vpop.f32.mrf.mxu0 }
 0x21e   : > { %v4294_v22 = vadd.f32 %v1469_v21, %v1376_v54  ;;  %v1512_v23 = vpop.f32.mrf.mxu1 }
 0x21f   : > { %v4296_v24 = vadd.f32 %v1512_v23, %v1378_v56  ;;  %v1549_v25 = vpop.f32.mrf.mxu0 }
 0x220   : > { %v4298_v26 = vadd.f32 %v1549_v25, %v1371_v58  ;;  %v1592_v27 = vpop.f32.mrf.mxu1 }
 0x221   : > { %v4300_v28 = vadd.f32 %v1592_v27, %v1373_v60  ;;  %v1551_v29 = vpop.f32.mrf.mxu0 }
 0x222   : > { %v4302_v30 = vadd.f32 %v1551_v29, %v1372_v62  ;;  %v1594_v31 = vpop.f32.mrf.mxu1 }
 0x223   : > { %v4304_v32 = vadd.f32 %v1594_v31, %v1374_v0  ;;  %v1553_v33 = vpop.f32.mrf.mxu0 }
 0x224   : > { %v4306_v34 = vadd.f32 %v1553_v33, %v1379_v2  ;;  %v1596_v35 = vpop.f32.mrf.mxu1 }
 0x225   : > { %v4308_v36 = vadd.f32 %v1596_v35, %v1381_v4  ;;  %v1555_v37 = vpop.f32.mrf.mxu0 }
 0x226   : > { %v4310_v38 = vadd.f32 %v1555_v37, %v1380_v6  ;;  %v1598_v39 = vpop.f32.mrf.mxu1 }
 0x227   : > { %4481 = vst [vmem:[#allocation7_spill] sm:$0xff] %v4308_v36  ;;  %v4312_v40 = vadd.f32 %v1598_v39, %v1382_v18  ;;  %v1697_v41 = vpop.f32.mrf.mxu0 }
 0x228   : > { %4482 = vst [vmem:[#allocation8_spill] sm:$0xff] %v4310_v38  ;;  %v1740_v42 = vpop.f32.mrf.mxu1 }
 0x229   : > { %4483 = vst [vmem:[#allocation9_spill] sm:$0xff] %v4312_v40  ;;  %v1699_v43 = vpop.f32.mrf.mxu0 }
 0x22a   : > { %v1742_v44 = vpop.f32.mrf.mxu1 }
 0x22b   : > { %v1701_v45 = vpop.f32.mrf.mxu0 }
 0x22c   : > { %v1744_v46 = vpop.f32.mrf.mxu1 }
 0x22d   : > { %v1703_v47 = vpop.f32.mrf.mxu0 }
 0x22e   : > { %v1746_v48 = vpop.f32.mrf.mxu1 }
 0x22f   : > { %v1783_v49 = vpop.f32.mrf.mxu0 }
 0x230   : > { %v1826_v50 = vpop.f32.mrf.mxu1 }
 0x231   : > { %v1785_v51 = vpop.f32.mrf.mxu0 }
 0x232   : > { %v1828_v52 = vpop.f32.mrf.mxu1 }
 0x233   : > { %v1787_v53 = vpop.f32.mrf.mxu0 }
 0x234   : > { %v1830_v54 = vpop.f32.mrf.mxu1 }
 0x235   : > { %v1789_v55 = vpop.f32.mrf.mxu0 }
 0x236   : > { %v1832_v56 = vpop.f32.mrf.mxu1 }
 0x237   : > { %v1931_v57 = vpop.f32.mrf.mxu0 }
 0x238   : > { %v1974_v58 = vpop.f32.mrf.mxu1 }
 0x239   : > { %v1933_v59 = vpop.f32.mrf.mxu0 }
 0x23a   : > { %v1976_v60 = vpop.f32.mrf.mxu1 }
 0x23b   : > { %v1935_v61 = vpop.f32.mrf.mxu0 }
 0x23c   : > { %v1978_v62 = vpop.f32.mrf.mxu1 }
 0x23d   : > { %v1937_v63 = vpop.f32.mrf.mxu0 }
 0x23e   : > { %v1980_v0 = vpop.f32.mrf.mxu1 }
 0x23f   : > { %v2017_v1 = vpop.f32.mrf.mxu0 }
 0x240   : > { %v2060_v2 = vpop.f32.mrf.mxu1 }
 0x241   : > { %v2019_v3 = vpop.f32.mrf.mxu0 }
 0x242   : > { %v2062_v4 = vpop.f32.mrf.mxu1 }
 0x243   : > { %v2021_v5 = vpop.f32.mrf.mxu0 }
 0x244   : > { %v2064_v6 = vpop.f32.mrf.mxu1 }
 0x245   : > { %v2023_v7 = vpop.f32.mrf.mxu0 }
 0x246   : > { %v2066_v18 = vpop.f32.mrf.mxu1 }
 0x247   : > { %v2165_v8 = vpop.f32.mrf.mxu0 }
 0x248   : > { %v2208_v10 = vpop.f32.mrf.mxu1 }
 0x249   : > { %v2167_v12 = vpop.f32.mrf.mxu0 }
 0x24a   : > { %v2210_v14 = vpop.f32.mrf.mxu1 }
 0x24b   : > { %v2169_v16 = vpop.f32.mrf.mxu0 }
 0x24c   : > { %v2212_v19 = vpop.f32.mrf.mxu1 }
 0x24d   : > { %v4314_v21 = vpop.f32.mrf.mxu0 }
 0x24e   : > { %4484 = vst [vmem:[#allocation10_spill] sm:$0xff] %v4314_v21  ;;  %v4316_v23 = vpop.f32.mrf.mxu1 }
 0x24f   : > { %4485 = vst [vmem:[#allocation11_spill] sm:$0xff] %v4316_v23  ;;  %v4318_v25 = vpop.f32.mrf.mxu0 }
 0x250   : > { %4486 = vst [vmem:[#allocation12_spill] sm:$0xff] %v4318_v25  ;;  %v4320_v27 = vpop.f32.mrf.mxu1 }
 0x251   : > { %4487 = vst [vmem:[#allocation13_spill] sm:$0xff] %v4320_v27  ;;  %v4322_v29 = vpop.f32.mrf.mxu0 }
 0x252   : > { %4488 = vst [vmem:[#allocation14_spill] sm:$0xff] %v4322_v29  ;;  %v4324_v31 = vpop.f32.mrf.mxu1  ;;  %v1835_v29 = vadd.f32 %v1697_v41, %v4282_v9  ;;  %v1839_v9 = vadd.f32 %v1783_v49, %v4298_v26 }
 0x253   : > { %4489 = vst [vmem:[#allocation15_spill] sm:$0xff] %v4324_v31  ;;  %v4326_v33 = vpop.f32.mrf.mxu0  ;;  %v1837_v31 = vadd.f32 %v1740_v42, %v4284_v11  ;;  %v1841_v11 = vadd.f32 %v1826_v50, %v4300_v28  ;;  %v4497_v42 = vld [vmem:[#allocation7_spill] sm:$0xff] }
 0x254   : > { %4490 = vst [vmem:[#allocation16_spill] sm:$0xff] %v4326_v33  ;;  %v4328_v35 = vpop.f32.mrf.mxu1  ;;  %v1845_v33 = vadd.f32 %v1744_v46, %v4292_v20  ;;  %v1849_v20 = vadd.f32 %v1830_v54, %v4497_v42  ;;  %v2069_v46 = vadd.f32 %v1931_v57, %v1835_v29 }
 0x255   : > { %4491 = vst [vmem:[#allocation17_spill] sm:$0xff] %v4328_v35  ;;  %v4330_v37 = vpop.f32.mrf.mxu0  ;;  %v1836_v35 = vadd.f32 %v1699_v43, %v4286_v13  ;;  %v1840_v13 = vadd.f32 %v1785_v51, %v4302_v30  ;;  %v2071_v26 = vadd.f32 %v1974_v58, %v1837_v31 }
 0x256   : > { %4492 = vst [vmem:[#allocation18_spill] sm:$0xff] %v4330_v37  ;;  %v4332_v39 = vpop.f32.mrf.mxu1  ;;  %v1838_v37 = vadd.f32 %v1742_v44, %v4288_v15  ;;  %v1842_v15 = vadd.f32 %v1828_v52, %v4304_v32  ;;  %v4499_v44 = vld [vmem:[#allocation8_spill] sm:$0xff]  ;;  %v2079_v50 = vadd.f32 %v1978_v62, %v1845_v33  ;;  %v2073_v52 = vadd.f32 %v2017_v1, %v1839_v9  ;;  %v4501_v1 = vld [vmem:[#allocation10_spill] sm:$0xff] }
 0x257   : > { %4493 = vst [vmem:[#allocation19_spill] sm:$0xff] %v4332_v39  ;;  %v2399_v40 = vpop.f32.mrf.mxu0  ;;  %v1843_v39 = vadd.f32 %v1701_v45, %v4290_v17  ;;  %v1847_v17 = vadd.f32 %v1787_v53, %v4306_v34  ;;  %v4500_v45 = vld [vmem:[#allocation9_spill] sm:$0xff]  ;;  %v2070_v28 = vadd.f32 %v1933_v59, %v1836_v35  ;;  %v2075_v34 = vadd.f32 %v2060_v2, %v1841_v11 }
 0x258   : > { %v2442_v21 = vpop.f32.mrf.mxu1  ;;  %v2074_v54 = vadd.f32 %v2019_v3, %v1840_v13  ;;  %v2076_v42 = vadd.f32 %v2062_v4, %v1842_v15  ;;  %v2303_v58 = vadd.f32 %v2165_v8, %v2069_v46  ;;  %v2305_v29 = vadd.f32 %v2208_v10, %v2071_v26  ;;  %v4502_v3 = vld [vmem:[#allocation11_spill] sm:$0xff] }
 0x259   : > { %v4334_v38 = vpop.f32.mrf.mxu0  ;;  %v2077_v49 = vadd.f32 %v1935_v61, %v1843_v39  ;;  %v4505_v8 = vld [vmem:[#allocation14_spill] sm:$0xff] }
 0x25a   : > { %v4336_v23 = vpop.f32.mrf.mxu1  ;;  %v2308_v10 = vadd.f32 %v4505_v8, %v2074_v54  ;;  %v4506_v31 = vld [vmem:[#allocation15_spill] sm:$0xff] }
 0x25b   : > { %4494 = vst [vmem:[#allocation20_spill] sm:$0xff] %v4336_v23  ;;  %v4338_v25 = vpop.f32.mrf.mxu0  ;;  %v1844_v23 = vadd.f32 %v1703_v47, %v4294_v22  ;;  %v1848_v22 = vadd.f32 %v1789_v55, %v4499_v44  ;;  %v2311_v62 = vadd.f32 %v2169_v16, %v2077_v49  ;;  %v4507_v33 = vld [vmem:[#allocation16_spill] sm:$0xff] }
 0x25c   : > { %4495 = vst [vmem:[#allocation21_spill] sm:$0xff] %v4338_v25  ;;  %v4342_v27 = vpop.f32.mrf.mxu1  ;;  %v1846_v25 = vadd.f32 %v1746_v48, %v4296_v24  ;;  %v1850_v24 = vadd.f32 %v1832_v56, %v4500_v45  ;;  %v2072_v48 = vadd.f32 %v1976_v60, %v1838_v37  ;;  %v2304_v60 = vadd.f32 %v2167_v12, %v2070_v28  ;;  %v4508_v37 = vld [vmem:[#allocation17_spill] sm:$0xff] }
 0x25d   : > { %v4348_v36 = vpop.f32.mrf.mxu0  ;;  %v2078_v51 = vadd.f32 %v1937_v63, %v1844_v23  ;;  %v2082_v56 = vadd.f32 %v2023_v7, %v1848_v22  ;;  %v2313_v63 = vadd.f32 %v2212_v19, %v2079_v50  ;;  %v2537_v23 = vadd.f32 %v2399_v40, %v2303_v58  ;;  %v4504_v7 = vld [vmem:[#allocation13_spill] sm:$0xff]  ;;  %v4378_v19 = vpop.permute.xlu0 %2791  ;;  %v4509_v13 = vld [vmem:[#allocation18_spill] sm:$0xff] }
 0x25e   : > { %v4354_v41 = vpop.f32.mrf.mxu1  ;;  %v2080_v32 = vadd.f32 %v1980_v0, %v1846_v25  ;;  %v2084_v57 = vadd.f32 %v2066_v18, %v1850_v24  ;;  %v2306_v61 = vadd.f32 %v2210_v14, %v2072_v48  ;;  %v2309_v18 = vadd.f32 %v4504_v7, %v2075_v34 }
 0x25f   : > { %4496 = vst [vmem:[#allocation22_spill] sm:$0xff] %v4354_v41  ;;  %v4360_v43 = vpop.f32.mrf.mxu0  ;;  %v2083_v41 = vadd.f32 %v2064_v6, %v1849_v20  ;;  %v2312_v2 = vadd.f32 %v4501_v1, %v2078_v51  ;;  %v2310_v12 = vadd.f32 %v4506_v31, %v2076_v42  ;;  %v2539_v14 = vadd.f32 %v2442_v21, %v2305_v29 }
 0x260   : > { %4498 = vst [vmem:[#allocation7_spill] sm:$0xff] %v4360_v43  ;;  %v2528_v47 = vpop.f32.mrf.mxu1  ;;  %v2081_v43 = vadd.f32 %v2021_v5, %v1847_v17  ;;  %v2314_v4 = vadd.f32 %v4502_v3, %v2080_v32  ;;  %v4503_v5 = vld [vmem:[#allocation12_spill] sm:$0xff]  ;;  %v2538_v9 = vadd.f32 %v4334_v38, %v2304_v60  ;;  %v2316_v15 = vadd.f32 %v4509_v13, %v2082_v56  ;;  %v4510_v17 = vld [vmem:[#allocation19_spill] sm:$0xff] }
 0x261   : > { %v2487_v30 = vpop.f32.mrf.mxu0  ;;  %v2307_v6 = vadd.f32 %v4503_v5, %v2073_v52  ;;  %v2317_v39 = vadd.f32 %v4508_v37, %v2083_v41  ;;  %v4385_v20 = vadd.f32 %v4510_v17, %v2084_v57  ;;  %v2547_v26 = vadd.f32 %v4342_v27, %v2313_v63  ;;  %v4394_v52 = vpop.permute.xlu1 %2796 }
 0x262   : > { %v2530_v53 = vpop.f32.mrf.mxu1  ;;  %v2315_v35 = vadd.f32 %v4507_v33, %v2081_v43  ;;  %v4511_v44 = vld [vmem:[#allocation20_spill] sm:$0xff]  ;;  %v2546_v38 = vadd.f32 %v4348_v36, %v2312_v2  ;;  %v2543_v42 = vadd.f32 %v2528_v47, %v2309_v18  ;;  %v2542_v58 = vadd.f32 %v2487_v30, %v2308_v10 }
 0x263   : > { %v4364_v55 = vpop.f32.mrf.mxu0  ;;  %v2540_v22 = vadd.f32 %v4511_v44, %v2306_v61  ;;  %v4512_v24 = vld [vmem:[#allocation21_spill] sm:$0xff]  ;;  %v2544_v29 = vadd.f32 %v2530_v53, %v2310_v12 }
 0x264   : > { %v4366_v59 = vpop.f32.mrf.mxu1  ;;  %v2545_v46 = vadd.f32 %v4512_v24, %v2311_v62  ;;  %v2549_v30 = vadd.f32 %v4364_v55, %v2315_v35 }
 0x265   : > { %v4368_v0 = vpop.f32.mrf.mxu0  ;;  %v2551_v10 = vadd.f32 %v4366_v59, %v2317_v39 }
 0x266   : > { %v4373_v25 = vpop.f32.mrf.mxu1  ;;  %v4513_v48 = vld [vmem:[#allocation22_spill] sm:$0xff]  ;;  %v2550_v17 = vadd.f32 %v4368_v0, %v2316_v15 }
 0x267   : > { %v2633_v16 = vpop.f32.mrf.mxu0  ;;  %v2548_v49 = vadd.f32 %v4513_v48, %v2314_v4  ;;  %v4514_v34 = vld [vmem:[#allocation7_spill] sm:$0xff]  ;;  %v2552_v24 = vadd.f32 %v4373_v25, %v4385_v20 }
 0x268   : > { %v2771_v11 = vadd.f32 %v2633_v16, %v2537_v23  ;;  %v2676_v40 = vpop.f32.mrf.mxu1  ;;  %v2541_v54 = vadd.f32 %v4514_v34, %v2307_v6 }
 0x269   : > { %v2773_v45 = vadd.f32 %v2676_v40, %v2539_v14  ;;  %v2635_v21 = vpop.f32.mrf.mxu0 }
 0x26a   : > { %v2772_v43 = vadd.f32 %v2635_v21, %v2538_v9  ;;  %v2799_v41 = vadd.f32 %v4378_v19, %v2771_v11  ;;  %v2678_v28 = vpop.f32.mrf.mxu1 }
 0x26b   : > { %v2774_v50 = vadd.f32 %v2678_v28, %v2540_v22  ;;  %v2801_v51 = vadd.f32 %v4378_v19, %v2773_v45  ;;  %v2637_v32 = vpop.f32.mrf.mxu0 }
 0x26c   : > { %v2800_v56 = vadd.f32 %v4378_v19, %v2772_v43  ;;  %v2779_v27 = vadd.f32 %v2637_v32, %v2545_v46  ;;  %v2680_v57 = vpop.f32.mrf.mxu1  ;;  %v2815_v62 = vmax.f32 %v2799_v41, 0.0 }
 0x26d   : > { %v2802_v60 = vadd.f32 %v4378_v19, %v2774_v50  ;;  %v2781_v36 = vadd.f32 %v2680_v57, %v2547_v26  ;;  %v2639_v61 = vpop.f32.mrf.mxu0  ;;  %v2817_v4 = vmax.f32 %v2801_v51, 0.0 }
 0x26e   : > { %v2816_v63 = vmax.f32 %v2800_v56, 0.0  ;;  %v2780_v1 = vadd.f32 %v2639_v61, %v2546_v38  ;;  %v2807_v2 = vadd.f32 %v4394_v52, %v2779_v27  ;;  %v2682_v3 = vpop.f32.mrf.mxu1 }
 0x26f   : > { %v2818_v5 = vmax.f32 %v2802_v60, 0.0  ;;  %v2782_v47 = vadd.f32 %v2682_v3, %v2548_v49  ;;  %v2809_v6 = vadd.f32 %v4394_v52, %v2781_v36  ;;  %v2719_v23 = vpop.f32.mrf.mxu0 }
 0x270   : > { %v3220_v53 = vpack.c.bf16 %v2816_v63, %v2815_v62  ;;  %v2808_v7 = vadd.f32 %v4394_v52, %v2780_v1  ;;  %v2775_v18 = vadd.f32 %v2719_v23, %v2541_v54  ;;  %v2762_v8 = vpop.f32.mrf.mxu1  ;;  %v2823_v33 = vmax.f32 %v2807_v2, 0.0 }
 0x271   : > { %v3221_v31 = vpack.c.bf16 %v2818_v5, %v2817_v4  ;;  %v2810_v12 = vadd.f32 %v4394_v52, %v2782_v47  ;;  %v2777_v14 = vadd.f32 %v2762_v8, %v2543_v42  ;;  %v2721_v16 = vpop.f32.mrf.mxu0  ;;  %v2825_v11 = vmax.f32 %v2809_v6, 0.0 }
 0x272   : > { %2879 = vst [vmem:[%s4406_s24] sm:$0xff] %v3220_v53  ;;  %v2824_v37 = vmax.f32 %v2808_v7, 0.0  ;;  %v2803_v55 = vadd.f32 %v4378_v19, %v2775_v18  ;;  %v2776_v35 = vadd.f32 %v2721_v16, %v2542_v58  ;;  %v2764_v9 = vpop.f32.mrf.mxu1 }
 0x273   : > { %2880 = vst [vmem:[%s4406_s24 + $0x8] sm:$0xff] %v3221_v31  ;;  %v2826_v59 = vmax.f32 %v2810_v12, 0.0  ;;  %v2805_v39 = vadd.f32 %v4378_v19, %v2777_v14  ;;  %v2778_v40 = vadd.f32 %v2764_v9, %v2544_v29  ;;  %v2723_v13 = vpop.f32.mrf.mxu0 }
 0x274   : > { %v3224_v44 = vpack.c.bf16 %v2824_v37, %v2823_v33  ;;  %v2804_v22 = vadd.f32 %v4378_v19, %v2776_v35  ;;  %v2783_v45 = vadd.f32 %v2723_v13, %v2549_v30  ;;  %v2766_v21 = vpop.f32.mrf.mxu1  ;;  %v2819_v28 = vmax.f32 %v2803_v55, 0.0 }
 0x275   : > { %v3225_v46 = vpack.c.bf16 %v2826_v59, %v2825_v11  ;;  %v2806_v26 = vadd.f32 %v4378_v19, %v2778_v40  ;;  %v2785_v43 = vadd.f32 %v2766_v21, %v2551_v10  ;;  %v2725_v41 = vpop.f32.mrf.mxu0  ;;  %v2821_v49 = vmax.f32 %v2805_v39, 0.0 }
 0x276   : > { %2883 = vst [vmem:[%s4406_s24 + $0x20] sm:$0xff] %v3224_v44  ;;  %v2820_v38 = vmax.f32 %v2804_v22, 0.0  ;;  %v2811_v0 = vadd.f32 %v4394_v52, %v2783_v45  ;;  %v2784_v15 = vadd.f32 %v2725_v41, %v2550_v17  ;;  %v2768_v48 = vpop.f32.mrf.mxu1 }
 0x277   : > { %2884 = vst [vmem:[%s4406_s24 + $0x28] sm:$0xff] %v3225_v46  ;;  %v2822_v50 = vmax.f32 %v2806_v26, 0.0  ;;  %v2813_v25 = vadd.f32 %v4394_v52, %v2785_v43  ;;  %v2786_v20 = vadd.f32 %v2768_v48, %v2552_v24 }
 0x278   : > { %v3222_v19 = vpack.c.bf16 %v2820_v38, %v2819_v28  ;;  %v2812_v51 = vadd.f32 %v4394_v52, %v2784_v15  ;;  %v2827_v54 = vmax.f32 %v2811_v0, 0.0 }
 0x279   : > { %v3223_v32 = vpack.c.bf16 %v2822_v50, %v2821_v49  ;;  %v2814_v34 = vadd.f32 %v4394_v52, %v2786_v20  ;;  %v2829_v56 = vmax.f32 %v2813_v25, 0.0  ;;  %v2909_v52 = vld [vmem:[%s4406_s24] sm:$0xff] (%p3683_p8) }
 0x27a   : > { %2881 = vst [vmem:[%s4406_s24 + $0x10] sm:$0xff] %v3222_v19  ;;  %v2828_v42 = vmax.f32 %v2812_v51, 0.0  ;;  %v2911_v29 = vld [vmem:[%s4406_s24 + $0x8] sm:$0xff] (%p3683_p8)  ;;  %2910 = vst [vmem:[%s2896_s11] sm:$0xff] (%p3683_p8), %v2909_v52 }
 0x27b   : > { %2882 = vst [vmem:[%s4406_s24 + $0x18] sm:$0xff] %v3223_v32  ;;  %v2830_v27 = vmax.f32 %v2814_v34, 0.0  ;;  %2893 = sbr.rel (!%p3683_p8) target bundleno = 648 (0x288), region = 147  ;;  %2912 = vst [vmem:[%s2896_s11 + $0x8] sm:$0xff] (%p3683_p8), %v2911_v29 }
 0x27c   : > { %v3226_v57 = vpack.c.bf16 %v2828_v42, %v2827_v54 }
 0x27d   : > { %v3227_v58 = vpack.c.bf16 %v2830_v27, %v2829_v56  ;;  %v2917_v61 = vld [vmem:[%s4406_s24 + $0x20] sm:$0xff] (%p3683_p8) }
 0x27e   : > { %2885 = vst [vmem:[%s4406_s24 + $0x30] sm:$0xff] %v3226_v57  ;;  %v2919_v62 = vld [vmem:[%s4406_s24 + $0x28] sm:$0xff] (%p3683_p8)  ;;  %2918 = vst [vmem:[%s2896_s11 + $0x40] sm:$0xff] (%p3683_p8), %v2917_v61 }
 0x27f   : > { %2886 = vst [vmem:[%s4406_s24 + $0x38] sm:$0xff] %v3227_v58  ;;  %2920 = vst [vmem:[%s2896_s11 + $0x48] sm:$0xff] (%p3683_p8), %v2919_v62 }
 0x281   : > { %v2913_v60 = vld [vmem:[%s4406_s24 + $0x10] sm:$0xff] }
 0x282   : > { %v2915_v36 = vld [vmem:[%s4406_s24 + $0x18] sm:$0xff]  ;;  %2914 = vst [vmem:[%s2896_s11 + $0x10] sm:$0xff] %v2913_v60 }
 0x283   : > { %2916 = vst [vmem:[%s2896_s11 + $0x18] sm:$0xff] %v2915_v36 }
 0x285   : > { %v2921_v63 = vld [vmem:[%s4406_s24 + $0x30] sm:$0xff] }
 0x286   : > { %v2923_v1 = vld [vmem:[%s4406_s24 + $0x38] sm:$0xff]  ;;  %2922 = vst [vmem:[%s2896_s11 + $0x50] sm:$0xff] %v2921_v63 }
 0x287   : > { %2924 = vst [vmem:[%s2896_s11 + $0x58] sm:$0xff] %v2923_v1 }
 0x288 PF: > { %s4516_s17 = sld [smem:[#allocation5_spill]]  ;;  %p11_p8 = scmp.ge.s32.totalorder %s3653_s21, 4  }
 0x289   : > { %s4517_s18 = sld [smem:[#allocation6_spill]]  ;;  %s4518_s15 = smov %s3512_s16 }
 0x28a   : > { %s4519_s16 = smov %s3678_s5  ;;  %s4520_s19 = smov %s3653_s21 }
 0x28b   :  { %13 = sbr.rel (!%p11_p8) target bundleno = 5 (0x5), region = 279 }

// kernel: net_forward.6
= control target key start
LH: loop header
LB: loop body
LE: loop exit
PB: predicated region body
PF: predicated region fallthrough
CT: control target
= control target key end

     0   :  { %s2879_s0 = inlined_call_operand.vmem [shape: bf16[9,32,16], index: 0, kind: input, shape index: {}]   ;;  %s2880_s1 = inlined_call_operand.vmem [shape: f32[32,1], index: 1, kind: input, shape index: {}]   ;;  %s2881_s2 = inlined_call_operand.vmem [shape: bf16[16,640], index: 2, kind: input, shape index: {}, may-alias: {2,3}]   ;;  %s2882_s3 = inlined_call_operand.vmem [shape: bf16[16,640], index: 3, kind: input, shape index: {}, may-alias: {2,3}]   ;;  %s2883_s4 = inlined_call_operand.vmem [shape: bf16[32,512], index: 4, kind: output, shape index: {}]  }
   0x1   :  { %2886 = sst [smem:[#allocation7_spill]] %s2881_s2 }
   0x2   :  { %s2350_s15 = smov 0   ;;  %s2352_s16 = smov 0  }
   0x3   :  { %s2354_s17 = smov 0   ;;  %s2356_s18 = smov 0  }
   0x4   :  { %s2358_s19 = smov 0  }
   0x5 LB: > { %2887 = sst [smem:[#allocation5_spill]] %s2244_s18  ;;  %s2884_s20 = sadd.s32 4294967295, %s2248_s19   ;;  %s2248_s19 = sphi %s2358_s19, %s2907_s19   ;;  %s2244_s18 = sphi %s2356_s18, %s2904_s18   ;;  %s2240_s17 = sphi %s2354_s17, %s2903_s17   ;;  %s2236_s16 = sphi %s2352_s16, %s2906_s16   ;;  %s2232_s15 = sphi %s2350_s15, %s2905_s15  }
   0x6   : > { %s2377_s21 = sadd.s32 1, %s2248_s19   ;;  %s63_s23 = sadd.s32 1, %s2244_s18 }
   0x7   : > { %s60_s22 = ssub.s32 %s2248_s19, %s2377_s21  ;;  %p70_p1 = scmp.ne.s32.totalorder %s2244_s18, %s2240_s17 }
   0x8   : > { %p61_p0 = scmp.eq.s32.totalorder %s60_s22, 0  ;;  %p71_p2 = scmp.eq.s32.totalorder %s2248_s19, 0 }
   0x9   : > { %s1925_s24 = sshll.u32 %s2248_s19, 1  ;;  %s93_s28 = sadd.s32 1, %s2236_s16 }
   0xa   : > { %s2387_s25 = scalar_select %p61_p0, %s2244_s18, %s63_s23  }
   0xb   : > { %p72_p3 = por %p71_p2, %p70_p1  ;;  %s1926_s26 = sadd.s32 2, %s1925_s24 }
   0xc   : > { %2888 = sst [smem:[#allocation6_spill]] %s2387_s25  ;;  %s1928_s27 = sadd.s32 2, %s1926_s26 }
   0xd   : > { %s90_s29 = ssub.s32 %s1926_s26, %s1928_s27  ;;  %p100_p4 = scmp.ne.s32.totalorder %s2236_s16, %s2232_s15 }
   0xe   : > { %p91_p5 = scmp.eq.s32.totalorder %s90_s29, 0  ;;  %p130_p6 = scmp.eq.s32.totalorder %s2884_s20, 1 }
   0xf   : > { %p2397_p7 = por %p100_p4, %p71_p2  ;;  %p1807_p9 = scmp.ge.s32.totalorder %s2248_s19, 2 }
  0x10   : > { %s2402_s5 = scalar_select %p91_p5, %s2236_s16, %s93_s28  }
  0x11   : > { %p2407_p8 = por %p130_p6, %p70_p1  ;;  %158 = sbr.rel (%p1807_p9) target bundleno = 148 (0x94), region = 24 }
  0x16   : > { %161 = sbr.rel (!%p72_p3) target bundleno = 143 (0x8f), region = 28  ;;  %s163_s7 = sand.u32 (%p72_p3), 1, %s2244_s18  }
  0x17   : > { %s167_s8 = ssub.s32 (%p72_p3), 5, %s1925_s24  ;;  %s1808_s9 = sshll.u32 (%p72_p3), %s163_s7, 4 }
  0x18   : > { %p168_p10 = scmp.lt.s32.totalorder (%p72_p3), %s167_s8, 2  ;;  %s1929_s10 = sshll.u32 (%p72_p3), %s2248_s19, 3 }
  0x19   : > { %s2891_s2 = sld [smem:[#allocation7_spill]] (%p72_p3)  ;;  %s2421_s23 = scalar_lea.vmem (%p72_p3), [#allocation2], %s1808_s9  }
  0x1b   : > { %s2909_s8 = smov (!%p168_p10, %s167_s8), 2 }
  0x1c   : > { %s1810_s14 = sshll.u32 %s2909_s8, 7  ;;  %s2419_s22 = sshll.u32 %s2909_s8, 2 }
  0x1d   : > { %p1814_p11 = scmp.eq.s32.totalorder %s1810_s14, 0 }
  0x1e   : > { %p178_p12 = scmp.lt.u32.totalorder (!%p1814_p11), %s2419_s22, 8 }
  0x1f   : > { %s2417_s13 = scalar_lea.vmem %s2891_s2, %s1929_s10   ;;  %177 = sbr.rel (%p1814_p11) target bundleno = 143 (0x8f), region = 32 }
  0x24   : > { %181 = sbr.rel (%p178_p12) target bundleno = 134 (0x86), region = 36  ;;  %s2425_s24 = sand.u32 (!%p178_p12), 7, %s2419_s22  }
  0x25   : > { %p200_p13 = scmp.eq.s32.totalorder (!%p178_p12), %s2425_s24, 0  ;;  %p1815_p0 = scmp.ne.s32.totalorder (!%p178_p12), %s2425_s24, 0 }
  0x29   : > { %203 = sbr.rel (%p1815_p0) target bundleno = 85 (0x55), region = 51  ;;  %s204_s26 = sshrl.u32 (!%p1815_p0), %s2419_s22, 3 }
  0x2a   : > { %s2432_s27 = sshrl.u32 (!%p1815_p0), %s204_s26, 5 }
  0x2b   : > { %p1816_p1 = scmp.le.s32.totalorder (!%p1815_p0), %s2432_s27, 0 }
  0x2e   : > { %1725 = sbr.rel (%p1816_p1) target bundleno = 69 (0x45), region = 244  ;;  %s2892_s28 = smov (!%p1816_p1), %s2421_s23 }
  0x2f   : > { %s2893_s29 = smov (!%p1816_p1), %s2417_s13  ;;  %s2441_s7 = smov (!%p1816_p1), 0  }
  0x30   : > { %s2443_s8 = smov (!%p1816_p1), 0  }
  0x33 LB: >> { %v217_v0 = vld [vmem:[%s2256_s29] sm:$0xff]  ;;  %v281_v1 = vld [vmem:[%s2256_s29 + $0x14] sm:$0xff]  ;;  %v287_v4 = vld [vmem:[%s2256_s29 + $0x2c] sm:$0xff]  ;;  %s345_s9 = sadd.s32 1, %s2260_s7  ;;  %s211_s8 = sadd.s32 1, %s2264_s8   ;;  %s2264_s8 = sphi %s2443_s8, %s211_s8   ;;  %s2260_s7 = sphi %s2441_s7, %s2896_s7   ;;  %s2256_s29 = sphi %s2893_s29, %s2895_s29   ;;  %s2252_s28 = sphi %s2892_s28, %s2894_s28  }
  0x34   : >> { %v283_v2 = vld [vmem:[%s2256_s29 + $0x1c] sm:$0xff]  ;;  %218 = vst [vmem:[%s2252_s28] sm:$0xff] %v217_v0  ;;  %282 = vst [vmem:[%s2252_s28 + $0x8] sm:$0xff] %v281_v1  ;;  %v285_v3 = vld [vmem:[%s2256_s29 + $0x24] sm:$0xff]  ;;  %p346_p2 = scmp.ge.s32.totalorder %s345_s9, %s2432_s27  ;;  %p210_p3 = scmp.ge.s32.totalorder %s211_s8, %s2432_s27 }
  0x35   : >> { %284 = vst [vmem:[%s2252_s28 + $0x10] sm:$0xff] %v283_v2  ;;  %v289_v5 = vld [vmem:[%s2256_s29 + $0x34] sm:$0xff]  ;;  %286 = vst [vmem:[%s2252_s28 + $0x18] sm:$0xff] %v285_v3  ;;  %v291_v6 = vld [vmem:[%s2256_s29 + $0x3c] sm:$0xff] }
  0x36   : >> { %288 = vst [vmem:[%s2252_s28 + $0x20] sm:$0xff] %v287_v4  ;;  %290 = vst [vmem:[%s2252_s28 + $0x28] sm:$0xff] %v289_v5  ;;  %v293_v7 = vld [vmem:[%s2256_s29 + $0x44] sm:$0xff]  ;;  %v295_v8 = vld [vmem:[%s2256_s29 + $0x4c] sm:$0xff]  ;;  %s2911_s9 = smov (%p346_p2, %s345_s9), 0 }
  0x37   : >> { %292 = vst [vmem:[%s2252_s28 + $0x30] sm:$0xff] %v291_v6  ;;  %294 = vst [vmem:[%s2252_s28 + $0x38] sm:$0xff] %v293_v7  ;;  %v297_v9 = vld [vmem:[%s2256_s29 + $0x54] sm:$0xff]  ;;  %v299_v10 = vld [vmem:[%s2256_s29 + $0x5c] sm:$0xff]  ;;  %s1817_s10 = sshll.u32 %s2911_s9, 8  ;;  %s2896_s7 = smov %s2911_s9 }
  0x38   : >> { %296 = vst [vmem:[%s2252_s28 + $0x40] sm:$0xff] %v295_v8  ;;  %v301_v11 = vld [vmem:[%s2256_s29 + $0x64] sm:$0xff]  ;;  %298 = vst [vmem:[%s2252_s28 + $0x48] sm:$0xff] %v297_v9  ;;  %v303_v12 = vld [vmem:[%s2256_s29 + $0x6c] sm:$0xff]  ;;  %s350_s11 = scalar_lea.vmem %s2417_s13, %s1817_s10   ;;  %s351_s12 = scalar_lea.vmem %s2421_s23, %s1817_s10 [#allocation2]  }
  0x39   : >> { %300 = vst [vmem:[%s2252_s28 + $0x50] sm:$0xff] %v299_v10  ;;  %302 = vst [vmem:[%s2252_s28 + $0x58] sm:$0xff] %v301_v11  ;;  %v305_v13 = vld [vmem:[%s2256_s29 + $0x74] sm:$0xff]  ;;  %v307_v14 = vld [vmem:[%s2256_s29 + $0x7c] sm:$0xff] }
  0x3a   : >> { %304 = vst [vmem:[%s2252_s28 + $0x60] sm:$0xff] %v303_v12  ;;  %306 = vst [vmem:[%s2252_s28 + $0x68] sm:$0xff] %v305_v13  ;;  %v309_v15 = vld [vmem:[%s2256_s29 + $0x84] sm:$0xff]  ;;  %v311_v16 = vld [vmem:[%s2256_s29 + $0x8c] sm:$0xff] }
  0x3b   : >> { %308 = vst [vmem:[%s2252_s28 + $0x70] sm:$0xff] %v307_v14  ;;  %v313_v17 = vld [vmem:[%s2256_s29 + $0x94] sm:$0xff]  ;;  %310 = vst [vmem:[%s2252_s28 + $0x78] sm:$0xff] %v309_v15  ;;  %v315_v18 = vld [vmem:[%s2256_s29 + $0x9c] sm:$0xff] }
  0x3c   : >> { %312 = vst [vmem:[%s2252_s28 + $0x80] sm:$0xff] %v311_v16  ;;  %314 = vst [vmem:[%s2252_s28 + $0x88] sm:$0xff] %v313_v17  ;;  %v317_v19 = vld [vmem:[%s2256_s29 + $0xa4] sm:$0xff]  ;;  %v319_v20 = vld [vmem:[%s2256_s29 + $0xac] sm:$0xff] }
  0x3d   : >> { %316 = vst [vmem:[%s2252_s28 + $0x90] sm:$0xff] %v315_v18  ;;  %318 = vst [vmem:[%s2252_s28 + $0x98] sm:$0xff] %v317_v19  ;;  %v321_v21 = vld [vmem:[%s2256_s29 + $0xb4] sm:$0xff]  ;;  %v323_v22 = vld [vmem:[%s2256_s29 + $0xbc] sm:$0xff] }
  0x3e   : >> { %320 = vst [vmem:[%s2252_s28 + $0xa0] sm:$0xff] %v319_v20  ;;  %v325_v23 = vld [vmem:[%s2256_s29 + $0xc4] sm:$0xff]  ;;  %322 = vst [vmem:[%s2252_s28 + $0xa8] sm:$0xff] %v321_v21  ;;  %v327_v24 = vld [vmem:[%s2256_s29 + $0xcc] sm:$0xff] }
  0x3f   : >> { %324 = vst [vmem:[%s2252_s28 + $0xb0] sm:$0xff] %v323_v22  ;;  %326 = vst [vmem:[%s2252_s28 + $0xb8] sm:$0xff] %v325_v23  ;;  %v329_v25 = vld [vmem:[%s2256_s29 + $0xd4] sm:$0xff]  ;;  %v331_v26 = vld [vmem:[%s2256_s29 + $0xdc] sm:$0xff] }
  0x40   : >> { %328 = vst [vmem:[%s2252_s28 + $0xc0] sm:$0xff] %v327_v24  ;;  %330 = vst [vmem:[%s2252_s28 + $0xc8] sm:$0xff] %v329_v25  ;;  %v333_v27 = vld [vmem:[%s2256_s29 + $0xe4] sm:$0xff]  ;;  %v335_v28 = vld [vmem:[%s2256_s29 + $0xec] sm:$0xff]  ;;  %213 = sbr.rel (!%p210_p3) target bundleno = 51 (0x33), region = 250 }
  0x41   : >> { %332 = vst [vmem:[%s2252_s28 + $0xd0] sm:$0xff] %v331_v26  ;;  %v337_v29 = vld [vmem:[%s2256_s29 + $0xf4] sm:$0xff]  ;;  %334 = vst [vmem:[%s2252_s28 + $0xd8] sm:$0xff] %v333_v27  ;;  %v339_v30 = vld [vmem:[%s2256_s29 + $0xfc] sm:$0xff] }
  0x42   : >> { %336 = vst [vmem:[%s2252_s28 + $0xe0] sm:$0xff] %v335_v28  ;;  %338 = vst [vmem:[%s2252_s28 + $0xe8] sm:$0xff] %v337_v29  ;;  %v341_v31 = vld [vmem:[%s2256_s29 + $0x104] sm:$0xff]  ;;  %v343_v32 = vld [vmem:[%s2256_s29 + $0x10c] sm:$0xff]  ;;  %s2895_s29 = smov %s350_s11 }
  0x43   : >> { %340 = vst [vmem:[%s2252_s28 + $0xf0] sm:$0xff] %v339_v30  ;;  %342 = vst [vmem:[%s2252_s28 + $0xf8] sm:$0xff] %v341_v31 }
  0x44   : >> { %344 = vst [vmem:[%s2252_s28 + $0x100] sm:$0xff] %v343_v32  ;;  %s2894_s28 = smov %s351_s12 }
  0x45 PF: > { %s2543_s14 = sand.u32 31, %s204_s26   ;;  %s1930_s10 = sshll.u32 %s2432_s27, 12 }
  0x46   : > { %s356_s20 = sshra.s32 %s1930_s10, 4  ;;  %p1822_p4 = scmp.le.s32.totalorder %s2543_s14, 0 }
  0x47   : > { %s2547_s2 = scalar_lea.vmem %s2417_s13, %s356_s20   ;;  %s360_s12 = scalar_lea.vmem %s2421_s23, %s356_s20 [#allocation2]  }
  0x48   : > { %1739 = sbr.rel (%p1822_p4) target bundleno = 85 (0x55), region = 255  ;;  %s2266_s9 = smov (!%p1822_p4), %s360_s12  }
  0x49   : > { %s2270_s8 = smov (!%p1822_p4), %s2547_s2   ;;  %s2274_s11 = smov (!%p1822_p4), 0  }
  0x4a   : > { %s2278_s28 = smov (!%p1822_p4), 0  }
  0x4d LB: >> { %v372_v33 = vld [vmem:[%s2272_s8] sm:$0xff]  ;;  %v374_v34 = vld [vmem:[%s2272_s8 + $0x14] sm:$0xff]  ;;  %s376_s26 = sadd.s32 1, %s2276_s11  ;;  %s366_s28 = sadd.s32 1, %s2280_s28   ;;  %s2280_s28 = sphi %s2278_s28, %s366_s28   ;;  %s2276_s11 = sphi %s2274_s11, %s2275_s11   ;;  %s2272_s8 = sphi %s2270_s8, %s381_s8   ;;  %s2268_s9 = sphi %s2266_s9, %s382_s9  }
  0x4e   : >> { %373 = vst [vmem:[%s2268_s9] sm:$0xff] %v372_v33  ;;  %375 = vst [vmem:[%s2268_s9 + $0x8] sm:$0xff] %v374_v34  ;;  %p377_p5 = scmp.ge.s32.totalorder %s376_s26, %s2543_s14  ;;  %p365_p6 = scmp.ge.s32.totalorder %s366_s28, %s2543_s14 }
  0x50   : >> { %s2913_s26 = smov (%p377_p5, %s376_s26), 0  ;;  %368 = sbr.rel (!%p365_p6) target bundleno = 77 (0x4d), region = 261 }
  0x51   : >> { %s1823_s20 = sshll.u32 %s2913_s26, 3  ;;  %s2275_s11 = smov %s2913_s26  }
  0x52   : >> { %s381_s8 = scalar_lea.vmem %s2547_s2, %s1823_s20   ;;  %s382_s9 = scalar_lea.vmem %s360_s12, %s1823_s20 [#allocation2]  }
  0x55 PF: > { %385 = sbr.rel (%p200_p13) target bundleno = 134 (0x86), region = 69  ;;  %s387_s27 = ssub.s32 (!%p200_p13), %s2419_s22, %s2425_s24 }
  0x56   : > { %s391_s29 = sshrl.u32 (!%p200_p13), %s2419_s22, 3  ;;  %s2561_s7 = scalar_lea.vmem (!%p200_p13), %s2417_s13, %s387_s27 }
  0x57   : > { %s2564_s10 = scalar_lea.vmem (!%p200_p13), %s2421_s23, %s387_s27 [#allocation2]  ;;  %s2568_s9 = sshrl.u32 (!%p200_p13), %s391_s29, 5 }
  0x58   : > { %p1825_p9 = scmp.le.s32.totalorder (!%p200_p13), %s2568_s9, 0 }
  0x5a   : > { %1753 = sbr.rel (%p1825_p9) target bundleno = 113 (0x71), region = 266  ;;  %s2897_s2 = smov (!%p1825_p9), %s2421_s23 }
  0x5b   : > { %s2898_s14 = smov (!%p1825_p9), %s2417_s13  ;;  %s2577_s12 = smov (!%p1825_p9), 0  }
  0x5c   : > { %s2579_s8 = smov (!%p1825_p9), 0  }
  0x5f LB: >> { %v404_v35 = vld [vmem:[%s2288_s14] sm:$0xff]  ;;  %v468_v36 = vld [vmem:[%s2288_s14 + $0x14] sm:$0xff]  ;;  %v474_v39 = vld [vmem:[%s2288_s14 + $0x2c] sm:$0xff]  ;;  %s532_s11 = sadd.s32 1, %s2292_s12  ;;  %s398_s8 = sadd.s32 1, %s2296_s8   ;;  %s2296_s8 = sphi %s2579_s8, %s398_s8   ;;  %s2292_s12 = sphi %s2577_s12, %s2901_s12   ;;  %s2288_s14 = sphi %s2898_s14, %s2900_s14   ;;  %s2284_s2 = sphi %s2897_s2, %s2899_s2  }
  0x60   : >> { %v470_v37 = vld [vmem:[%s2288_s14 + $0x1c] sm:$0xff]  ;;  %405 = vst [vmem:[%s2284_s2] sm:$0xff] %v404_v35  ;;  %469 = vst [vmem:[%s2284_s2 + $0x8] sm:$0xff] %v468_v36  ;;  %v472_v38 = vld [vmem:[%s2288_s14 + $0x24] sm:$0xff]  ;;  %p533_p10 = scmp.ge.s32.totalorder %s532_s11, %s2568_s9  ;;  %p397_p11 = scmp.ge.s32.totalorder %s398_s8, %s2568_s9 }
  0x61   : >> { %471 = vst [vmem:[%s2284_s2 + $0x10] sm:$0xff] %v470_v37  ;;  %v476_v40 = vld [vmem:[%s2288_s14 + $0x34] sm:$0xff]  ;;  %473 = vst [vmem:[%s2284_s2 + $0x18] sm:$0xff] %v472_v38  ;;  %v478_v41 = vld [vmem:[%s2288_s14 + $0x3c] sm:$0xff] }
  0x62   : >> { %475 = vst [vmem:[%s2284_s2 + $0x20] sm:$0xff] %v474_v39  ;;  %477 = vst [vmem:[%s2284_s2 + $0x28] sm:$0xff] %v476_v40  ;;  %v480_v42 = vld [vmem:[%s2288_s14 + $0x44] sm:$0xff]  ;;  %v482_v43 = vld [vmem:[%s2288_s14 + $0x4c] sm:$0xff]  ;;  %s2915_s11 = smov (%p533_p10, %s532_s11), 0 }
  0x63   : >> { %479 = vst [vmem:[%s2284_s2 + $0x30] sm:$0xff] %v478_v41  ;;  %481 = vst [vmem:[%s2284_s2 + $0x38] sm:$0xff] %v480_v42  ;;  %v484_v44 = vld [vmem:[%s2288_s14 + $0x54] sm:$0xff]  ;;  %v486_v45 = vld [vmem:[%s2288_s14 + $0x5c] sm:$0xff]  ;;  %s1826_s28 = sshll.u32 %s2915_s11, 8  ;;  %s2901_s12 = smov %s2915_s11 }
  0x64   : >> { %483 = vst [vmem:[%s2284_s2 + $0x40] sm:$0xff] %v482_v43  ;;  %v488_v46 = vld [vmem:[%s2288_s14 + $0x64] sm:$0xff]  ;;  %485 = vst [vmem:[%s2284_s2 + $0x48] sm:$0xff] %v484_v44  ;;  %v490_v47 = vld [vmem:[%s2288_s14 + $0x6c] sm:$0xff]  ;;  %s537_s26 = scalar_lea.vmem %s2417_s13, %s1826_s28   ;;  %s538_s20 = scalar_lea.vmem %s2421_s23, %s1826_s28 [#allocation2]  }
  0x65   : >> { %487 = vst [vmem:[%s2284_s2 + $0x50] sm:$0xff] %v486_v45  ;;  %489 = vst [vmem:[%s2284_s2 + $0x58] sm:$0xff] %v488_v46  ;;  %v492_v48 = vld [vmem:[%s2288_s14 + $0x74] sm:$0xff]  ;;  %v494_v49 = vld [vmem:[%s2288_s14 + $0x7c] sm:$0xff] }
  0x66   : >> { %491 = vst [vmem:[%s2284_s2 + $0x60] sm:$0xff] %v490_v47  ;;  %493 = vst [vmem:[%s2284_s2 + $0x68] sm:$0xff] %v492_v48  ;;  %v496_v50 = vld [vmem:[%s2288_s14 + $0x84] sm:$0xff]  ;;  %v498_v51 = vld [vmem:[%s2288_s14 + $0x8c] sm:$0xff] }
  0x67   : >> { %495 = vst [vmem:[%s2284_s2 + $0x70] sm:$0xff] %v494_v49  ;;  %v500_v52 = vld [vmem:[%s2288_s14 + $0x94] sm:$0xff]  ;;  %497 = vst [vmem:[%s2284_s2 + $0x78] sm:$0xff] %v496_v50  ;;  %v502_v53 = vld [vmem:[%s2288_s14 + $0x9c] sm:$0xff] }
  0x68   : >> { %499 = vst [vmem:[%s2284_s2 + $0x80] sm:$0xff] %v498_v51  ;;  %501 = vst [vmem:[%s2284_s2 + $0x88] sm:$0xff] %v500_v52  ;;  %v504_v54 = vld [vmem:[%s2288_s14 + $0xa4] sm:$0xff]  ;;  %v506_v55 = vld [vmem:[%s2288_s14 + $0xac] sm:$0xff] }
  0x69   : >> { %503 = vst [vmem:[%s2284_s2 + $0x90] sm:$0xff] %v502_v53  ;;  %505 = vst [vmem:[%s2284_s2 + $0x98] sm:$0xff] %v504_v54  ;;  %v508_v56 = vld [vmem:[%s2288_s14 + $0xb4] sm:$0xff]  ;;  %v510_v57 = vld [vmem:[%s2288_s14 + $0xbc] sm:$0xff] }
  0x6a   : >> { %507 = vst [vmem:[%s2284_s2 + $0xa0] sm:$0xff] %v506_v55  ;;  %v512_v58 = vld [vmem:[%s2288_s14 + $0xc4] sm:$0xff]  ;;  %509 = vst [vmem:[%s2284_s2 + $0xa8] sm:$0xff] %v508_v56  ;;  %v514_v59 = vld [vmem:[%s2288_s14 + $0xcc] sm:$0xff] }
  0x6b   : >> { %511 = vst [vmem:[%s2284_s2 + $0xb0] sm:$0xff] %v510_v57  ;;  %513 = vst [vmem:[%s2284_s2 + $0xb8] sm:$0xff] %v512_v58  ;;  %v516_v60 = vld [vmem:[%s2288_s14 + $0xd4] sm:$0xff]  ;;  %v518_v61 = vld [vmem:[%s2288_s14 + $0xdc] sm:$0xff] }
  0x6c   : >> { %515 = vst [vmem:[%s2284_s2 + $0xc0] sm:$0xff] %v514_v59  ;;  %517 = vst [vmem:[%s2284_s2 + $0xc8] sm:$0xff] %v516_v60  ;;  %v520_v62 = vld [vmem:[%s2288_s14 + $0xe4] sm:$0xff]  ;;  %v522_v63 = vld [vmem:[%s2288_s14 + $0xec] sm:$0xff]  ;;  %400 = sbr.rel (!%p397_p11) target bundleno = 95 (0x5f), region = 272 }
  0x6d   : >> { %519 = vst [vmem:[%s2284_s2 + $0xd0] sm:$0xff] %v518_v61  ;;  %v524_v0 = vld [vmem:[%s2288_s14 + $0xf4] sm:$0xff]  ;;  %521 = vst [vmem:[%s2284_s2 + $0xd8] sm:$0xff] %v520_v62  ;;  %v526_v1 = vld [vmem:[%s2288_s14 + $0xfc] sm:$0xff] }
  0x6e   : >> { %523 = vst [vmem:[%s2284_s2 + $0xe0] sm:$0xff] %v522_v63  ;;  %525 = vst [vmem:[%s2284_s2 + $0xe8] sm:$0xff] %v524_v0  ;;  %v528_v2 = vld [vmem:[%s2288_s14 + $0x104] sm:$0xff]  ;;  %v530_v3 = vld [vmem:[%s2288_s14 + $0x10c] sm:$0xff]  ;;  %s2900_s14 = smov %s537_s26 }
  0x6f   : >> { %527 = vst [vmem:[%s2284_s2 + $0xf0] sm:$0xff] %v526_v1  ;;  %529 = vst [vmem:[%s2284_s2 + $0xf8] sm:$0xff] %v528_v2 }
  0x70   : >> { %531 = vst [vmem:[%s2284_s2 + $0x100] sm:$0xff] %v530_v3  ;;  %s2899_s2 = smov %s538_s20 }
  0x71 PF: > { %s2679_s27 = sand.u32 31, %s391_s29   ;;  %s1932_s28 = sshll.u32 %s2568_s9, 12 }
  0x72   : > { %s543_s25 = sshra.s32 %s1932_s28, 4  ;;  %p1831_p12 = scmp.le.s32.totalorder %s2679_s27, 0 }
  0x73   : > { %s2683_s18 = scalar_lea.vmem %s2417_s13, %s543_s25   ;;  %s547_s20 = scalar_lea.vmem %s2421_s23, %s543_s25 [#allocation2]  }
  0x74   : > { %1767 = sbr.rel (%p1831_p12) target bundleno = 129 (0x81), region = 277  ;;  %s2298_s11 = smov (!%p1831_p12), %s547_s20  }
  0x75   : > { %s2302_s8 = smov (!%p1831_p12), %s2683_s18   ;;  %s2306_s26 = smov (!%p1831_p12), 0  }
  0x76   : > { %s2310_s2 = smov (!%p1831_p12), 0  }
  0x79 LB: >> { %v559_v4 = vld [vmem:[%s2304_s8] sm:$0xff]  ;;  %v561_v5 = vld [vmem:[%s2304_s8 + $0x14] sm:$0xff]  ;;  %s563_s29 = sadd.s32 1, %s2308_s26  ;;  %s553_s2 = sadd.s32 1, %s2312_s2   ;;  %s2312_s2 = sphi %s2310_s2, %s553_s2   ;;  %s2308_s26 = sphi %s2306_s26, %s2307_s26   ;;  %s2304_s8 = sphi %s2302_s8, %s568_s8   ;;  %s2300_s11 = sphi %s2298_s11, %s569_s11  }
  0x7a   : >> { %560 = vst [vmem:[%s2300_s11] sm:$0xff] %v559_v4  ;;  %562 = vst [vmem:[%s2300_s11 + $0x8] sm:$0xff] %v561_v5  ;;  %p564_p13 = scmp.ge.s32.totalorder %s563_s29, %s2679_s27  ;;  %p552_p0 = scmp.ge.s32.totalorder %s553_s2, %s2679_s27 }
  0x7c   : >> { %s2917_s29 = smov (%p564_p13, %s563_s29), 0  ;;  %555 = sbr.rel (!%p552_p0) target bundleno = 121 (0x79), region = 283 }
  0x7d   : >> { %s1832_s25 = sshll.u32 %s2917_s29, 3  ;;  %s2307_s26 = smov %s2917_s29  }
  0x7e   : >> { %s568_s8 = scalar_lea.vmem %s2683_s18, %s1832_s25   ;;  %s569_s11 = scalar_lea.vmem %s547_s20, %s1832_s25 [#allocation2]  }
  0x81 PF: > { %s2314_s9 = smov 1  }
  0x82   : > { %s570_s14 = sshll.u32 %s2314_s9, %s2425_s24 }
  0x83   : > { %s1834_s12 = sadd.s32 4294967295, %s570_s14 }
  0x84   : > { %v580_v6 = vld [vmem:[%s2561_s7] sm:%s1834_s12]  ;;  %v582_v7 = vld [vmem:[%s2561_s7 + $0x14] sm:%s1834_s12] }
  0x85   : > { %581 = vst [vmem:[%s2564_s10] sm:%s1834_s12] %v580_v6  ;;  %583 = vst [vmem:[%s2564_s10 + $0x8] sm:%s1834_s12] %v582_v7 }
  0x86 PF: > { %p1835_p1 = scmp.ge.u32.totalorder %s2419_s22, 8 }
  0x87   : > { %s2315_s28 = smov (!%p1835_p1), 1  }
  0x88   : > { %184 = sbr.rel (%p1835_p1) target bundleno = 143 (0x8f), region = 40  ;;  %s185_s18 = sshll.u32 (!%p1835_p1), %s2315_s28, %s2419_s22 }
  0x89   : > { %s1836_s27 = sadd.s32 (!%p1835_p1), 4294967295, %s185_s18 }
  0x8d   : > { %v195_v8 = vld [vmem:[%s2417_s13] sm:%s1836_s27]  ;;  %v197_v9 = vld [vmem:[%s2417_s13 + $0x14] sm:%s1836_s27] }
  0x8e   : > { %196 = vst [vmem:[%s2421_s23] sm:%s1836_s27] %v195_v8  ;;  %198 = vst [vmem:[%s2421_s23 + $0x8] sm:%s1836_s27] %v197_v9 }
  0x8f PF: > { %587 = sbr.rel (!%p2397_p7) target bundleno = 148 (0x94), region = 94  ;;  %s589_s24 = sand.u32 (%p2397_p7), 1, %s2236_s16  }
  0x90   : > { %s1838_s7 = sshll.u32 (%p2397_p7), %s2248_s19, 3  ;;  %s1837_s10 = sshll.u32 (%p2397_p7), %s589_s24, 3 }
  0x91   : > { %s1686_s22 = scalar_lea.vmem (%p2397_p7), %s2882_s3, %s1838_s7  ;;  %s591_s13 = scalar_lea.vmem (%p2397_p7), [#allocation3], %s1837_s10 }
  0x92   : > { %v1839_v10 = vld [vmem:[%s1686_s22 + $0x8] sm:$0xf] (%p2397_p7)  ;;  %v1840_v11 = vld [vmem:[%s1686_s22 + $0x1c] sm:$0xf] (%p2397_p7) }
  0x93   : > { %613 = vst [vmem:[%s591_s13] sm:$0xf] (%p2397_p7), %v1839_v10  ;;  %615 = vst [vmem:[%s591_s13 + $0x4] sm:$0xf] (%p2397_p7), %v1840_v11 }
  0x94 PF: > { %p1841_p2 = scmp.ge.s32.totalorder %s2248_s19, 1  ;;  %p642_p7 = scmp.lt.s32.totalorder %s2248_s19, 3 }
  0x96   : > { %p643_p3 = pnand %p1841_p2, %p642_p7 }
  0x97   : > { %s649_s30 = sand.u32 (!%p643_p3), 1, %s2240_s17   ;;  %s656_s8 = sand.u32 (!%p643_p3), 1, %s2232_s15  }
  0x98   : > { %646 = sbr.rel (%p643_p3) target bundleno = 566 (0x236), region = 135  ;;  %s1842_s23 = sshll.u32 (!%p643_p3), %s649_s30, 4 }
  0x99   : > { %s1843_s26 = sshll.u32 (!%p643_p3), %s656_s8, 3  ;;  %s651_s2 = scalar_lea.vmem (!%p643_p3), [#allocation2], %s1842_s23 }
  0x9a   : > { %s658_s29 = scalar_lea.vmem (!%p643_p3), [#allocation3], %s1843_s26  ;;  %s2317_s25 = smov (!%p643_p3), 127  }
  0x9b   : > { %s2318_s15 = smov (!%p643_p3), 126   ;;  %s2319_s9 = smov (!%p643_p3), 114  }
  0x9c   : > { %s2320_s14 = smov (!%p643_p3), 113   ;;  %s2321_s12 = smov (!%p643_p3), 112  }
  0x9d   : > { %v2316_v12 = vmov 0   ;;  %v2124_v13 = vld [vmem:[%s651_s2 + $0x4] ss:$8 sps:$4 sm:$0xff]   ;;  %v2719_v14 = vld [vmem:[%s651_s2] ss:$8 sps:$4 sm:$0xff]   ;;  %s2322_s28 = smov 100  }
  0x9e   : > { %781 = vmatprep.mubr.bf16.mxu0 %v2316_v12  ;;  %791 = vmatprep.mubr.bf16.mxu1 %v2316_v12  ;;  %v2127_v15 = vld [vmem:[%s658_s29] sm:$0xff]   ;;  %s2323_s18 = smov 99   ;;  %s2324_s27 = smov 98   ;;  %v1524_v18 = vld [vmem:[%s2880_s1 + $0x10] sm:$0xff]  ;;  %v1525_v19 = vld [vmem:[%s2880_s1 + $0x18] sm:$0xff]  ;;  %vm737_vm0 = vcmask 1039360  }
  0x9f   : > { %2122 = vset.pattern.permute.xlu0 %v2316_v12  ;;  %2123 = vset.pattern.permute.xlu1 %v2316_v12  ;;  %v1522_v16 = vld [vmem:[%s2880_s1] sm:$0xff]  ;;  %v1523_v17 = vld [vmem:[%s2880_s1 + $0x8] sm:$0xff]  ;;  %vm892_vm1 = vcmask 1031168   ;;  %v2128_v26 = vld [vmem:[%s2879_s0 + $0x10] sm:$0xff]   ;;  %vm742_vm2 = vcmask 130048   ;;  %vm985_vm3 = vcmask 932864  }
  0xa0   : > { %733 = vrot.lane.b32.xlu0 %v2124_v13, %s2317_s25  ;;  %731 = vrot.lane.b32.xlu1 %v2719_v14, %s2317_s25  ;;  %v2129_v27 = vld [vmem:[%s2879_s0 + $0x18] sm:$0xff]   ;;  %v2130_v35 = vld [vmem:[%s2879_s0] sm:$0xff]   ;;  %vm1078_vm4 = vcmask 924672   ;;  %vm1171_vm5 = vcmask 916480   ;;  %vm1264_vm6 = vcmask 818176   ;;  %vm1357_vm7 = vcmask 809984  }
  0xa1   : > { %v2131_v36 = vld [vmem:[%s2879_s0 + $0x20] sm:$0xff]   ;;  %v2132_v44 = vld [vmem:[%s2879_s0 + $0x8] sm:$0xff]   ;;  %v2134_v51 = vld [vmem:[%s2879_s0 + $0x30] sm:$0xff]   ;;  %vm1450_vm8 = vcmask 801792   ;;  %s1844_s11 = sshll.u32 %s649_s30, 5  ;;  %s2902_s30 = sadd.s32 (%p2407_p8), 4294967295, %s2248_s19  }
  0xa2   : > { %v2133_v45 = vld [vmem:[%s2879_s0 + $0x28] sm:$0xff]   ;;  %v2135_v52 = vld [vmem:[%s2879_s0 + $0x40] sm:$0xff]   ;;  %v2136_v60 = vld [vmem:[%s2879_s0 + $0x38] sm:$0xff]   ;;  %s2846_s17 = scalar_lea.vmem [#allocation4], %s1844_s11  ;;  %s1938_s22 = sshll.u32 (%p2407_p8), %s2902_s30, 3 }
  0xa3   : > { %v2137_v61 = vld [vmem:[%s2879_s0 + $0x48] sm:$0xff]   ;;  %v2138_v4 = vld [vmem:[%s2879_s0 + $0x50] sm:$0xff]   ;;  %v2139_v5 = vld [vmem:[%s2879_s0 + $0x60] sm:$0xff]   ;;  %s1599_s8 = scalar_lea.vmem (%p2407_p8), %s2883_s4, %s1938_s22 }
  0xa4   : > { %735 = vrot.lane.b32.xlu0 %v2127_v15, %s2317_s25  ;;  %888 = vrot.lane.b32.xlu1 %v2124_v13, %s2318_s15  ;;  %v2140_v8 = vld [vmem:[%s2879_s0 + $0x58] sm:$0xff]   ;;  %v2141_v9 = vld [vmem:[%s2879_s0 + $0x68] sm:$0xff]  }
  0xa5   : > { %v2142_v10 = vld [vmem:[%s2879_s0 + $0x70] sm:$0xff]   ;;  %v2143_v11 = vld [vmem:[%s2879_s0 + $0x80] sm:$0xff]  }
  0xa8   : > { %890 = vrot.lane.b32.xlu0 %v2127_v15, %s2318_s15  ;;  %886 = vrot.lane.b32.xlu1 %v2719_v14, %s2318_s15 }
  0xac   : > { %981 = vrot.lane.b32.xlu0 %v2124_v13, %s2319_s9  ;;  %983 = vrot.lane.b32.xlu1 %v2127_v15, %s2319_s9 }
  0xb0   : > { %979 = vrot.lane.b32.xlu0 %v2719_v14, %s2319_s9  ;;  %1074 = vrot.lane.b32.xlu1 %v2124_v13, %s2320_s14 }
  0xb4   : > { %1076 = vrot.lane.b32.xlu0 %v2127_v15, %s2320_s14  ;;  %1072 = vrot.lane.b32.xlu1 %v2719_v14, %s2320_s14 }
  0xb8   : > { %1167 = vrot.lane.b32.xlu0 %v2124_v13, %s2321_s12  ;;  %1169 = vrot.lane.b32.xlu1 %v2127_v15, %s2321_s12 }
  0xbc   : > { %1165 = vrot.lane.b32.xlu0 %v2719_v14, %s2321_s12  ;;  %1260 = vrot.lane.b32.xlu1 %v2124_v13, %s2322_s28 }
  0xc0   : > { %1262 = vrot.lane.b32.xlu0 %v2127_v15, %s2322_s28  ;;  %1258 = vrot.lane.b32.xlu1 %v2719_v14, %s2322_s28 }
  0xc4   : > { %1353 = vrot.lane.b32.xlu0 %v2124_v13, %s2323_s18  ;;  %1355 = vrot.lane.b32.xlu1 %v2127_v15, %s2323_s18 }
  0xc8   : > { %1351 = vrot.lane.b32.xlu0 %v2719_v14, %s2323_s18  ;;  %1446 = vrot.lane.b32.xlu1 %v2124_v13, %s2324_s27 }
  0xcc   : > { %1448 = vrot.lane.b32.xlu0 %v2127_v15, %s2324_s27  ;;  %1444 = vrot.lane.b32.xlu1 %v2719_v14, %s2324_s27 }
  0xd0   : > { %1528 = vperm.xlu0 %2122, %v1522_v16   ;;  %1533 = vperm.xlu1 %2123, %v1523_v17  }
  0xd4   : > { %1538 = vperm.xlu1 %2123, %v1524_v18   ;;  %1543 = vperm.xlu0 %2122, %v1525_v19  }
 0x112   : > { %v734_v20 = vpop.permute.xlu0 %733  ;;  %v732_v21 = vpop.permute.xlu1 %731 }
 0x113   : > { %v738_v25 = vsel %vm737_vm0, %v732_v21, %v734_v20 }
 0x116   : > { %v736_v22 = vpop.permute.xlu0 %735  ;;  %v889_v23 = vpop.permute.xlu1 %888 }
 0x117   : > { %v739_v24 = vsel %vm737_vm0, %v734_v20, %v736_v22 }
 0x118   : > { %763 = vmatprep.subr.bf16.mxu0 %v739_v24  ;;  %1941 = vmatprep.subr.bf16.mxu1 %v739_v24 }
 0x119   : > { %764 = vmatpush1.bf16.msra.mxu0 %v738_v25  ;;  %1942 = vmatpush1.bf16.msra.mxu1 %v738_v25 }
 0x11a   : > { %v891_v28 = vpop.permute.xlu0 %890  ;;  %832 = vmatprep.subr.bf16.mxu1 %v2124_v13  ;;  %v887_v29 = vpop.permute.xlu1 %886  ;;  %v2144_v13 = vld [vmem:[%s2879_s0 + $0x78] sm:$0xff]  }
 0x11b   : > { %v894_v30 = vsel %vm892_vm1, %v889_v23, %v891_v28  ;;  %v893_v31 = vsel %vm892_vm1, %v887_v29, %v889_v23 }
 0x11c   : > { %1854 = vmatmul.mubr.msk.bf16.vlgmr.msra.gmra.mxu0 %vm742_vm2, %v2128_v26  ;;  %1855 = vmatmul.mubr.msk.bf16.vlgmr.msra.gmra.mxu1 %vm742_vm2, %v2129_v27 }
 0x11d   : > { %917 = vmatprep.subr.bf16.mxu0 %v894_v30  ;;  %833 = vmatpush1.bf16.msra.mxu1 %v2719_v14  ;;  %v2145_v14 = vld [vmem:[%s2879_s0 + $0x88] sm:$0xff]  }
 0x11e   : > { %918 = vmatpush1.bf16.msra.mxu0 %v893_v31  ;;  %v982_v32 = vpop.permute.xlu0 %981  ;;  %850 = vmatprep.mubr.bf16.mxu1 %v2316_v12  ;;  %v984_v33 = vpop.permute.xlu1 %983 }
 0x11f   : > { %935 = vmatprep.mubr.bf16.mxu0 %v2316_v12  ;;  %v987_v34 = vsel %vm985_vm3, %v982_v32, %v984_v33 }
 0x120   : > { %1010 = vmatprep.subr.bf16.mxu1 %v987_v34 }
 0x122   : > { %v980_v37 = vpop.permute.xlu0 %979  ;;  %v1075_v39 = vpop.permute.xlu1 %1074 }
 0x123   : > { %v986_v38 = vsel %vm985_vm3, %v980_v37, %v982_v32 }
 0x124   : > { %1858 = vmatmul.mubr.msk.bf16.vlgmr.msra.gmra.mxu1 %vm742_vm2, %v2130_v35  ;;  %1866 = vmatmul.mubr.msk.bf16.vlgmr.msra.gmra.mxu0 %vm742_vm2, %v2131_v36 }
 0x125   : > { %1011 = vmatpush1.bf16.msra.mxu1 %v986_v38  ;;  %860 = vmatprep.mubr.bf16.mxu1 %v2316_v12 }
 0x126   : > { %v1077_v40 = vpop.permute.xlu0 %1076  ;;  %945 = vmatprep.mubr.bf16.mxu0 %v2316_v12  ;;  %v1073_v41 = vpop.permute.xlu1 %1072 }
 0x127   : > { %v1080_v42 = vsel %vm1078_vm4, %v1075_v39, %v1077_v40  ;;  %v1079_v43 = vsel %vm1078_vm4, %v1073_v41, %v1075_v39 }
 0x128   : > { %1103 = vmatprep.subr.bf16.mxu0 %v1080_v42 }
 0x129   : > { %1104 = vmatpush1.bf16.msra.mxu0 %v1079_v43 }
 0x12a   : > { %v1168_v46 = vpop.permute.xlu0 %1167  ;;  %v1170_v47 = vpop.permute.xlu1 %1169 }
 0x12b   : > { %v1173_v48 = vsel %vm1171_vm5, %v1168_v46, %v1170_v47 }
 0x12c   : > { %1859 = vmatmul.mubr.msk.bf16.gmra.mxu1 %vm742_vm2, %v2132_v44  ;;  %1867 = vmatmul.mubr.msk.bf16.gmra.mxu0 %vm742_vm2, %v2133_v45 }
 0x12d   : > { %1196 = vmatprep.subr.bf16.mxu1 %v1173_v48  ;;  %1028 = vmatprep.mubr.bf16.mxu1 %v2316_v12 }
 0x12e   : > { %v1166_v49 = vpop.permute.xlu0 %1165  ;;  %1121 = vmatprep.mubr.bf16.mxu0 %v2316_v12  ;;  %v1261_v50 = vpop.permute.xlu1 %1260 }
 0x12f   : > { %v1172_v53 = vsel %vm1171_vm5, %v1166_v49, %v1168_v46 }
 0x132   : > { %v1263_v54 = vpop.permute.xlu0 %1262  ;;  %v1259_v55 = vpop.permute.xlu1 %1258 }
 0x133   : > { %v1266_v56 = vsel %vm1264_vm6, %v1261_v50, %v1263_v54  ;;  %v1265_v57 = vsel %vm1264_vm6, %v1259_v55, %v1261_v50 }
 0x134   : > { %1874 = vmatmul.mubr.msk.bf16.vlgmr.msra.gmra.mxu1 %vm742_vm2, %v2134_v51  ;;  %1882 = vmatmul.mubr.msk.bf16.vlgmr.msra.gmra.mxu0 %vm742_vm2, %v2135_v52 }
 0x135   : > { %1197 = vmatpush1.bf16.msra.mxu1 %v1172_v53  ;;  %1289 = vmatprep.subr.bf16.mxu0 %v1266_v56 }
 0x136   : > { %1290 = vmatpush1.bf16.msra.mxu0 %v1265_v57  ;;  %v1354_v58 = vpop.permute.xlu0 %1353  ;;  %1038 = vmatprep.mubr.bf16.mxu1 %v2316_v12  ;;  %v1356_v59 = vpop.permute.xlu1 %1355 }
 0x137   : > { %1131 = vmatprep.mubr.bf16.mxu0 %v2316_v12  ;;  %v1359_v62 = vsel %vm1357_vm7, %v1354_v58, %v1356_v59 }
 0x138   : > { %1382 = vmatprep.subr.bf16.mxu1 %v1359_v62 }
 0x13a   : > { %v1352_v63 = vpop.permute.xlu0 %1351  ;;  %v1447_v0 = vpop.permute.xlu1 %1446 }
 0x13b   : > { %v1358_v6 = vsel %vm1357_vm7, %v1352_v63, %v1354_v58 }
 0x13c   : > { %1875 = vmatmul.mubr.msk.bf16.gmra.mxu1 %vm742_vm2, %v2136_v60  ;;  %1883 = vmatmul.mubr.msk.bf16.gmra.mxu0 %vm742_vm2, %v2137_v61 }
 0x13d   : > { %1214 = vmatprep.mubr.bf16.mxu1 %v2316_v12  ;;  %1307 = vmatprep.mubr.bf16.mxu0 %v2316_v12 }
 0x13e   : > { %v1449_v1 = vpop.permute.xlu0 %1448  ;;  %v1445_v2 = vpop.permute.xlu1 %1444 }
 0x13f   : > { %v1452_v3 = vsel %vm1450_vm8, %v1447_v0, %v1449_v1  ;;  %v1451_v7 = vsel %vm1450_vm8, %v1445_v2, %v1447_v0 }
 0x140   : > { %1475 = vmatprep.subr.bf16.mxu0 %v1452_v3 }
 0x144   : > { %1890 = vmatmul.mubr.msk.bf16.vlgmr.msra.gmra.mxu1 %vm742_vm2, %v2138_v4  ;;  %1898 = vmatmul.mubr.msk.bf16.vlgmr.msra.gmra.mxu0 %vm742_vm2, %v2139_v5 }
 0x145   : > { %1383 = vmatpush1.bf16.msra.mxu1 %v1358_v6  ;;  %1476 = vmatpush1.bf16.msra.mxu0 %v1451_v7 }
 0x146   : > { %1224 = vmatprep.mubr.bf16.mxu1 %v2316_v12  ;;  %1317 = vmatprep.mubr.bf16.mxu0 %v2316_v12 }
 0x14c   : > { %1891 = vmatmul.mubr.msk.bf16.gmra.mxu1 %vm742_vm2, %v2140_v8  ;;  %1899 = vmatmul.mubr.msk.bf16.gmra.mxu0 %vm742_vm2, %v2141_v9 }
 0x14d   : > { %1400 = vmatprep.mubr.bf16.mxu1 %v2316_v12  ;;  %1493 = vmatprep.mubr.bf16.mxu0 %v2316_v12 }
 0x154   : > { %1906 = vmatmul.mubr.msk.bf16.vlgmr.msra.gmra.mxu1 %vm742_vm2, %v2142_v10  ;;  %1914 = vmatmul.mubr.msk.bf16.vlgmr.msra.gmra.mxu0 %vm742_vm2, %v2143_v11 }
 0x155   : > { %1410 = vmatprep.mubr.bf16.mxu1 %v2316_v12  ;;  %1503 = vmatprep.mubr.bf16.mxu0 %v2316_v12 }
 0x15c   : > { %1907 = vmatmul.mubr.msk.bf16.gmra.mxu1 %vm742_vm2, %v2144_v13  ;;  %1915 = vmatmul.mubr.msk.bf16.gmra.mxu0 %vm742_vm2, %v2145_v14 }
 0x1dc   : > { %v783_v15 = vpop.f32.mrf.mxu0  ;;  %v793_v16 = vpop.f32.mrf.mxu1 }
 0x1de   : > { %v785_v17 = vpop.f32.mrf.mxu0  ;;  %v795_v18 = vpop.f32.mrf.mxu1 }
 0x1e0   : > { %v787_v19 = vpop.f32.mrf.mxu0  ;;  %v797_v20 = vpop.f32.mrf.mxu1 }
 0x1e2   : > { %v789_v21 = vpop.f32.mrf.mxu0  ;;  %v2832_v12 = vpop.f32.mrf.mxu1 }
 0x1e4   : > { %v852_v22 = vpop.f32.mrf.mxu1  ;;  %v937_v23 = vpop.f32.mrf.mxu0 }
 0x1e5   : > { %v853_v54 = vadd.f32 %v852_v22, %v783_v15 }
 0x1e6   : > { %v854_v24 = vpop.f32.mrf.mxu1  ;;  %v939_v25 = vpop.f32.mrf.mxu0 }
 0x1e7   : > { %v855_v57 = vadd.f32 %v854_v24, %v785_v17  ;;  %v956_v60 = vadd.f32 %v937_v23, %v853_v54 }
 0x1e8   : > { %v856_v26 = vpop.f32.mrf.mxu1  ;;  %v941_v27 = vpop.f32.mrf.mxu0 }
 0x1e9   : > { %v857_v61 = vadd.f32 %v856_v26, %v787_v19  ;;  %v957_v0 = vadd.f32 %v939_v25, %v855_v57 }
 0x1ea   : > { %v858_v28 = vpop.f32.mrf.mxu1  ;;  %v943_v29 = vpop.f32.mrf.mxu0 }
 0x1eb   : > { %v859_v1 = vadd.f32 %v858_v28, %v789_v21  ;;  %v958_v6 = vadd.f32 %v941_v27, %v857_v61 }
 0x1ec   : > { %v862_v30 = vpop.f32.mrf.mxu1  ;;  %v947_v31 = vpop.f32.mrf.mxu0 }
 0x1ed   : > { %v863_v3 = vadd.f32 %v862_v30, %v793_v16  ;;  %v959_v10 = vadd.f32 %v943_v29, %v859_v1 }
 0x1ee   : > { %v864_v32 = vpop.f32.mrf.mxu1  ;;  %v949_v33 = vpop.f32.mrf.mxu0 }
 0x1ef   : > { %v960_v14 = vadd.f32 %v947_v31, %v863_v3  ;;  %v865_v15 = vadd.f32 %v864_v32, %v795_v18 }
 0x1f0   : > { %v866_v34 = vpop.f32.mrf.mxu1  ;;  %v951_v35 = vpop.f32.mrf.mxu0 }
 0x1f1   : > { %v867_v17 = vadd.f32 %v866_v34, %v797_v20 }
 0x1f2   : > { %v868_v36 = vpop.f32.mrf.mxu1  ;;  %v953_v37 = vpop.f32.mrf.mxu0 }
 0x1f3   : > { %v869_v21 = vadd.f32 %v868_v36, %v2832_v12 }
 0x1f4   : > { %v1030_v38 = vpop.f32.mrf.mxu1  ;;  %v1123_v39 = vpop.f32.mrf.mxu0 }
 0x1f5   : > { %v1049_v2 = vadd.f32 %v1030_v38, %v956_v60  ;;  %v961_v38 = vadd.f32 %v949_v33, %v865_v15  ;;  %v963_v20 = vadd.f32 %v953_v37, %v869_v21 }
 0x1f6   : > { %v1032_v40 = vpop.f32.mrf.mxu1  ;;  %v1125_v41 = vpop.f32.mrf.mxu0 }
 0x1f7   : > { %v1050_v7 = vadd.f32 %v1032_v40, %v957_v0  ;;  %v1142_v11 = vadd.f32 %v1123_v39, %v1049_v2  ;;  %v962_v40 = vadd.f32 %v951_v35, %v867_v17  ;;  %v1534_v0 = vpop.permute.xlu1 %1533 }
 0x1f8   : > { %v1034_v42 = vpop.f32.mrf.mxu1  ;;  %v1127_v43 = vpop.f32.mrf.mxu0 }
 0x1f9   : > { %v1051_v13 = vadd.f32 %v1034_v42, %v958_v6  ;;  %v1143_v23 = vadd.f32 %v1125_v41, %v1050_v7 }
 0x1fa   : > { %v1036_v44 = vpop.f32.mrf.mxu1  ;;  %v1129_v45 = vpop.f32.mrf.mxu0 }
 0x1fb   : > { %v1052_v24 = vadd.f32 %v1036_v44, %v959_v10  ;;  %v1144_v27 = vadd.f32 %v1127_v43, %v1051_v13  ;;  %v1539_v21 = vpop.permute.xlu1 %1538 }
 0x1fc   : > { %v1040_v46 = vpop.f32.mrf.mxu1  ;;  %v1133_v47 = vpop.f32.mrf.mxu0 }
 0x1fd   : > { %v1053_v16 = vadd.f32 %v1040_v46, %v960_v14  ;;  %v1145_v42 = vadd.f32 %v1129_v45, %v1052_v24  ;;  %v1529_v46 = vpop.permute.xlu0 %1528 }
 0x1fe   : > { %v1042_v48 = vpop.f32.mrf.mxu1  ;;  %v2834_v49 = vpop.f32.mrf.mxu0 }
 0x1ff   : > { %v1146_v32 = vadd.f32 %v1133_v47, %v1053_v16  ;;  %v1054_v34 = vadd.f32 %v1042_v48, %v961_v38 }
 0x200   : > { %v1044_v50 = vpop.f32.mrf.mxu1  ;;  %v2836_v51 = vpop.f32.mrf.mxu0 }
 0x201   : > { %v1055_v41 = vadd.f32 %v1044_v50, %v962_v40  ;;  %v1147_v45 = vadd.f32 %v2834_v49, %v1054_v34 }
 0x202   : > { %v1046_v52 = vpop.f32.mrf.mxu1  ;;  %v2838_v53 = vpop.f32.mrf.mxu0 }
 0x203   : > { %v1056_v57 = vadd.f32 %v1046_v52, %v963_v20  ;;  %v1148_v37 = vadd.f32 %v2836_v51, %v1055_v41  ;;  %v1544_v41 = vpop.permute.xlu0 %1543 }
 0x204   : > { %v1216_v55 = vpop.f32.mrf.mxu1  ;;  %v1309_v56 = vpop.f32.mrf.mxu0 }
 0x205   : > { %v1235_v25 = vadd.f32 %v1216_v55, %v1142_v11  ;;  %v1149_v52 = vadd.f32 %v2838_v53, %v1056_v57 }
 0x206   : > { %v1218_v58 = vpop.f32.mrf.mxu1  ;;  %v1311_v59 = vpop.f32.mrf.mxu0 }
 0x207   : > { %v1236_v30 = vadd.f32 %v1218_v58, %v1143_v23  ;;  %v1328_v31 = vadd.f32 %v1309_v56, %v1235_v25 }
 0x208   : > { %v1220_v62 = vpop.f32.mrf.mxu1  ;;  %v1313_v63 = vpop.f32.mrf.mxu0 }
 0x209   : > { %v1237_v18 = vadd.f32 %v1220_v62, %v1144_v27  ;;  %v1329_v55 = vadd.f32 %v1311_v59, %v1236_v30 }
 0x20a   : > { %v1222_v4 = vpop.f32.mrf.mxu1  ;;  %v1315_v5 = vpop.f32.mrf.mxu0 }
 0x20b   : > { %v1238_v12 = vadd.f32 %v1222_v4, %v1145_v42  ;;  %v1330_v35 = vadd.f32 %v1313_v63, %v1237_v18 }
 0x20c   : > { %v1226_v8 = vpop.f32.mrf.mxu1  ;;  %v1319_v9 = vpop.f32.mrf.mxu0 }
 0x20d   : > { %v1239_v43 = vadd.f32 %v1226_v8, %v1146_v32  ;;  %v1331_v50 = vadd.f32 %v1315_v5, %v1238_v12 }
 0x20e   : > { %v1228_v22 = vpop.f32.mrf.mxu1  ;;  %v1321_v19 = vpop.f32.mrf.mxu0 }
 0x20f   : > { %v1332_v1 = vadd.f32 %v1319_v9, %v1239_v43  ;;  %v1240_v2 = vadd.f32 %v1228_v22, %v1147_v45 }
 0x210   : > { %v1230_v26 = vpop.f32.mrf.mxu1  ;;  %v1323_v28 = vpop.f32.mrf.mxu0 }
 0x211   : > { %v1241_v4 = vadd.f32 %v1230_v26, %v1148_v37  ;;  %v1333_v17 = vadd.f32 %v1321_v19, %v1240_v2 }
 0x212   : > { %v1232_v29 = vpop.f32.mrf.mxu1  ;;  %v1325_v39 = vpop.f32.mrf.mxu0 }
 0x213   : > { %v1242_v51 = vadd.f32 %v1232_v29, %v1149_v52  ;;  %v1334_v22 = vadd.f32 %v1323_v28, %v1241_v4 }
 0x214   : > { %v1402_v44 = vpop.f32.mrf.mxu1  ;;  %v1495_v54 = vpop.f32.mrf.mxu0 }
 0x215   : > { %v1421_v36 = vadd.f32 %v1402_v44, %v1328_v31  ;;  %v1335_v30 = vadd.f32 %v1325_v39, %v1242_v51 }
 0x216   : > { %v1404_v58 = vpop.f32.mrf.mxu1  ;;  %v1497_v33 = vpop.f32.mrf.mxu0 }
 0x217   : > { %v1514_v60 = vadd.f32 %v1495_v54, %v1421_v36  ;;  %v1422_v61 = vadd.f32 %v1404_v58, %v1329_v55 }
 0x218   : > { %v1406_v47 = vpop.f32.mrf.mxu1  ;;  %v1499_v48 = vpop.f32.mrf.mxu0 }
 0x219   : > { %v1515_v56 = vadd.f32 %v1497_v33, %v1422_v61  ;;  %v1546_v59 = vadd.f32 %v1529_v46, %v1514_v60  ;;  %v1423_v62 = vadd.f32 %v1406_v47, %v1330_v35 }
 0x21a   : > { %v1408_v3 = vpop.f32.mrf.mxu1  ;;  %v1501_v63 = vpop.f32.mrf.mxu0 }
 0x21b   : > { %v1547_v6 = vadd.f32 %v1529_v46, %v1515_v56  ;;  %v1516_v49 = vadd.f32 %v1499_v48, %v1423_v62  ;;  %v1424_v7 = vadd.f32 %v1408_v3, %v1331_v50  ;;  %v1554_v8 = vmax.f32 %v1546_v59, 0.0 }
 0x21c   : > { %v1412_v10 = vpop.f32.mrf.mxu1  ;;  %v1505_v5 = vpop.f32.mrf.mxu0 }
 0x21d   : > { %v1555_v11 = vmax.f32 %v1547_v6, 0.0  ;;  %v1517_v13 = vadd.f32 %v1501_v63, %v1424_v7  ;;  %v1425_v14 = vadd.f32 %v1412_v10, %v1332_v1  ;;  %v1548_v15 = vadd.f32 %v1534_v0, %v1516_v49 }
 0x21e   : > { %v1414_v53 = vpop.f32.mrf.mxu1  ;;  %v1507_v9 = vpop.f32.mrf.mxu0 }
 0x21f   : > { %v1934_v23 = vpack.c.bf16 %v1555_v11, %v1554_v8  ;;  %v1518_v24 = vadd.f32 %v1505_v5, %v1425_v14  ;;  %v1549_v25 = vadd.f32 %v1534_v0, %v1517_v13  ;;  %v1426_v16 = vadd.f32 %v1414_v53, %v1333_v17 }
 0x220   : > { %v1416_v26 = vpop.f32.mrf.mxu1  ;;  %v1509_v27 = vpop.f32.mrf.mxu0  ;;  %v1556_v38 = vmax.f32 %v1548_v15, 0.0 }
 0x221   : > { %1586 = vst [vmem:[%s2846_s17] sm:$0xff] %v1934_v23  ;;  %v1557_v40 = vmax.f32 %v1549_v25, 0.0  ;;  %v1427_v29 = vadd.f32 %v1416_v26, %v1334_v22  ;;  %v1519_v19 = vadd.f32 %v1507_v9, %v1426_v16  ;;  %v1550_v42 = vadd.f32 %v1539_v21, %v1518_v24 }
 0x222   : > { %v1418_v31 = vpop.f32.mrf.mxu1  ;;  %v1511_v34 = vpop.f32.mrf.mxu0 }
 0x223   : > { %v1935_v28 = vpack.c.bf16 %v1557_v40, %v1556_v38  ;;  %v1520_v18 = vadd.f32 %v1509_v27, %v1427_v29  ;;  %v1428_v20 = vadd.f32 %v1418_v31, %v1335_v30  ;;  %v1551_v32 = vadd.f32 %v1539_v21, %v1519_v19 }
 0x224   : > { %v1558_v54 = vmax.f32 %v1550_v42, 0.0 }
 0x225   : > { %1587 = vst [vmem:[%s2846_s17 + $0x8] sm:$0xff] %v1935_v28  ;;  %v1521_v39 = vadd.f32 %v1511_v34, %v1428_v20  ;;  %v1552_v44 = vadd.f32 %v1544_v41, %v1520_v18  ;;  %v1559_v55 = vmax.f32 %v1551_v32, 0.0 }
 0x227   : > { %v1553_v12 = vadd.f32 %v1544_v41, %v1521_v39  ;;  %v1936_v36 = vpack.c.bf16 %v1559_v55, %v1558_v54  ;;  %v1560_v46 = vmax.f32 %v1552_v44, 0.0 }
 0x228   : > { %v1634_v58 = vld [vmem:[%s2846_s17] sm:$0xff] (%p2407_p8) }
 0x229   : > { %v1561_v57 = vmax.f32 %v1553_v12, 0.0  ;;  %1588 = vst [vmem:[%s2846_s17 + $0x10] sm:$0xff] %v1936_v36  ;;  %1596 = sbr.rel (!%p2407_p8) target bundleno = 566 (0x236), region = 147  ;;  %1635 = vst [vmem:[%s1599_s8] sm:$0xff] (%p2407_p8), %v1634_v58 }
 0x22b   : > { %v1937_v43 = vpack.c.bf16 %v1561_v57, %v1560_v46 }
 0x22c   : > { %v1636_v33 = vld [vmem:[%s2846_s17 + $0x8] sm:$0xff] (%p2407_p8) }
 0x22d   : > { %1589 = vst [vmem:[%s2846_s17 + $0x18] sm:$0xff] %v1937_v43  ;;  %1637 = vst [vmem:[%s1599_s8 + $0x10] sm:$0xff] (%p2407_p8), %v1636_v33 }
 0x230   : > { %v1638_v35 = vld [vmem:[%s2846_s17 + $0x10] sm:$0xff] }
 0x231   : > { %1639 = vst [vmem:[%s1599_s8 + $0x20] sm:$0xff] %v1638_v35 }
 0x234   : > { %v1640_v60 = vld [vmem:[%s2846_s17 + $0x18] sm:$0xff] }
 0x235   : > { %1641 = vst [vmem:[%s1599_s8 + $0x30] sm:$0xff] %v1640_v60 }
 0x236 PF: > { %s2903_s17 = sld [smem:[#allocation5_spill]]  ;;  %p11_p8 = scmp.ge.s32.totalorder %s2377_s21, 4  }
 0x237   : > { %s2904_s18 = sld [smem:[#allocation6_spill]]  ;;  %s2905_s15 = smov %s2236_s16 }
 0x238   : > { %s2906_s16 = smov %s2402_s5  ;;  %s2907_s19 = smov %s2377_s21 }
 0x239   :  { %13 = sbr.rel (!%p11_p8) target bundleno = 5 (0x5), region = 294 }

// kernel: net_forward.7
= control target key start
LH: loop header
LB: loop body
LE: loop exit
PB: predicated region body
PF: predicated region fallthrough
CT: control target
= control target key end

     0   :  { %s3079_s0 = inlined_call_operand.vmem [shape: bf16[9,32,32], index: 0, kind: input, shape index: {}]   ;;  %s3080_s1 = inlined_call_operand.vmem [shape: f32[32,1], index: 1, kind: input, shape index: {}]   ;;  %s3081_s2 = inlined_call_operand.vmem [shape: bf16[32,640], index: 2, kind: input, shape index: {}, may-alias: {2,3}]   ;;  %s3082_s3 = inlined_call_operand.vmem [shape: bf16[32,640], index: 3, kind: input, shape index: {}, may-alias: {2,3}]   ;;  %s3083_s4 = inlined_call_operand.vmem [shape: bf16[32,512], index: 4, kind: output, shape index: {}]  }
   0x1   :  { %3085 = sst [smem:[#allocation7_spill]] %s3081_s2 }
   0x2   :  { %s2484_s15 = smov 0   ;;  %s2486_s16 = smov 0  }
   0x3   :  { %s2488_s17 = smov 0   ;;  %s2490_s18 = smov 0  }
   0x4   :  { %s2492_s19 = smov 0  }
   0x5 LB: > { %s3084_s20 = sadd.s32 4294967295, %s2382_s19   ;;  %s2511_s21 = sadd.s32 1, %s2382_s19   ;;  %s2382_s19 = sphi %s2492_s19, %s3109_s19   ;;  %s2378_s18 = sphi %s2490_s18, %s3108_s18   ;;  %s2374_s17 = sphi %s2488_s17, %s3107_s17   ;;  %s2370_s16 = sphi %s2486_s16, %s3106_s16   ;;  %s2366_s15 = sphi %s2484_s15, %s3105_s15  }
   0x6   : > { %s60_s22 = ssub.s32 %s2382_s19, %s2511_s21  ;;  %s63_s23 = sadd.s32 1, %s2378_s18 }
   0x7   : > { %p61_p0 = scmp.eq.s32.totalorder %s60_s22, 0  ;;  %p70_p1 = scmp.ne.s32.totalorder %s2378_s18, %s2374_s17 }
   0x8   : > { %p71_p2 = scmp.eq.s32.totalorder %s2382_s19, 0  ;;  %s2053_s24 = sshll.u32 %s2382_s19, 1 }
   0x9   : > { %s2521_s25 = scalar_select %p61_p0, %s2378_s18, %s63_s23  }
   0xa   : > { %p72_p3 = por %p71_p2, %p70_p1  ;;  %s2054_s26 = sadd.s32 2, %s2053_s24 }
   0xb   : > { %3086 = sst [smem:[#allocation5_spill]] %s2521_s25  ;;  %s2056_s27 = sadd.s32 2, %s2054_s26 }
   0xc   : > { %s93_s28 = sadd.s32 1, %s2370_s16  ;;  %s90_s29 = ssub.s32 %s2054_s26, %s2056_s27 }
   0xd   : > { %p100_p4 = scmp.ne.s32.totalorder %s2370_s16, %s2366_s15  ;;  %p91_p5 = scmp.eq.s32.totalorder %s90_s29, 0 }
   0xe   : > { %p130_p6 = scmp.eq.s32.totalorder %s3084_s20, 1  ;;  %p1930_p9 = scmp.ge.s32.totalorder %s2382_s19, 2 }
   0xf   : > { %p2531_p7 = por %p100_p4, %p71_p2 }
  0x10   : > { %s2536_s5 = scalar_select %p91_p5, %s2370_s16, %s93_s28  }
  0x11   : > { %p2541_p8 = por %p130_p6, %p70_p1  ;;  %158 = sbr.rel (%p1930_p9) target bundleno = 139 (0x8b), region = 24 }
  0x16   : > { %161 = sbr.rel (!%p72_p3) target bundleno = 133 (0x85), region = 28  ;;  %s163_s7 = sand.u32 (%p72_p3), 1, %s2378_s18  }
  0x17   : > { %s167_s8 = ssub.s32 (%p72_p3), 5, %s2053_s24  ;;  %s1931_s9 = sshll.u32 (%p72_p3), %s163_s7, 5 }
  0x18   : > { %p168_p10 = scmp.lt.s32.totalorder (%p72_p3), %s167_s8, 2  ;;  %s2057_s10 = sshll.u32 (%p72_p3), %s2382_s19, 3 }
  0x19   : > { %s3089_s2 = sld [smem:[#allocation7_spill]] (%p72_p3)  ;;  %s2555_s23 = scalar_lea.vmem (%p72_p3), [#allocation2], %s1931_s9  }
  0x1b   : > { %s3111_s8 = smov (!%p168_p10, %s167_s8), 2 }
  0x1c   : > { %s1933_s14 = sshll.u32 %s3111_s8, 8  ;;  %s2553_s22 = sshll.u32 %s3111_s8, 2 }
  0x1d   : > { %p1937_p11 = scmp.eq.s32.totalorder %s1933_s14, 0 }
  0x1e   : > { %p178_p12 = scmp.lt.u32.totalorder (!%p1937_p11), %s2553_s22, 8 }
  0x1f   : > { %s2551_s13 = scalar_lea.vmem %s3089_s2, %s2057_s10   ;;  %177 = sbr.rel (%p1937_p11) target bundleno = 133 (0x85), region = 32 }
  0x24   : > { %181 = sbr.rel (%p178_p12) target bundleno = 122 (0x7a), region = 36  ;;  %s2559_s24 = sand.u32 (!%p178_p12), 7, %s2553_s22  }
  0x25   : > { %p204_p13 = scmp.eq.s32.totalorder (!%p178_p12), %s2559_s24, 0  ;;  %p1938_p0 = scmp.ne.s32.totalorder (!%p178_p12), %s2559_s24, 0 }
  0x29   : > { %207 = sbr.rel (%p1938_p0) target bundleno = 78 (0x4e), region = 51  ;;  %s208_s26 = sshrl.u32 (!%p1938_p0), %s2553_s22, 3 }
  0x2a   : > { %s2566_s27 = sshrl.u32 (!%p1938_p0), %s208_s26, 4 }
  0x2b   : > { %p1939_p1 = scmp.le.s32.totalorder (!%p1938_p0), %s2566_s27, 0 }
  0x2e   : > { %1848 = sbr.rel (%p1939_p1) target bundleno = 62 (0x3e), region = 244  ;;  %s3090_s28 = smov (!%p1939_p1), %s2555_s23 }
  0x2f   : > { %s3091_s29 = smov (!%p1939_p1), %s2551_s13  ;;  %s2575_s7 = smov (!%p1939_p1), 0  }
  0x30   : > { %s2577_s8 = smov (!%p1939_p1), 0  }
  0x33 LB: >> { %v221_v0 = vld [vmem:[%s2390_s29] sm:$0xff]  ;;  %v253_v1 = vld [vmem:[%s2390_s29 + $0x14] sm:$0xff]  ;;  %v285_v2 = vld [vmem:[%s2390_s29 + $0x28] sm:$0xff]  ;;  %s349_s9 = sadd.s32 1, %s2394_s7  ;;  %s215_s8 = sadd.s32 1, %s2398_s8   ;;  %s2398_s8 = sphi %s2577_s8, %s215_s8   ;;  %s2394_s7 = sphi %s2575_s7, %s3092_s7   ;;  %s2390_s29 = sphi %s3091_s29, %s354_s29   ;;  %s2386_s28 = sphi %s3090_s28, %s355_s28  }
  0x34   : >> { %222 = vst [vmem:[%s2386_s28] sm:$0xff] %v221_v0  ;;  %254 = vst [vmem:[%s2386_s28 + $0x8] sm:$0xff] %v253_v1  ;;  %v317_v3 = vld [vmem:[%s2390_s29 + $0x3c] sm:$0xff]  ;;  %v319_v4 = vld [vmem:[%s2390_s29 + $0x44] sm:$0xff]  ;;  %p350_p2 = scmp.ge.s32.totalorder %s349_s9, %s2566_s27  ;;  %p214_p3 = scmp.ge.s32.totalorder %s215_s8, %s2566_s27 }
  0x35   : >> { %286 = vst [vmem:[%s2386_s28 + $0x10] sm:$0xff] %v285_v2  ;;  %v321_v5 = vld [vmem:[%s2390_s29 + $0x4c] sm:$0xff]  ;;  %318 = vst [vmem:[%s2386_s28 + $0x18] sm:$0xff] %v317_v3  ;;  %v323_v6 = vld [vmem:[%s2390_s29 + $0x54] sm:$0xff] }
  0x36   : >> { %320 = vst [vmem:[%s2386_s28 + $0x20] sm:$0xff] %v319_v4  ;;  %322 = vst [vmem:[%s2386_s28 + $0x28] sm:$0xff] %v321_v5  ;;  %v325_v7 = vld [vmem:[%s2390_s29 + $0x5c] sm:$0xff]  ;;  %v327_v8 = vld [vmem:[%s2390_s29 + $0x64] sm:$0xff]  ;;  %s3113_s9 = smov (%p350_p2, %s349_s9), 0 }
  0x37   : >> { %324 = vst [vmem:[%s2386_s28 + $0x30] sm:$0xff] %v323_v6  ;;  %326 = vst [vmem:[%s2386_s28 + $0x38] sm:$0xff] %v325_v7  ;;  %v329_v9 = vld [vmem:[%s2390_s29 + $0x6c] sm:$0xff]  ;;  %v331_v10 = vld [vmem:[%s2390_s29 + $0x74] sm:$0xff]  ;;  %s1940_s10 = sshll.u32 %s3113_s9, 7  ;;  %s3092_s7 = smov %s3113_s9 }
  0x38   : >> { %328 = vst [vmem:[%s2386_s28 + $0x40] sm:$0xff] %v327_v8  ;;  %v333_v11 = vld [vmem:[%s2390_s29 + $0x7c] sm:$0xff]  ;;  %330 = vst [vmem:[%s2386_s28 + $0x48] sm:$0xff] %v329_v9  ;;  %v335_v12 = vld [vmem:[%s2390_s29 + $0x84] sm:$0xff] }
  0x39   : >> { %332 = vst [vmem:[%s2386_s28 + $0x50] sm:$0xff] %v331_v10  ;;  %334 = vst [vmem:[%s2386_s28 + $0x58] sm:$0xff] %v333_v11  ;;  %v337_v13 = vld [vmem:[%s2390_s29 + $0x8c] sm:$0xff]  ;;  %v339_v14 = vld [vmem:[%s2390_s29 + $0x94] sm:$0xff]  ;;  %217 = sbr.rel (!%p214_p3) target bundleno = 51 (0x33), region = 250 }
  0x3a   : >> { %336 = vst [vmem:[%s2386_s28 + $0x60] sm:$0xff] %v335_v12  ;;  %338 = vst [vmem:[%s2386_s28 + $0x68] sm:$0xff] %v337_v13  ;;  %v341_v15 = vld [vmem:[%s2390_s29 + $0x9c] sm:$0xff]  ;;  %v343_v16 = vld [vmem:[%s2390_s29 + $0xa4] sm:$0xff] }
  0x3b   : >> { %340 = vst [vmem:[%s2386_s28 + $0x70] sm:$0xff] %v339_v14  ;;  %v345_v17 = vld [vmem:[%s2390_s29 + $0xac] sm:$0xff]  ;;  %342 = vst [vmem:[%s2386_s28 + $0x78] sm:$0xff] %v341_v15  ;;  %v347_v18 = vld [vmem:[%s2390_s29 + $0xb4] sm:$0xff]  ;;  %s354_s29 = scalar_lea.vmem %s2551_s13, %s1940_s10  }
  0x3c   : >> { %344 = vst [vmem:[%s2386_s28 + $0x80] sm:$0xff] %v343_v16  ;;  %346 = vst [vmem:[%s2386_s28 + $0x88] sm:$0xff] %v345_v17 }
  0x3d   : >> { %348 = vst [vmem:[%s2386_s28 + $0x90] sm:$0xff] %v347_v18  ;;  %s355_s28 = scalar_lea.vmem %s2555_s23, %s1940_s10 [#allocation2]  }
  0x3e PF: > { %s2645_s11 = sand.u32 15, %s208_s26   ;;  %s2058_s12 = sshll.u32 %s2566_s27, 11 }
  0x3f   : > { %s360_s14 = sshra.s32 %s2058_s12, 4  ;;  %p1945_p4 = scmp.le.s32.totalorder %s2645_s11, 0 }
  0x40   : > { %s2649_s10 = scalar_lea.vmem %s2551_s13, %s360_s14   ;;  %s2652_s20 = scalar_lea.vmem %s2555_s23, %s360_s14 [#allocation2]  }
  0x41   : > { %1862 = sbr.rel (%p1945_p4) target bundleno = 78 (0x4e), region = 255  ;;  %s3093_s28 = smov (!%p1945_p4), %s2652_s20 }
  0x42   : > { %s3094_s29 = smov (!%p1945_p4), %s2649_s10  ;;  %s2661_s7 = smov (!%p1945_p4), 0  }
  0x43   : > { %s2412_s8 = smov (!%p1945_p4), 0  }
  0x46 LB: >> { %v376_v19 = vld [vmem:[%s2406_s29] sm:$0xff]  ;;  %v378_v20 = vld [vmem:[%s2406_s29 + $0x14] sm:$0xff]  ;;  %v380_v21 = vld [vmem:[%s2406_s29 + $0x28] sm:$0xff]  ;;  %s384_s26 = sadd.s32 1, %s2410_s7  ;;  %s370_s8 = sadd.s32 1, %s2414_s8   ;;  %s2414_s8 = sphi %s2412_s8, %s370_s8   ;;  %s2410_s7 = sphi %s2661_s7, %s3095_s7   ;;  %s2406_s29 = sphi %s3094_s29, %s389_s29   ;;  %s2402_s28 = sphi %s3093_s28, %s390_s28  }
  0x47   : >> { %377 = vst [vmem:[%s2402_s28] sm:$0xff] %v376_v19  ;;  %379 = vst [vmem:[%s2402_s28 + $0x8] sm:$0xff] %v378_v20  ;;  %v382_v22 = vld [vmem:[%s2406_s29 + $0x3c] sm:$0xff]  ;;  %p385_p5 = scmp.ge.s32.totalorder %s384_s26, %s2645_s11  ;;  %p369_p6 = scmp.ge.s32.totalorder %s370_s8, %s2645_s11 }
  0x48   : >> { %381 = vst [vmem:[%s2402_s28 + $0x10] sm:$0xff] %v380_v21  ;;  %383 = vst [vmem:[%s2402_s28 + $0x18] sm:$0xff] %v382_v22 }
  0x49   : >> { %s3115_s26 = smov (%p385_p5, %s384_s26), 0  ;;  %372 = sbr.rel (!%p369_p6) target bundleno = 70 (0x46), region = 261 }
  0x4a   : >> { %s1946_s27 = sshll.u32 %s3115_s26, 3  ;;  %s3095_s7 = smov %s3115_s26 }
  0x4b   : >> { %s389_s29 = scalar_lea.vmem %s2649_s10, %s1946_s27   ;;  %s390_s28 = scalar_lea.vmem %s2652_s20, %s1946_s27 [#allocation2]  }
  0x4e PF: > { %393 = sbr.rel (%p204_p13) target bundleno = 122 (0x7a), region = 69  ;;  %s395_s9 = ssub.s32 (!%p204_p13), %s2553_s22, %s2559_s24 }
  0x4f   : > { %s399_s12 = sshrl.u32 (!%p204_p13), %s2553_s22, 3  ;;  %s2682_s14 = scalar_lea.vmem (!%p204_p13), %s2551_s13, %s395_s9 }
  0x50   : > { %s2685_s7 = scalar_lea.vmem (!%p204_p13), %s2555_s23, %s395_s9 [#allocation2]  ;;  %s2689_s8 = sshrl.u32 (!%p204_p13), %s399_s12, 4 }
  0x51   : > { %p1948_p9 = scmp.le.s32.totalorder (!%p204_p13), %s2689_s8, 0 }
  0x53   : > { %1876 = sbr.rel (%p1948_p9) target bundleno = 99 (0x63), region = 266  ;;  %s3096_s20 = smov (!%p1948_p9), %s2555_s23 }
  0x54   : > { %s3097_s11 = smov (!%p1948_p9), %s2551_s13  ;;  %s2698_s10 = smov (!%p1948_p9), 0  }
  0x55   : > { %s2700_s28 = smov (!%p1948_p9), 0  }
  0x58 LB: >> { %v412_v23 = vld [vmem:[%s2422_s11] sm:$0xff]  ;;  %v444_v24 = vld [vmem:[%s2422_s11 + $0x14] sm:$0xff]  ;;  %v476_v25 = vld [vmem:[%s2422_s11 + $0x28] sm:$0xff]  ;;  %s540_s29 = sadd.s32 1, %s2426_s10  ;;  %s406_s28 = sadd.s32 1, %s2430_s28   ;;  %s2430_s28 = sphi %s2700_s28, %s406_s28   ;;  %s2426_s10 = sphi %s2698_s10, %s3098_s10   ;;  %s2422_s11 = sphi %s3097_s11, %s545_s11   ;;  %s2418_s20 = sphi %s3096_s20, %s546_s20  }
  0x59   : >> { %413 = vst [vmem:[%s2418_s20] sm:$0xff] %v412_v23  ;;  %445 = vst [vmem:[%s2418_s20 + $0x8] sm:$0xff] %v444_v24  ;;  %v508_v26 = vld [vmem:[%s2422_s11 + $0x3c] sm:$0xff]  ;;  %v510_v27 = vld [vmem:[%s2422_s11 + $0x44] sm:$0xff]  ;;  %p541_p10 = scmp.ge.s32.totalorder %s540_s29, %s2689_s8  ;;  %p405_p11 = scmp.ge.s32.totalorder %s406_s28, %s2689_s8 }
  0x5a   : >> { %477 = vst [vmem:[%s2418_s20 + $0x10] sm:$0xff] %v476_v25  ;;  %v512_v28 = vld [vmem:[%s2422_s11 + $0x4c] sm:$0xff]  ;;  %509 = vst [vmem:[%s2418_s20 + $0x18] sm:$0xff] %v508_v26  ;;  %v514_v29 = vld [vmem:[%s2422_s11 + $0x54] sm:$0xff] }
  0x5b   : >> { %511 = vst [vmem:[%s2418_s20 + $0x20] sm:$0xff] %v510_v27  ;;  %513 = vst [vmem:[%s2418_s20 + $0x28] sm:$0xff] %v512_v28  ;;  %v516_v30 = vld [vmem:[%s2422_s11 + $0x5c] sm:$0xff]  ;;  %v518_v31 = vld [vmem:[%s2422_s11 + $0x64] sm:$0xff]  ;;  %s3117_s29 = smov (%p541_p10, %s540_s29), 0 }
  0x5c   : >> { %515 = vst [vmem:[%s2418_s20 + $0x30] sm:$0xff] %v514_v29  ;;  %517 = vst [vmem:[%s2418_s20 + $0x38] sm:$0xff] %v516_v30  ;;  %v520_v32 = vld [vmem:[%s2422_s11 + $0x6c] sm:$0xff]  ;;  %v522_v33 = vld [vmem:[%s2422_s11 + $0x74] sm:$0xff]  ;;  %s1949_s26 = sshll.u32 %s3117_s29, 7  ;;  %s3098_s10 = smov %s3117_s29 }
  0x5d   : >> { %519 = vst [vmem:[%s2418_s20 + $0x40] sm:$0xff] %v518_v31  ;;  %v524_v34 = vld [vmem:[%s2422_s11 + $0x7c] sm:$0xff]  ;;  %521 = vst [vmem:[%s2418_s20 + $0x48] sm:$0xff] %v520_v32  ;;  %v526_v35 = vld [vmem:[%s2422_s11 + $0x84] sm:$0xff] }
  0x5e   : >> { %523 = vst [vmem:[%s2418_s20 + $0x50] sm:$0xff] %v522_v33  ;;  %525 = vst [vmem:[%s2418_s20 + $0x58] sm:$0xff] %v524_v34  ;;  %v528_v36 = vld [vmem:[%s2422_s11 + $0x8c] sm:$0xff]  ;;  %v530_v37 = vld [vmem:[%s2422_s11 + $0x94] sm:$0xff]  ;;  %408 = sbr.rel (!%p405_p11) target bundleno = 88 (0x58), region = 272 }
  0x5f   : >> { %527 = vst [vmem:[%s2418_s20 + $0x60] sm:$0xff] %v526_v35  ;;  %529 = vst [vmem:[%s2418_s20 + $0x68] sm:$0xff] %v528_v36  ;;  %v532_v38 = vld [vmem:[%s2422_s11 + $0x9c] sm:$0xff]  ;;  %v534_v39 = vld [vmem:[%s2422_s11 + $0xa4] sm:$0xff] }
  0x60   : >> { %531 = vst [vmem:[%s2418_s20 + $0x70] sm:$0xff] %v530_v37  ;;  %v536_v40 = vld [vmem:[%s2422_s11 + $0xac] sm:$0xff]  ;;  %533 = vst [vmem:[%s2418_s20 + $0x78] sm:$0xff] %v532_v38  ;;  %v538_v41 = vld [vmem:[%s2422_s11 + $0xb4] sm:$0xff]  ;;  %s545_s11 = scalar_lea.vmem %s2551_s13, %s1949_s26  }
  0x61   : >> { %535 = vst [vmem:[%s2418_s20 + $0x80] sm:$0xff] %v534_v39  ;;  %537 = vst [vmem:[%s2418_s20 + $0x88] sm:$0xff] %v536_v40 }
  0x62   : >> { %539 = vst [vmem:[%s2418_s20 + $0x90] sm:$0xff] %v538_v41  ;;  %s546_s20 = scalar_lea.vmem %s2555_s23, %s1949_s26 [#allocation2]  }
  0x63 PF: > { %s2768_s27 = sand.u32 15, %s399_s12   ;;  %s2060_s9 = sshll.u32 %s2689_s8, 11 }
  0x64   : > { %s551_s26 = sshra.s32 %s2060_s9, 4  ;;  %p1954_p12 = scmp.le.s32.totalorder %s2768_s27, 0 }
  0x65   : > { %s2772_s2 = scalar_lea.vmem %s2551_s13, %s551_s26   ;;  %s2775_s25 = scalar_lea.vmem %s2555_s23, %s551_s26 [#allocation2]  }
  0x66   : > { %1890 = sbr.rel (%p1954_p12) target bundleno = 115 (0x73), region = 277  ;;  %s3099_s20 = smov (!%p1954_p12), %s2775_s25 }
  0x67   : > { %s3100_s11 = smov (!%p1954_p12), %s2772_s2  ;;  %s2440_s10 = smov (!%p1954_p12), 0  }
  0x68   : > { %s2444_s28 = smov (!%p1954_p12), 0  }
  0x6b LB: >> { %v567_v42 = vld [vmem:[%s2438_s11] sm:$0xff]  ;;  %v569_v43 = vld [vmem:[%s2438_s11 + $0x14] sm:$0xff]  ;;  %v571_v44 = vld [vmem:[%s2438_s11 + $0x28] sm:$0xff]  ;;  %s575_s12 = sadd.s32 1, %s2442_s10  ;;  %s561_s28 = sadd.s32 1, %s2446_s28   ;;  %s2446_s28 = sphi %s2444_s28, %s561_s28   ;;  %s2442_s10 = sphi %s2440_s10, %s2441_s10   ;;  %s2438_s11 = sphi %s3100_s11, %s580_s11   ;;  %s2434_s20 = sphi %s3099_s20, %s581_s20  }
  0x6c   : >> { %568 = vst [vmem:[%s2434_s20] sm:$0xff] %v567_v42  ;;  %570 = vst [vmem:[%s2434_s20 + $0x8] sm:$0xff] %v569_v43  ;;  %v573_v45 = vld [vmem:[%s2438_s11 + $0x3c] sm:$0xff]  ;;  %p576_p13 = scmp.ge.s32.totalorder %s575_s12, %s2768_s27  ;;  %p560_p0 = scmp.ge.s32.totalorder %s561_s28, %s2768_s27 }
  0x6d   : >> { %572 = vst [vmem:[%s2434_s20 + $0x10] sm:$0xff] %v571_v44  ;;  %574 = vst [vmem:[%s2434_s20 + $0x18] sm:$0xff] %v573_v45 }
  0x6e   : >> { %s3119_s12 = smov (%p576_p13, %s575_s12), 0  ;;  %563 = sbr.rel (!%p560_p0) target bundleno = 107 (0x6b), region = 283 }
  0x6f   : >> { %s1955_s8 = sshll.u32 %s3119_s12, 3  ;;  %s2441_s10 = smov %s3119_s12  }
  0x70   : >> { %s580_s11 = scalar_lea.vmem %s2772_s2, %s1955_s8   ;;  %s581_s20 = scalar_lea.vmem %s2775_s25, %s1955_s8 [#allocation2]  }
  0x73 PF: > { %s2448_s29 = smov 1  }
  0x74   : > { %s582_s9 = sshll.u32 %s2448_s29, %s2559_s24 }
  0x75   : > { %s1957_s26 = sadd.s32 4294967295, %s582_s9 }
  0x76   : > { %v592_v46 = vld [vmem:[%s2682_s14] sm:%s1957_s26]  ;;  %v594_v47 = vld [vmem:[%s2682_s14 + $0x14] sm:%s1957_s26] }
  0x77   : > { %593 = vst [vmem:[%s2685_s7] sm:%s1957_s26] %v592_v46  ;;  %595 = vst [vmem:[%s2685_s7 + $0x8] sm:%s1957_s26] %v594_v47 }
  0x78   : > { %v596_v48 = vld [vmem:[%s2682_s14 + $0x28] sm:%s1957_s26]  ;;  %v598_v49 = vld [vmem:[%s2682_s14 + $0x3c] sm:%s1957_s26] }
  0x79   : > { %597 = vst [vmem:[%s2685_s7 + $0x10] sm:%s1957_s26] %v596_v48  ;;  %599 = vst [vmem:[%s2685_s7 + $0x18] sm:%s1957_s26] %v598_v49 }
  0x7a PF: > { %p1958_p1 = scmp.ge.u32.totalorder %s2553_s22, 8 }
  0x7b   : > { %s2449_s2 = smov (!%p1958_p1), 1  }
  0x7c   : > { %184 = sbr.rel (%p1958_p1) target bundleno = 133 (0x85), region = 40  ;;  %s185_s25 = sshll.u32 (!%p1958_p1), %s2449_s2, %s2553_s22 }
  0x7d   : > { %s1959_s24 = sadd.s32 (!%p1958_p1), 4294967295, %s185_s25 }
  0x81   : > { %v195_v50 = vld [vmem:[%s2551_s13] sm:%s1959_s24]  ;;  %v197_v51 = vld [vmem:[%s2551_s13 + $0x14] sm:%s1959_s24] }
  0x82   : > { %196 = vst [vmem:[%s2555_s23] sm:%s1959_s24] %v195_v50  ;;  %198 = vst [vmem:[%s2555_s23 + $0x8] sm:%s1959_s24] %v197_v51 }
  0x83   : > { %v199_v52 = vld [vmem:[%s2551_s13 + $0x28] sm:%s1959_s24]  ;;  %v201_v53 = vld [vmem:[%s2551_s13 + $0x3c] sm:%s1959_s24] }
  0x84   : > { %200 = vst [vmem:[%s2555_s23 + $0x10] sm:%s1959_s24] %v199_v52  ;;  %202 = vst [vmem:[%s2555_s23 + $0x18] sm:%s1959_s24] %v201_v53 }
  0x85 PF: > { %603 = sbr.rel (!%p2531_p7) target bundleno = 139 (0x8b), region = 94  ;;  %s605_s14 = sand.u32 (%p2531_p7), 1, %s2370_s16  }
  0x86   : > { %s1961_s7 = sshll.u32 (%p2531_p7), %s2382_s19, 3  ;;  %s1960_s22 = sshll.u32 (%p2531_p7), %s605_s14, 4 }
  0x87   : > { %s1809_s11 = scalar_lea.vmem (%p2531_p7), %s3082_s3, %s1961_s7  ;;  %s607_s13 = scalar_lea.vmem (%p2531_p7), [#allocation3], %s1960_s22 }
  0x88   : > { %v1962_v54 = vld [vmem:[%s1809_s11 + $0x8] sm:$0xf] (%p2531_p7)  ;;  %v1963_v55 = vld [vmem:[%s1809_s11 + $0x1c] sm:$0xf] (%p2531_p7)  ;;  %v1964_v56 = vld [vmem:[%s1809_s11 + $0x30] sm:$0xf] (%p2531_p7) }
  0x89   : > { %629 = vst [vmem:[%s607_s13] sm:$0xf] (%p2531_p7), %v1962_v54  ;;  %631 = vst [vmem:[%s607_s13 + $0x4] sm:$0xf] (%p2531_p7), %v1963_v55  ;;  %v1965_v57 = vld [vmem:[%s1809_s11 + $0x44] sm:$0xf] (%p2531_p7) }
  0x8a   : > { %633 = vst [vmem:[%s607_s13 + $0x8] sm:$0xf] %v1964_v56  ;;  %635 = vst [vmem:[%s607_s13 + $0xc] sm:$0xf] %v1965_v57 }
  0x8b PF: > { %p1966_p7 = scmp.ge.s32.totalorder %s2382_s19, 1  ;;  %p666_p2 = scmp.lt.s32.totalorder %s2382_s19, 3 }
  0x8d   : > { %p667_p3 = pnand %p1966_p7, %p666_p2 }
  0x8f   : > { %670 = sbr.rel (%p667_p3) target bundleno = 588 (0x24c), region = 135 }
  0x94   : > { %s673_s30 = sand.u32 1, %s2374_s17   ;;  %s680_s10 = sand.u32 1, %s2366_s15   ;;  %v2451_v0 = vmov 0   ;;  %v1645_v1 = vld [vmem:[%s3080_s1] sm:$0xff]  ;;  %v1646_v2 = vld [vmem:[%s3080_s1 + $0x8] sm:$0xff]  ;;  %v1648_v3 = vld [vmem:[%s3080_s1 + $0x18] sm:$0xff] }
  0x95   : > { %s2823_s23 = sshll.u32 %s673_s30, 5  ;;  %s1968_s28 = sshll.u32 %s680_s10, 4  ;;  %834 = vmatprep.mubr.bf16.mxu0 %v2451_v0  ;;  %844 = vmatprep.mubr.bf16.mxu1 %v2451_v0  ;;  %v1647_v4 = vld [vmem:[%s3080_s1 + $0x10] sm:$0xff]  ;;  %vm786_vm0 = vcmask 1039360   ;;  %v2263_v16 = vld [vmem:[%s3079_s0 + $0x18] sm:$0xff]   ;;  %vm951_vm1 = vcmask 1031168  }
  0x96   : > { %s675_s12 = scalar_lea.vmem [#allocation2], %s2823_s23  ;;  %s682_s8 = scalar_lea.vmem [#allocation3], %s1968_s28  ;;  %2252 = vset.pattern.permute.xlu0 %v2451_v0  ;;  %2253 = vset.pattern.permute.xlu1 %v2451_v0  ;;  %v2262_v15 = vld [vmem:[%s3079_s0 + $0x10] sm:$0xff]   ;;  %vm795_vm2 = vcmask 261120   ;;  %v2264_v23 = vld [vmem:[%s3079_s0] sm:$0xff]   ;;  %vm1054_vm3 = vcmask 949248  }
  0x97   : > { %v2827_v58 = vld [vmem:[%s675_s12 + $0x14] ss:$8 sps:$4 sm:$0xff]   ;;  %v2829_v59 = vld [vmem:[%s675_s12 + $0x10] ss:$8 sps:$4 sm:$0xff]   ;;  %s2450_s29 = smov 127   ;;  %s2452_s15 = smov 126  }
  0x98   : > { %782 = vrot.lane.b32.xlu0 %v2827_v58, %s2450_s29  ;;  %v2257_v60 = vld [vmem:[%s682_s8 + $0x8] sm:$0xff]   ;;  %780 = vrot.lane.b32.xlu1 %v2829_v59, %s2450_s29  ;;  %v2260_v62 = vld [vmem:[%s682_s8] sm:$0xff]   ;;  %s2453_s17 = smov 116   ;;  %s2454_s9 = smov 115   ;;  %vm1157_vm4 = vcmask 941056   ;;  %vm1260_vm5 = vcmask 932864  }
  0x99   : > { %v2833_v61 = vld [vmem:[%s675_s12 + $0x4] ss:$8 sps:$4 sm:$0xff]   ;;  %v2835_v63 = vld [vmem:[%s675_s12] ss:$8 sps:$4 sm:$0xff]   ;;  %s2455_s26 = smov 114   ;;  %s2456_s2 = smov 104  }
  0x9a   : > { %s2457_s25 = smov 103   ;;  %s2458_s24 = smov 102   ;;  %v2265_v28 = vld [vmem:[%s3079_s0 + $0x20] sm:$0xff]   ;;  %v2266_v32 = vld [vmem:[%s3079_s0 + $0x8] sm:$0xff]   ;;  %v2268_v47 = vld [vmem:[%s3079_s0 + $0x30] sm:$0xff]   ;;  %vm1363_vm6 = vcmask 850944  }
  0x9b   : > { %v2267_v36 = vld [vmem:[%s3079_s0 + $0x28] sm:$0xff]   ;;  %v2269_v52 = vld [vmem:[%s3079_s0 + $0x40] sm:$0xff]   ;;  %v2270_v55 = vld [vmem:[%s3079_s0 + $0x38] sm:$0xff]   ;;  %vm1466_vm7 = vcmask 842752   ;;  %vm1569_vm8 = vcmask 834560   ;;  %s3046_s20 = scalar_lea.vmem [#allocation4], %s2823_s23 }
  0x9c   : > { %784 = vrot.lane.b32.xlu0 %v2257_v60, %s2450_s29  ;;  %776 = vrot.lane.b32.xlu1 %v2833_v61, %s2450_s29  ;;  %s3103_s23 = sadd.s32 (%p2541_p8), 4294967295, %s2382_s19  }
  0x9d   : > { %s2066_s11 = sshll.u32 (%p2541_p8), %s3103_s23, 3 }
  0x9e   : > { %s1722_s10 = scalar_lea.vmem (%p2541_p8), %s3083_s4, %s2066_s11 }
  0xa0   : > { %778 = vrot.lane.b32.xlu0 %v2260_v62, %s2450_s29  ;;  %774 = vrot.lane.b32.xlu1 %v2835_v63, %s2450_s29 }
  0xa4   : > { %947 = vrot.lane.b32.xlu0 %v2827_v58, %s2452_s15  ;;  %949 = vrot.lane.b32.xlu1 %v2257_v60, %s2452_s15 }
  0xa8   : > { %945 = vrot.lane.b32.xlu0 %v2829_v59, %s2452_s15  ;;  %941 = vrot.lane.b32.xlu1 %v2833_v61, %s2452_s15 }
  0xac   : > { %943 = vrot.lane.b32.xlu0 %v2260_v62, %s2452_s15  ;;  %939 = vrot.lane.b32.xlu1 %v2835_v63, %s2452_s15 }
  0xb0   : > { %1050 = vrot.lane.b32.xlu0 %v2827_v58, %s2453_s17  ;;  %1052 = vrot.lane.b32.xlu1 %v2257_v60, %s2453_s17 }
  0xb4   : > { %1048 = vrot.lane.b32.xlu0 %v2829_v59, %s2453_s17  ;;  %1153 = vrot.lane.b32.xlu1 %v2827_v58, %s2454_s9 }
  0xb8   : > { %1155 = vrot.lane.b32.xlu0 %v2257_v60, %s2454_s9  ;;  %1151 = vrot.lane.b32.xlu1 %v2829_v59, %s2454_s9 }
  0xbc   : > { %1044 = vrot.lane.b32.xlu0 %v2833_v61, %s2453_s17  ;;  %1046 = vrot.lane.b32.xlu1 %v2260_v62, %s2453_s17 }
  0xc0   : > { %1042 = vrot.lane.b32.xlu0 %v2835_v63, %s2453_s17  ;;  %1147 = vrot.lane.b32.xlu1 %v2833_v61, %s2454_s9 }
  0xc4   : > { %1149 = vrot.lane.b32.xlu0 %v2260_v62, %s2454_s9  ;;  %1145 = vrot.lane.b32.xlu1 %v2835_v63, %s2454_s9 }
  0xc8   : > { %1256 = vrot.lane.b32.xlu0 %v2827_v58, %s2455_s26  ;;  %1258 = vrot.lane.b32.xlu1 %v2257_v60, %s2455_s26 }
  0xcc   : > { %1254 = vrot.lane.b32.xlu0 %v2829_v59, %s2455_s26  ;;  %1359 = vrot.lane.b32.xlu1 %v2827_v58, %s2456_s2 }
  0xd0   : > { %1361 = vrot.lane.b32.xlu0 %v2257_v60, %s2456_s2  ;;  %1357 = vrot.lane.b32.xlu1 %v2829_v59, %s2456_s2 }
  0xd4   : > { %1250 = vrot.lane.b32.xlu0 %v2833_v61, %s2455_s26  ;;  %1252 = vrot.lane.b32.xlu1 %v2260_v62, %s2455_s26 }
  0xd8   : > { %1248 = vrot.lane.b32.xlu0 %v2835_v63, %s2455_s26  ;;  %1353 = vrot.lane.b32.xlu1 %v2833_v61, %s2456_s2 }
  0xdc   : > { %1355 = vrot.lane.b32.xlu0 %v2260_v62, %s2456_s2  ;;  %1351 = vrot.lane.b32.xlu1 %v2835_v63, %s2456_s2 }
  0xe0   : > { %1462 = vrot.lane.b32.xlu0 %v2827_v58, %s2457_s25  ;;  %1464 = vrot.lane.b32.xlu1 %v2257_v60, %s2457_s25 }
  0xe4   : > { %1460 = vrot.lane.b32.xlu0 %v2829_v59, %s2457_s25  ;;  %1565 = vrot.lane.b32.xlu1 %v2827_v58, %s2458_s24 }
  0xe8   : > { %1567 = vrot.lane.b32.xlu0 %v2257_v60, %s2458_s24  ;;  %1563 = vrot.lane.b32.xlu1 %v2829_v59, %s2458_s24  ;;  %v2271_v60 = vld [vmem:[%s3079_s0 + $0x48] sm:$0xff]  }
  0xec   : > { %1456 = vrot.lane.b32.xlu0 %v2833_v61, %s2457_s25  ;;  %1458 = vrot.lane.b32.xlu1 %v2260_v62, %s2457_s25 }
  0xf0   : > { %1454 = vrot.lane.b32.xlu0 %v2835_v63, %s2457_s25  ;;  %1559 = vrot.lane.b32.xlu1 %v2833_v61, %s2458_s24 }
  0xf4   : > { %1561 = vrot.lane.b32.xlu0 %v2260_v62, %s2458_s24  ;;  %1557 = vrot.lane.b32.xlu1 %v2835_v63, %s2458_s24 }
  0xf8   : > { %1651 = vperm.xlu0 %2252, %v1645_v1   ;;  %1656 = vperm.xlu1 %2253, %v1646_v2  }
  0xfc   : > { %1666 = vperm.xlu0 %2252, %v1648_v3   ;;  %1661 = vperm.xlu1 %2253, %v1647_v4  }
 0x10a   : > { %v783_v5 = vpop.permute.xlu0 %782  ;;  %v781_v6 = vpop.permute.xlu1 %780 }
 0x10b   : > { %v789_v10 = vsel %vm786_vm0, %v781_v6, %v783_v5 }
 0x10e   : > { %v785_v7 = vpop.permute.xlu0 %784  ;;  %v777_v8 = vpop.permute.xlu1 %776 }
 0x10f   : > { %v790_v9 = vsel %vm786_vm0, %v783_v5, %v785_v7 }
 0x110   : > { %814 = vmatprep.subr.bf16.mxu0 %v790_v9  ;;  %2069 = vmatprep.subr.bf16.mxu1 %v790_v9 }
 0x111   : > { %815 = vmatpush1.bf16.msra.mxu0 %v789_v10  ;;  %2071 = vmatpush1.bf16.msra.mxu1 %v789_v10 }
 0x112   : > { %v779_v11 = vpop.permute.xlu0 %778  ;;  %v775_v12 = vpop.permute.xlu1 %774 }
 0x113   : > { %v788_v13 = vsel %vm786_vm0, %v777_v8, %v779_v11  ;;  %v787_v14 = vsel %vm786_vm0, %v775_v12, %v777_v8  ;;  %v2272_v8 = vld [vmem:[%s3079_s0 + $0x50] sm:$0xff]  }
 0x114   : > { %816 = vmatprep.subr.bf16.mxu0 %v788_v13  ;;  %2070 = vmatprep.subr.bf16.mxu1 %v788_v13  ;;  %v2273_v13 = vld [vmem:[%s3079_s0 + $0x60] sm:$0xff]  }
 0x115   : > { %817 = vmatpush1.bf16.msra.mxu0 %v787_v14  ;;  %2072 = vmatpush1.bf16.msra.mxu1 %v787_v14 }
 0x116   : > { %v948_v17 = vpop.permute.xlu0 %947  ;;  %883 = vmatprep.subr.bf16.mxu1 %v2827_v58  ;;  %v950_v18 = vpop.permute.xlu1 %949 }
 0x117   : > { %v955_v19 = vsel %vm951_vm1, %v948_v17, %v950_v18 }
 0x118   : > { %1982 = vmatmul.mubr.msk.bf16.vlgmr.msra.gmra.mxu0 %vm795_vm2, %v2262_v15  ;;  %1983 = vmatmul.mubr.msk.bf16.vlgmr.msra.gmra.mxu1 %vm795_vm2, %v2263_v16  ;;  %v2274_v16 = vld [vmem:[%s3079_s0 + $0x58] sm:$0xff]  }
 0x119   : > { %978 = vmatprep.subr.bf16.mxu0 %v955_v19  ;;  %884 = vmatpush1.bf16.msra.mxu1 %v2829_v59 }
 0x11a   : > { %v946_v20 = vpop.permute.xlu0 %945  ;;  %885 = vmatprep.subr.bf16.mxu1 %v2833_v61  ;;  %903 = vmatprep.mubr.bf16.mxu1 %v2451_v0  ;;  %v942_v22 = vpop.permute.xlu1 %941 }
 0x11b   : > { %v954_v21 = vsel %vm951_vm1, %v946_v20, %v948_v17  ;;  %998 = vmatprep.mubr.bf16.mxu0 %v2451_v0 }
 0x11c   : > { %979 = vmatpush1.bf16.msra.mxu0 %v954_v21  ;;  %v2275_v21 = vld [vmem:[%s3079_s0 + $0x68] sm:$0xff]  }
 0x11d   : > { %886 = vmatpush1.bf16.msra.mxu1 %v2835_v63 }
 0x11e   : > { %v944_v24 = vpop.permute.xlu0 %943  ;;  %v940_v25 = vpop.permute.xlu1 %939 }
 0x11f   : > { %v953_v26 = vsel %vm951_vm1, %v942_v22, %v944_v24  ;;  %v952_v27 = vsel %vm951_vm1, %v940_v25, %v942_v22 }
 0x120   : > { %980 = vmatprep.subr.bf16.mxu0 %v953_v26  ;;  %1986 = vmatmul.mubr.msk.bf16.vlgmr.msra.gmra.mxu1 %vm795_vm2, %v2264_v23 }
 0x121   : > { %981 = vmatpush1.bf16.msra.mxu0 %v952_v27  ;;  %913 = vmatprep.mubr.bf16.mxu1 %v2451_v0 }
 0x122   : > { %v1051_v29 = vpop.permute.xlu0 %1050  ;;  %v1053_v30 = vpop.permute.xlu1 %1052 }
 0x123   : > { %v1058_v31 = vsel %vm1054_vm3, %v1051_v29, %v1053_v30 }
 0x124   : > { %1994 = vmatmul.mubr.msk.bf16.vlgmr.msra.gmra.mxu0 %vm795_vm2, %v2265_v28  ;;  %1081 = vmatprep.subr.bf16.mxu1 %v1058_v31 }
 0x125   : > { %1008 = vmatprep.mubr.bf16.mxu0 %v2451_v0 }
 0x126   : > { %v1049_v33 = vpop.permute.xlu0 %1048  ;;  %v1154_v35 = vpop.permute.xlu1 %1153 }
 0x127   : > { %v1057_v34 = vsel %vm1054_vm3, %v1049_v33, %v1051_v29 }
 0x128   : > { %1082 = vmatpush1.bf16.msra.mxu1 %v1057_v34 }
 0x129   : > { %1987 = vmatmul.mubr.msk.bf16.gmra.mxu1 %vm795_vm2, %v2266_v32  ;;  %v2276_v32 = vld [vmem:[%s3079_s0 + $0x70] sm:$0xff]  }
 0x12a   : > { %v1156_v37 = vpop.permute.xlu0 %1155  ;;  %1101 = vmatprep.mubr.bf16.mxu1 %v2451_v0  ;;  %v1152_v38 = vpop.permute.xlu1 %1151 }
 0x12b   : > { %v1161_v39 = vsel %vm1157_vm4, %v1154_v35, %v1156_v37  ;;  %v1160_v40 = vsel %vm1157_vm4, %v1152_v38, %v1154_v35  ;;  %v2277_v37 = vld [vmem:[%s3079_s0 + $0x80] sm:$0xff]   ;;  %v2278_v38 = vld [vmem:[%s3079_s0 + $0x78] sm:$0xff]  }
 0x12c   : > { %1184 = vmatprep.subr.bf16.mxu0 %v1161_v39  ;;  %1995 = vmatmul.mubr.msk.bf16.gmra.mxu0 %vm795_vm2, %v2267_v36  ;;  %v2279_v39 = vld [vmem:[%s3079_s0 + $0x88] sm:$0xff]  }
 0x12d   : > { %1185 = vmatpush1.bf16.msra.mxu0 %v1160_v40  ;;  %1204 = vmatprep.mubr.bf16.mxu0 %v2451_v0 }
 0x12e   : > { %v1045_v41 = vpop.permute.xlu0 %1044  ;;  %v1047_v42 = vpop.permute.xlu1 %1046 }
 0x12f   : > { %v1056_v43 = vsel %vm1054_vm3, %v1045_v41, %v1047_v42 }
 0x130   : > { %1083 = vmatprep.subr.bf16.mxu1 %v1056_v43 }
 0x132   : > { %v1043_v44 = vpop.permute.xlu0 %1042  ;;  %v1148_v46 = vpop.permute.xlu1 %1147 }
 0x133   : > { %v1055_v45 = vsel %vm1054_vm3, %v1043_v44, %v1045_v41 }
 0x134   : > { %1084 = vmatpush1.bf16.msra.mxu1 %v1055_v45 }
 0x136   : > { %v1150_v48 = vpop.permute.xlu0 %1149  ;;  %v1146_v49 = vpop.permute.xlu1 %1145 }
 0x137   : > { %2002 = vmatmul.mubr.msk.bf16.vlgmr.msra.gmra.mxu1 %vm795_vm2, %v2268_v47  ;;  %v1159_v50 = vsel %vm1157_vm4, %v1148_v46, %v1150_v48  ;;  %v1158_v51 = vsel %vm1157_vm4, %v1146_v49, %v1148_v46 }
 0x138   : > { %1186 = vmatprep.subr.bf16.mxu0 %v1159_v50  ;;  %1111 = vmatprep.mubr.bf16.mxu1 %v2451_v0 }
 0x139   : > { %1187 = vmatpush1.bf16.msra.mxu0 %v1158_v51 }
 0x13a   : > { %v1257_v53 = vpop.permute.xlu0 %1256  ;;  %v1259_v54 = vpop.permute.xlu1 %1258 }
 0x13b   : > { %v1264_v56 = vsel %vm1260_vm5, %v1257_v53, %v1259_v54 }
 0x13c   : > { %2010 = vmatmul.mubr.msk.bf16.vlgmr.msra.gmra.mxu0 %vm795_vm2, %v2269_v52  ;;  %1287 = vmatprep.subr.bf16.mxu1 %v1264_v56 }
 0x13d   : > { %1214 = vmatprep.mubr.bf16.mxu0 %v2451_v0 }
 0x13e   : > { %v1255_v57 = vpop.permute.xlu0 %1254  ;;  %v1360_v59 = vpop.permute.xlu1 %1359 }
 0x13f   : > { %v1263_v58 = vsel %vm1260_vm5, %v1255_v57, %v1257_v53  ;;  %2003 = vmatmul.mubr.msk.bf16.gmra.mxu1 %vm795_vm2, %v2270_v55 }
 0x140   : > { %1288 = vmatpush1.bf16.msra.mxu1 %v1263_v58  ;;  %1307 = vmatprep.mubr.bf16.mxu1 %v2451_v0 }
 0x142   : > { %v1362_v61 = vpop.permute.xlu0 %1361  ;;  %v1358_v62 = vpop.permute.xlu1 %1357 }
 0x143   : > { %v1367_v63 = vsel %vm1363_vm6, %v1360_v59, %v1362_v61  ;;  %v1366_v1 = vsel %vm1363_vm6, %v1358_v62, %v1360_v59 }
 0x144   : > { %2011 = vmatmul.mubr.msk.bf16.gmra.mxu0 %vm795_vm2, %v2271_v60  ;;  %1390 = vmatprep.subr.bf16.mxu0 %v1367_v63 }
 0x145   : > { %1391 = vmatpush1.bf16.msra.mxu0 %v1366_v1  ;;  %1410 = vmatprep.mubr.bf16.mxu0 %v2451_v0 }
 0x146   : > { %v1251_v2 = vpop.permute.xlu0 %1250  ;;  %v1253_v3 = vpop.permute.xlu1 %1252 }
 0x147   : > { %v1262_v4 = vsel %vm1260_vm5, %v1251_v2, %v1253_v3 }
 0x148   : > { %1289 = vmatprep.subr.bf16.mxu1 %v1262_v4 }
 0x14a   : > { %v1249_v5 = vpop.permute.xlu0 %1248  ;;  %v1354_v7 = vpop.permute.xlu1 %1353 }
 0x14b   : > { %v1261_v6 = vsel %vm1260_vm5, %v1249_v5, %v1251_v2 }
 0x14c   : > { %1290 = vmatpush1.bf16.msra.mxu1 %v1261_v6 }
 0x14e   : > { %v1356_v9 = vpop.permute.xlu0 %1355  ;;  %v1352_v10 = vpop.permute.xlu1 %1351 }
 0x14f   : > { %2018 = vmatmul.mubr.msk.bf16.vlgmr.msra.gmra.mxu1 %vm795_vm2, %v2272_v8  ;;  %v1365_v11 = vsel %vm1363_vm6, %v1354_v7, %v1356_v9  ;;  %v1364_v12 = vsel %vm1363_vm6, %v1352_v10, %v1354_v7 }
 0x150   : > { %1392 = vmatprep.subr.bf16.mxu0 %v1365_v11  ;;  %1317 = vmatprep.mubr.bf16.mxu1 %v2451_v0 }
 0x151   : > { %1393 = vmatpush1.bf16.msra.mxu0 %v1364_v12 }
 0x152   : > { %v1463_v14 = vpop.permute.xlu0 %1462  ;;  %v1465_v15 = vpop.permute.xlu1 %1464 }
 0x153   : > { %v1470_v17 = vsel %vm1466_vm7, %v1463_v14, %v1465_v15 }
 0x154   : > { %2026 = vmatmul.mubr.msk.bf16.vlgmr.msra.gmra.mxu0 %vm795_vm2, %v2273_v13  ;;  %1493 = vmatprep.subr.bf16.mxu1 %v1470_v17 }
 0x155   : > { %1420 = vmatprep.mubr.bf16.mxu0 %v2451_v0 }
 0x156   : > { %v1461_v18 = vpop.permute.xlu0 %1460  ;;  %v1566_v20 = vpop.permute.xlu1 %1565 }
 0x157   : > { %v1469_v19 = vsel %vm1466_vm7, %v1461_v18, %v1463_v14  ;;  %2019 = vmatmul.mubr.msk.bf16.gmra.mxu1 %vm795_vm2, %v2274_v16 }
 0x158   : > { %1494 = vmatpush1.bf16.msra.mxu1 %v1469_v19  ;;  %1513 = vmatprep.mubr.bf16.mxu1 %v2451_v0 }
 0x15a   : > { %v1568_v22 = vpop.permute.xlu0 %1567  ;;  %v1564_v23 = vpop.permute.xlu1 %1563 }
 0x15b   : > { %v1573_v24 = vsel %vm1569_vm8, %v1566_v20, %v1568_v22  ;;  %v1572_v25 = vsel %vm1569_vm8, %v1564_v23, %v1566_v20 }
 0x15c   : > { %2027 = vmatmul.mubr.msk.bf16.gmra.mxu0 %vm795_vm2, %v2275_v21  ;;  %1596 = vmatprep.subr.bf16.mxu0 %v1573_v24 }
 0x15d   : > { %1597 = vmatpush1.bf16.msra.mxu0 %v1572_v25  ;;  %1616 = vmatprep.mubr.bf16.mxu0 %v2451_v0 }
 0x15e   : > { %v1457_v26 = vpop.permute.xlu0 %1456  ;;  %v1459_v27 = vpop.permute.xlu1 %1458 }
 0x15f   : > { %v1468_v28 = vsel %vm1466_vm7, %v1457_v26, %v1459_v27 }
 0x160   : > { %1495 = vmatprep.subr.bf16.mxu1 %v1468_v28 }
 0x162   : > { %v1455_v29 = vpop.permute.xlu0 %1454  ;;  %v1560_v31 = vpop.permute.xlu1 %1559 }
 0x163   : > { %v1467_v30 = vsel %vm1466_vm7, %v1455_v29, %v1457_v26 }
 0x164   : > { %1496 = vmatpush1.bf16.msra.mxu1 %v1467_v30 }
 0x166   : > { %v1562_v33 = vpop.permute.xlu0 %1561  ;;  %v1558_v34 = vpop.permute.xlu1 %1557 }
 0x167   : > { %2034 = vmatmul.mubr.msk.bf16.vlgmr.msra.gmra.mxu1 %vm795_vm2, %v2276_v32  ;;  %v1571_v35 = vsel %vm1569_vm8, %v1560_v31, %v1562_v33  ;;  %v1570_v36 = vsel %vm1569_vm8, %v1558_v34, %v1560_v31 }
 0x168   : > { %1598 = vmatprep.subr.bf16.mxu0 %v1571_v35  ;;  %1523 = vmatprep.mubr.bf16.mxu1 %v2451_v0 }
 0x169   : > { %1599 = vmatpush1.bf16.msra.mxu0 %v1570_v36 }
 0x16c   : > { %2042 = vmatmul.mubr.msk.bf16.vlgmr.msra.gmra.mxu0 %vm795_vm2, %v2277_v37 }
 0x16d   : > { %1626 = vmatprep.mubr.bf16.mxu0 %v2451_v0 }
 0x16f   : > { %2035 = vmatmul.mubr.msk.bf16.gmra.mxu1 %vm795_vm2, %v2278_v38 }
 0x174   : > { %2043 = vmatmul.mubr.msk.bf16.gmra.mxu0 %vm795_vm2, %v2279_v39 }
 0x1d8   : > { %v846_v40 = vpop.f32.mrf.mxu1  ;;  %v836_v41 = vpop.f32.mrf.mxu0 }
 0x1da   : > { %v3003_v42 = vpop.f32.mrf.mxu1  ;;  %v838_v43 = vpop.f32.mrf.mxu0 }
 0x1dc   : > { %v3005_v44 = vpop.f32.mrf.mxu1  ;;  %v840_v45 = vpop.f32.mrf.mxu0 }
 0x1de   : > { %v3007_v46 = vpop.f32.mrf.mxu1  ;;  %v842_v0 = vpop.f32.mrf.mxu0 }
 0x1e0   : > { %v905_v47 = vpop.f32.mrf.mxu1 }
 0x1e1   : > { %v906_v25 = vadd.f32 %v905_v47, %v836_v41 }
 0x1e2   : > { %v907_v48 = vpop.f32.mrf.mxu1 }
 0x1e3   : > { %v908_v26 = vadd.f32 %v907_v48, %v838_v43 }
 0x1e4   : > { %v909_v49 = vpop.f32.mrf.mxu1  ;;  %v1000_v50 = vpop.f32.mrf.mxu0 }
 0x1e5   : > { %v1019_v29 = vadd.f32 %v1000_v50, %v906_v25  ;;  %v910_v30 = vadd.f32 %v909_v49, %v840_v45 }
 0x1e6   : > { %v911_v51 = vpop.f32.mrf.mxu1  ;;  %v1002_v52 = vpop.f32.mrf.mxu0 }
 0x1e7   : > { %v1020_v31 = vadd.f32 %v1002_v52, %v908_v26  ;;  %v912_v34 = vadd.f32 %v911_v51, %v842_v0 }
 0x1e8   : > { %v1004_v53 = vpop.f32.mrf.mxu0 }
 0x1e9   : > { %v915_v54 = vpop.f32.mrf.mxu1  ;;  %v1021_v37 = vadd.f32 %v1004_v53, %v910_v30 }
 0x1ea   : > { %v1006_v55 = vpop.f32.mrf.mxu0  ;;  %v916_v36 = vadd.f32 %v915_v54, %v846_v40 }
 0x1eb   : > { %v917_v56 = vpop.f32.mrf.mxu1  ;;  %v1022_v47 = vadd.f32 %v1006_v55, %v912_v34 }
 0x1ec   : > { %v1010_v57 = vpop.f32.mrf.mxu0  ;;  %v918_v41 = vadd.f32 %v917_v56, %v3003_v42 }
 0x1ed   : > { %v919_v58 = vpop.f32.mrf.mxu1  ;;  %v1023_v25 = vadd.f32 %v1010_v57, %v916_v36 }
 0x1ee   : > { %v1012_v59 = vpop.f32.mrf.mxu0  ;;  %v920_v52 = vadd.f32 %v919_v58, %v3005_v44  ;;  %v1652_v58 = vpop.permute.xlu0 %1651 }
 0x1ef   : > { %v921_v60 = vpop.f32.mrf.mxu1 }
 0x1f0   : > { %v3009_v61 = vpop.f32.mrf.mxu0 }
 0x1f2   : > { %v3011_v1 = vpop.f32.mrf.mxu0 }
 0x1f7   : > { %v1103_v62 = vpop.f32.mrf.mxu1 }
 0x1f8   : > { %v1122_v35 = vadd.f32 %v1103_v62, %v1019_v29  ;;  %v922_v62 = vadd.f32 %v921_v60, %v3007_v46 }
 0x1f9   : > { %v1105_v63 = vpop.f32.mrf.mxu1 }
 0x1fa   : > { %v1123_v38 = vadd.f32 %v1105_v63, %v1020_v31  ;;  %v1024_v63 = vadd.f32 %v1012_v59, %v918_v41  ;;  %v1026_v46 = vadd.f32 %v3011_v1, %v922_v62 }
 0x1fb   : > { %v1107_v2 = vpop.f32.mrf.mxu1 }
 0x1fc   : > { %v1206_v3 = vpop.f32.mrf.mxu0  ;;  %v1124_v48 = vadd.f32 %v1107_v2, %v1021_v37 }
 0x1fd   : > { %v1109_v4 = vpop.f32.mrf.mxu1  ;;  %v1225_v39 = vadd.f32 %v1206_v3, %v1122_v35 }
 0x1fe   : > { %v1208_v5 = vpop.f32.mrf.mxu0  ;;  %v1125_v0 = vadd.f32 %v1109_v4, %v1022_v47 }
 0x1ff   : > { %v1113_v7 = vpop.f32.mrf.mxu1  ;;  %v1226_v45 = vadd.f32 %v1208_v5, %v1123_v38 }
 0x200   : > { %v1210_v6 = vpop.f32.mrf.mxu0  ;;  %v1126_v3 = vadd.f32 %v1113_v7, %v1023_v25 }
 0x201   : > { %v1115_v9 = vpop.f32.mrf.mxu1  ;;  %v1227_v51 = vadd.f32 %v1210_v6, %v1124_v48 }
 0x202   : > { %v1212_v8 = vpop.f32.mrf.mxu0  ;;  %v1127_v29 = vadd.f32 %v1115_v9, %v1024_v63 }
 0x203   : > { %v3013_v11 = vpop.f32.mrf.mxu1  ;;  %v1228_v56 = vadd.f32 %v1212_v8, %v1125_v0 }
 0x204   : > { %v1216_v10 = vpop.f32.mrf.mxu0 }
 0x205   : > { %v3017_v13 = vpop.f32.mrf.mxu1  ;;  %v1229_v44 = vadd.f32 %v1216_v10, %v1126_v3 }
 0x206   : > { %v3015_v12 = vpop.f32.mrf.mxu0 }
 0x207   : > { %v1230_v60 = vadd.f32 %v3015_v12, %v1127_v29 }
 0x208   : > { %v3019_v14 = vpop.f32.mrf.mxu0 }
 0x20a   : > { %v3021_v17 = vpop.f32.mrf.mxu0 }
 0x20b   : > { %3101 = vst [vmem:[#allocation6_spill] sm:$0xff] %v3021_v17 }
 0x20f   : > { %v1309_v15 = vpop.f32.mrf.mxu1 }
 0x210   : > { %v1328_v49 = vadd.f32 %v1309_v15, %v1225_v39  ;;  %v1025_v15 = vadd.f32 %v3009_v61, %v920_v52 }
 0x211   : > { %v1311_v16 = vpop.f32.mrf.mxu1 }
 0x212   : > { %v1329_v40 = vadd.f32 %v1311_v16, %v1226_v45  ;;  %v1128_v59 = vadd.f32 %v3013_v11, %v1025_v15  ;;  %v3102_v12 = vld [vmem:[#allocation6_spill] sm:$0xff] }
 0x213   : > { %v1313_v18 = vpop.f32.mrf.mxu1 }
 0x214   : > { %v1412_v19 = vpop.f32.mrf.mxu0  ;;  %v1330_v26 = vadd.f32 %v1313_v18, %v1227_v51  ;;  %v1657_v18 = vpop.permute.xlu1 %1656 }
 0x215   : > { %v1315_v20 = vpop.f32.mrf.mxu1  ;;  %v1431_v53 = vadd.f32 %v1412_v19, %v1328_v49 }
 0x216   : > { %v1414_v21 = vpop.f32.mrf.mxu0  ;;  %v1331_v4 = vadd.f32 %v1315_v20, %v1228_v56  ;;  %v1129_v20 = vadd.f32 %v3017_v13, %v1026_v46 }
 0x217   : > { %v1319_v23 = vpop.f32.mrf.mxu1  ;;  %v1432_v55 = vadd.f32 %v1414_v21, %v1329_v40 }
 0x218   : > { %v1416_v22 = vpop.f32.mrf.mxu0  ;;  %v1332_v7 = vadd.f32 %v1319_v23, %v1229_v44  ;;  %v1232_v23 = vadd.f32 %v3102_v12, %v1129_v20  ;;  %v1662_v52 = vpop.permute.xlu1 %1661 }
 0x219   : > { %v1321_v27 = vpop.f32.mrf.mxu1  ;;  %v1433_v6 = vadd.f32 %v1416_v22, %v1330_v26  ;;  %v1231_v22 = vadd.f32 %v3019_v14, %v1128_v59 }
 0x21a   : > { %v1418_v24 = vpop.f32.mrf.mxu0  ;;  %v1333_v34 = vadd.f32 %v1321_v27, %v1230_v60 }
 0x21b   : > { %v3023_v32 = vpop.f32.mrf.mxu1  ;;  %v1434_v21 = vadd.f32 %v1418_v24, %v1331_v4 }
 0x21c   : > { %v1422_v28 = vpop.f32.mrf.mxu0  ;;  %v1334_v39 = vadd.f32 %v3023_v32, %v1231_v22 }
 0x21d   : > { %v3027_v17 = vpop.f32.mrf.mxu1  ;;  %v1435_v35 = vadd.f32 %v1422_v28, %v1332_v7 }
 0x21e   : > { %v3025_v33 = vpop.f32.mrf.mxu0  ;;  %v1335_v28 = vadd.f32 %v3027_v17, %v1232_v23 }
 0x21f   : > { %v1436_v24 = vadd.f32 %v3025_v33, %v1333_v34 }
 0x220   : > { %v3030_v43 = vpop.f32.mrf.mxu0 }
 0x221   : > { %v1437_v49 = vadd.f32 %v3030_v43, %v1334_v39 }
 0x222   : > { %v1428_v42 = vpop.f32.mrf.mxu0 }
 0x223   : > { %v1438_v40 = vadd.f32 %v1428_v42, %v1335_v28  ;;  %v1667_v42 = vpop.permute.xlu0 %1666 }
 0x227   : > { %v1515_v50 = vpop.f32.mrf.mxu1 }
 0x228   : > { %v1534_v2 = vadd.f32 %v1515_v50, %v1431_v53 }
 0x229   : > { %v1517_v54 = vpop.f32.mrf.mxu1 }
 0x22a   : > { %v1535_v16 = vadd.f32 %v1517_v54, %v1432_v55 }
 0x22b   : > { %v1519_v5 = vpop.f32.mrf.mxu1 }
 0x22c   : > { %v1618_v57 = vpop.f32.mrf.mxu0  ;;  %v1536_v61 = vadd.f32 %v1519_v5, %v1433_v6 }
 0x22d   : > { %v1637_v19 = vadd.f32 %v1618_v57, %v1534_v2  ;;  %v1521_v30 = vpop.f32.mrf.mxu1 }
 0x22e   : > { %v1620_v8 = vpop.f32.mrf.mxu0  ;;  %v1537_v1 = vadd.f32 %v1521_v30, %v1434_v21 }
 0x22f   : > { %v1669_v9 = vadd.f32 %v1652_v58, %v1637_v19  ;;  %v1638_v10 = vadd.f32 %v1620_v8, %v1535_v16  ;;  %v1525_v31 = vpop.f32.mrf.mxu1 }
 0x230   : > { %v1622_v36 = vpop.f32.mrf.mxu0  ;;  %v1538_v41 = vadd.f32 %v1525_v31, %v1435_v35 }
 0x231   : > { %v1670_v37 = vadd.f32 %v1652_v58, %v1638_v10  ;;  %v1639_v11 = vadd.f32 %v1622_v36, %v1536_v61  ;;  %v1527_v38 = vpop.f32.mrf.mxu1  ;;  %v1677_v48 = vmax.f32 %v1669_v9, 0.0 }
 0x232   : > { %v1624_v47 = vpop.f32.mrf.mxu0  ;;  %v1539_v0 = vadd.f32 %v1527_v38, %v1436_v24 }
 0x233   : > { %v1678_v45 = vmax.f32 %v1670_v37, 0.0  ;;  %v1640_v13 = vadd.f32 %v1624_v47, %v1537_v1  ;;  %v1671_v14 = vadd.f32 %v1657_v18, %v1639_v11  ;;  %v1529_v27 = vpop.f32.mrf.mxu1 }
 0x234   : > { %v1628_v50 = vpop.f32.mrf.mxu0  ;;  %v1540_v33 = vadd.f32 %v1529_v27, %v1437_v49 }
 0x235   : > { %v2062_v25 = vpack.c.bf16 %v1678_v45, %v1677_v48  ;;  %v1672_v51 = vadd.f32 %v1657_v18, %v1640_v13  ;;  %v1641_v32 = vadd.f32 %v1628_v50, %v1538_v41  ;;  %v1531_v53 = vpop.f32.mrf.mxu1  ;;  %v1679_v62 = vmax.f32 %v1671_v14, 0.0 }
 0x236   : > { %v1630_v54 = vpop.f32.mrf.mxu0  ;;  %v1541_v26 = vadd.f32 %v1531_v53, %v1438_v40 }
 0x237   : > { %1709 = vst [vmem:[%s3046_s20] sm:$0xff] %v2062_v25  ;;  %v1680_v63 = vmax.f32 %v1672_v51, 0.0  ;;  %v1642_v17 = vadd.f32 %v1630_v54, %v1539_v0  ;;  %v1673_v43 = vadd.f32 %v1662_v52, %v1641_v32 }
 0x238   : > { %v1632_v3 = vpop.f32.mrf.mxu0 }
 0x239   : > { %v2063_v56 = vpack.c.bf16 %v1680_v63, %v1679_v62  ;;  %v1674_v55 = vadd.f32 %v1662_v52, %v1642_v17  ;;  %v1643_v2 = vadd.f32 %v1632_v3, %v1540_v33  ;;  %v1681_v15 = vmax.f32 %v1673_v43, 0.0 }
 0x23a   : > { %v1634_v5 = vpop.f32.mrf.mxu0 }
 0x23b   : > { %1710 = vst [vmem:[%s3046_s20 + $0x8] sm:$0xff] %v2063_v56  ;;  %v1682_v29 = vmax.f32 %v1674_v55, 0.0  ;;  %v1675_v44 = vadd.f32 %v1667_v42, %v1643_v2  ;;  %v1644_v57 = vadd.f32 %v1634_v5, %v1541_v26 }
 0x23d   : > { %v2064_v58 = vpack.c.bf16 %v1682_v29, %v1681_v15  ;;  %v1676_v4 = vadd.f32 %v1667_v42, %v1644_v57  ;;  %v1683_v6 = vmax.f32 %v1675_v44, 0.0 }
 0x23e   : > { %v1757_v30 = vld [vmem:[%s3046_s20] sm:$0xff] (%p2541_p8) }
 0x23f   : > { %1711 = vst [vmem:[%s3046_s20 + $0x10] sm:$0xff] %v2064_v58  ;;  %v1684_v16 = vmax.f32 %v1676_v4, 0.0  ;;  %1719 = sbr.rel (!%p2541_p8) target bundleno = 588 (0x24c), region = 147  ;;  %1758 = vst [vmem:[%s1722_s10] sm:$0xff] (%p2541_p8), %v1757_v30 }
 0x241   : > { %v2065_v19 = vpack.c.bf16 %v1684_v16, %v1683_v6 }
 0x242   : > { %v1759_v46 = vld [vmem:[%s3046_s20 + $0x8] sm:$0xff] (%p2541_p8) }
 0x243   : > { %1712 = vst [vmem:[%s3046_s20 + $0x18] sm:$0xff] %v2065_v19  ;;  %1760 = vst [vmem:[%s1722_s10 + $0x10] sm:$0xff] (%p2541_p8), %v1759_v46 }
 0x246   : > { %v1761_v59 = vld [vmem:[%s3046_s20 + $0x10] sm:$0xff] }
 0x247   : > { %1762 = vst [vmem:[%s1722_s10 + $0x20] sm:$0xff] %v1761_v59 }
 0x24a   : > { %v1763_v60 = vld [vmem:[%s3046_s20 + $0x18] sm:$0xff] }
 0x24b   : > { %1764 = vst [vmem:[%s1722_s10 + $0x30] sm:$0xff] %v1763_v60 }
 0x24c PF: > { %s3104_s19 = sld [smem:[#allocation5_spill]]  ;;  %p11_p8 = scmp.ge.s32.totalorder %s2511_s21, 4  }
 0x24d   : > { %s3105_s15 = smov %s2370_s16  ;;  %s3106_s16 = smov %s2536_s5 }
 0x24e   : > { %s3107_s17 = smov %s2378_s18  ;;  %13 = sbr.rel (!%p11_p8) target bundleno = 5 (0x5), region = 294 }
 0x252   : > { %s3108_s18 = smov %s3104_s19  ;;  %s3109_s19 = smov %s2511_s21 }

</bundles_post_ra>
